<compile_context>
chip_gen: v5e
topology: v5e:2x2
jax: 0.10.0
libtpu: 0.0.40
codegen_flags: <defaults>
</compile_context>

<pallas_src>
import functools

import jax
import jax.numpy as jnp
from jax import lax
from jax.experimental import pallas as pl
from jax.experimental.pallas import tpu as pltpu


def _round_up(x, m):
    return (x + m - 1) // m * m


def _pick_unroll(T):
    for u in (4, 2):
        if T % u == 0 and T // u >= 2:
            return u
    return 1


# ----------------------------------------------------------------------------
# Fused kernel: one grid step == one batch block's full forward pass.
# Refs: x, (w_ih, w_hh, b) per layer, w_heads, b_heads | out | gx, seq.
# ----------------------------------------------------------------------------
def _make_bilstm_kernel(T, H, num_layers, b_tile, out_width, unroll):
    G = 4 * H                       # per-direction gate width
    n_in = 1 + 3 * num_layers + 2   # number of input refs

    def kernel(*refs):
        x_ref = refs[0]             # (T, Bt, D_in), time-major, MXU dtype
        wh_ref = refs[n_in - 2]     # (2H, No)
        bh_ref = refs[n_in - 1]     # (1, No) f32
        out_ref = refs[n_in]        # (T, Bt, No) f32
        gx_ref = refs[n_in + 1]     # (T, Bt, 8H) f32 scratch (fw|bw gates)
        seq_ref = refs[n_in + 2]    # (T, Bt, 2H) f32 scratch ([h_fw | h_bw])

        mx = wh_ref.dtype           # MXU operand dtype (bf16 by default)

        def run_layer(inp_mx, wih_ref, whh_ref, b_ref):
            # Hoisted input projection for BOTH directions at once:
            # one (T*Bt, d_in) @ (d_in, 8H) MXU matmul + f32 bias.
            gx_ref[...] = (
                jnp.dot(inp_mx, wih_ref[...],
                        preferred_element_type=jnp.float32)
                + b_ref[...]
            ).reshape(T, b_tile, 2 * G)

            whh_f = whh_ref[0]      # (H, 4H), i/f/o columns pre-scaled by 1/2
            whh_b = whh_ref[1]

            def cell(a, c):
                # a = tanh(gates); sigmoid(x) = 0.5 + 0.5*tanh(x/2) (the 1/2
                # was folded into the weights/bias for the i/f/o columns).
                # NOTE: with H=32 these slices are 32-lane; for real configs
                # pick H a multiple of 128 for full VPU lane utilization.
                i = 0.5 + 0.5 * a[:, 0 * H:1 * H]
                f = 0.5 + 0.5 * a[:, 1 * H:2 * H]
                g = a[:, 2 * H:3 * H]
                o = 0.5 + 0.5 * a[:, 3 * H:4 * H]
                c = f * c + i * g                 # float32 state
                h = o * jnp.tanh(c)               # float32 state
                return h, c

            def step(t, carry):
                h_f, c_f, h_b, c_b = carry
                t_f = t
                t_b = T - 1 - t
                # fw + bw issued back-to-back: independent chains overlap.
                g_f = gx_ref[t_f, :, 0:G] + jnp.dot(
                    h_f.astype(mx), whh_f, preferred_element_type=jnp.float32)
                g_b = gx_ref[t_b, :, G:2 * G] + jnp.dot(
                    h_b.astype(mx), whh_b, preferred_element_type=jnp.float32)
                a_f = jnp.tanh(g_f)               # one full-width EUP push
                a_b = jnp.tanh(g_b)
                h_f, c_f = cell(a_f, c_f)
                h_b, c_b = cell(a_b, c_b)
                seq_ref[t_f, :, 0:H] = h_f        # VMEM, not HBM
                seq_ref[t_b, :, H:2 * H] = h_b
                return h_f, c_f, h_b, c_b

            z = jnp.zeros((b_tile, H), jnp.float32)

            def body(it, carry):
                # Modest manual unroll inside fori_loop: LLO scheduling
                # visibility without the unbounded live ranges of a full
                # static Python unroll.
                for k in range(unroll):
                    carry = step(it * unroll + k, carry)
                return carry

            lax.fori_loop(0, T // unroll, body, (z, z, z, z))

        # Layer 0 input already in the MXU dtype (cast once in the wrapper).
        inp_mx = x_ref[...].reshape(T * b_tile, x_ref.shape[-1])
        for layer in range(num_layers):
            run_layer(inp_mx, refs[1 + 3 * layer], refs[2 + 3 * layer],
                      refs[3 + 3 * layer])
            # Next consumer's input = bidirectional h sequence; cast once.
            inp_mx = seq_ref[...].reshape(T * b_tile, 2 * H).astype(mx)
            # TODO(synk): training-mode inter-layer dropout(0.1) not
            # implemented (eval() semantics => identity).

        # Fused heads: one (T*Bt, 2H) @ (2H, No) matmul + sigmoid, written as
        # a single lane-dense slab (notes/instr split in the wrapper).
        logits = jnp.dot(inp_mx, wh_ref[...],
                         preferred_element_type=jnp.float32) + bh_ref[...]
        out_ref[...] = jax.nn.sigmoid(logits).reshape(
            T, b_tile, out_width).astype(out_ref.dtype)

    return kernel


# ----------------------------------------------------------------------------
# Parameter construction (PyTorch-style U(-1/sqrt(H), 1/sqrt(H)) init),
# stored canonically (per-direction, gate order [i, f, g, o]):
#   w_ih: (2, D_in, 4H)   w_hh: (2, H, 4H)   b: (2, 1, 4H) (= b_ih + b_hh)
#   w_heads/b_heads: the two Linear heads concatenated on the output dim.
# ----------------------------------------------------------------------------
def init_params(key, input_size, hidden, num_layers, num_notes, num_instr,
                dtype=jnp.bfloat16):
    H = hidden

    def uni(k, shape, bound):
        return jax.random.uniform(k, shape, jnp.float32, -bound, bound)

    kb = 1.0 / float(H) ** 0.5
    layers = []
    for layer in range(num_layers):
        d_in = input_size if layer == 0 else 2 * H
        key, *ks = jax.random.split(key, 9)
        w_ih = jnp.stack([uni(ks[0], (d_in, 4 * H), kb),
                          uni(ks[1], (d_in, 4 * H), kb)]).astype(dtype)
        w_hh = jnp.stack([uni(ks[2], (H, 4 * H), kb),
                          uni(ks[3], (H, 4 * H), kb)]).astype(dtype)
        b = jnp.stack([
            (uni(ks[4], (4 * H,), kb) + uni(ks[5], (4 * H,), kb))[None, :],
            (uni(ks[6], (4 * H,), kb) + uni(ks[7], (4 * H,), kb))[None, :],
        ]).astype(dtype)
        layers.append({"w_ih": w_ih, "w_hh": w_hh, "b": b})

    kf = 1.0 / float(2 * H) ** 0.5
    key, k1, k2, k3, k4 = jax.random.split(key, 5)
    w_heads = jnp.concatenate([uni(k1, (2 * H, num_notes), kf),
                               uni(k3, (2 * H, num_instr), kf)],
                              axis=1).astype(dtype)
    b_heads = jnp.concatenate([uni(k2, (1, num_notes), kf),
                               uni(k4, (1, num_instr), kf)],
                              axis=1).astype(dtype)
    return {"lstm": layers, "w_heads": w_heads, "b_heads": b_heads}


# ----------------------------------------------------------------------------
# Full forward pass: single pallas_call over batch blocks.
# ----------------------------------------------------------------------------
@functools.partial(jax.jit,
                   static_argnames=("hidden", "num_notes", "num_instr",
                                    "b_tile"))
def bilstm_forward(params, x, hidden, num_notes, num_instr, b_tile=16):
    """x: (B, T, input_size) float32, batch_first like the PyTorch module."""
    B, T, D = x.shape
    H = hidden
    No = num_notes + num_instr
    num_layers = len(params["lstm"])
    w_dtype = params["w_heads"].dtype

    # ---- batch blocking + time-major, MXU-dtype input ----------------------
    B_pad = _round_up(B, b_tile)
    if B_pad != B:
        x = jnp.pad(x, ((0, B_pad - B), (0, 0), (0, 0)))
    x_k = jnp.transpose(x, (1, 0, 2)).astype(w_dtype)      # (T, B_pad, D)

    # ---- fold sigmoid-via-tanh 1/2 into i/f/o columns, fuse fw|bw W_ih -----
    gate_scale = jnp.concatenate([
        jnp.full((H,), 0.5, jnp.float32), jnp.full((H,), 0.5, jnp.float32),
        jnp.ones((H,), jnp.float32), jnp.full((H,), 0.5, jnp.float32)])
    ops = []
    for lp in params["lstm"]:
        w_ih = jnp.concatenate([lp["w_ih"][0], lp["w_ih"][1]], axis=-1)
        w_ih = (w_ih.astype(jnp.float32)
                * jnp.tile(gate_scale, 2)[None, :]).astype(w_dtype)   # (d,8H)
        w_hh = (lp["w_hh"].astype(jnp.float32)
                * gate_scale[None, None, :]).astype(w_dtype)          # (2,H,4H)
        b = (jnp.concatenate([lp["b"][0], lp["b"][1]], axis=-1)
             .astype(jnp.float32) * jnp.tile(gate_scale, 2)[None, :]) # (1,8H)
        ops.append((w_ih, w_hh, b))
    w_heads = params["w_heads"].astype(w_dtype)            # (2H, No)
    b_heads = params["b_heads"].astype(jnp.float32)        # (1, No)

    # ---- pallas_call --------------------------------------------------------
    unroll = _pick_unroll(T)
    kernel = _make_bilstm_kernel(T, H, num_layers, b_tile, No, unroll)

    in_specs = [pl.BlockSpec((T, b_tile, D), lambda i: (0, i, 0))]
    inputs = [x_k]
    for (w_ih, w_hh, b) in ops:
        in_specs += [
            pl.BlockSpec(w_ih.shape, lambda i: (0, 0)),    # VMEM-resident
            pl.BlockSpec(w_hh.shape, lambda i: (0, 0, 0)),
            pl.BlockSpec(b.shape, lambda i: (0, 0)),
        ]
        inputs += [w_ih, w_hh, b]
    in_specs += [pl.BlockSpec(w_heads.shape, lambda i: (0, 0)),
                 pl.BlockSpec(b_heads.shape, lambda i: (0, 0))]
    inputs += [w_heads, b_heads]

    out = pl.pallas_call(
        kernel,
        out_shape=jax.ShapeDtypeStruct((T, B_pad, No), jnp.float32),
        grid_spec=pltpu.PrefetchScalarGridSpec(
            num_scalar_prefetch=0,
            grid=(B_pad // b_tile,),
            in_specs=in_specs,
            out_specs=pl.BlockSpec((T, b_tile, No), lambda i: (0, i, 0)),
            scratch_shapes=[
                pltpu.VMEM((T, b_tile, 8 * H), jnp.float32),  # hoisted x@W_ih
                pltpu.VMEM((T, b_tile, 2 * H), jnp.float32),  # [h_fw | h_bw]
            ],
        ),
        compiler_params=pltpu.CompilerParams(
            # Batch blocks are independent; on v7x the two TensorCores split
            # the (>=2-step) grid. On v5e/v6e (single TC) this is a serial
            # loop - the win there is the batch-blocked matmul shape.
            dimension_semantics=("parallel",),
            # Explicit cap with headroom for v7x's 64 MiB per-TC VMEM.
            vmem_limit_bytes=48 * 1024 * 1024,
        ),
    )(*inputs)

    probs = jnp.transpose(out, (1, 0, 2))[:B]              # (B, T, No) f32
    return probs[..., :num_notes], probs[..., num_notes:]


# ----------------------------------------------------------------------------
# Pure-JAX reference (lax.scan) for a structural sanity check.
# ----------------------------------------------------------------------------
def reference_forward(params, x, hidden, num_notes):
    B, T, _ = x.shape
    H = hidden
    h = x.astype(jnp.float32)
    for lp in params["lstm"]:
        outs = []
        for d in range(2):
            w_ih = lp["w_ih"][d].astype(jnp.float32)
            w_hh = lp["w_hh"][d].astype(jnp.float32)
            b = lp["b"][d].astype(jnp.float32)

            def step(carry, x_t, w_ih=w_ih, w_hh=w_hh, b=b):
                h_t, c_t = carry
                g = x_t @ w_ih + h_t @ w_hh + b
                i = jax.nn.sigmoid(g[:, :H])
                f = jax.nn.sigmoid(g[:, H:2 * H])
                gg = jnp.tanh(g[:, 2 * H:3 * H])
                o = jax.nn.sigmoid(g[:, 3 * H:])
                c_t = f * c_t + i * gg
                h_t = o * jnp.tanh(c_t)
                return (h_t, c_t), h_t

            xs = jnp.transpose(h, (1, 0, 2))               # (T, B, D_in)
            if d == 1:
                xs = xs[::-1]
            init = (jnp.zeros((B, H), jnp.float32),
                    jnp.zeros((B, H), jnp.float32))
            _, ys = lax.scan(step, init, xs)
            if d == 1:
                ys = ys[::-1]
            outs.append(ys)
        h = jnp.transpose(jnp.concatenate(outs, axis=-1), (1, 0, 2))
    logits = (h.reshape(B * T, 2 * H) @ params["w_heads"].astype(jnp.float32)
              + params["b_heads"].astype(jnp.float32))
    probs = jax.nn.sigmoid(logits).reshape(B, T, -1)
    return probs[..., :num_notes], probs[..., num_notes:]


if __name__ == "__main__":
    # Small shapes, but big enough to exercise batch blocking (2 grid steps).
    B, T = 32, 8
    INPUT_SIZE, HIDDEN = 32, 32
    NUM_LAYERS, NUM_NOTES, NUM_INSTR = 2, 16, 16

    key = jax.random.PRNGKey(0)
    key, pkey, xkey = jax.random.split(key, 3)
    params = init_params(pkey, INPUT_SIZE, HIDDEN, NUM_LAYERS,
                         NUM_NOTES, NUM_INSTR)      # bf16 weights by default
    x = jax.random.normal(xkey, (B, T, INPUT_SIZE), jnp.float32)

    notes_out, instr_out = bilstm_forward(params, x, HIDDEN,
                                          NUM_NOTES, NUM_INSTR)
    jax.block_until_ready((notes_out, instr_out))

    assert notes_out.shape == (B, T, NUM_NOTES)
    assert instr_out.shape == (B, T, NUM_INSTR)
    assert bool(jnp.all(jnp.isfinite(notes_out)))
    assert bool(jnp.all((notes_out >= 0) & (notes_out <= 1)))
    assert bool(jnp.all((instr_out >= 0) & (instr_out <= 1)))

    # Structural sanity check against a pure-JAX (f32 math) reference using
    # the same (bf16-stored) weights; loose tolerance covers bf16 MXU inputs.
    ref_notes, ref_instr = reference_forward(params, x, HIDDEN, NUM_NOTES)
    err = max(float(jnp.max(jnp.abs(notes_out - ref_notes))),
              float(jnp.max(jnp.abs(instr_out - ref_instr))))
    assert err < 3e-2, f"max abs err {err}"

    print("KERNEL_OK")
</pallas_src>

<mosaic_0001>
module attributes {stable_mosaic.version = 11 : i64} {
  func.func @kernel(%arg0: i32, %arg1: memref<8x16x32xbf16, #tpu.memory_space<vmem>>, %arg2: memref<32x256xbf16, #tpu.memory_space<vmem>>, %arg3: memref<2x32x128xbf16, #tpu.memory_space<vmem>>, %arg4: memref<1x256xf32, #tpu.memory_space<vmem>>, %arg5: memref<64x256xbf16, #tpu.memory_space<vmem>>, %arg6: memref<2x32x128xbf16, #tpu.memory_space<vmem>>, %arg7: memref<1x256xf32, #tpu.memory_space<vmem>>, %arg8: memref<64x32xbf16, #tpu.memory_space<vmem>>, %arg9: memref<1x32xf32, #tpu.memory_space<vmem>>, %arg10: memref<8x16x32xf32, #tpu.memory_space<vmem>>, %arg11: memref<8x16x256xf32, #tpu.memory_space<vmem>>, %arg12: memref<8x16x64xf32, #tpu.memory_space<vmem>>) attributes {dimension_semantics = [#tpu.dimension_semantics<parallel>], iteration_bounds = array<i64: 2>, scalar_prefetch = 0 : i64, scratch_operands = 2 : i64, tpu.core_type = #tpu.core_type<tc>, window_params = [{transform_indices = @transform_0, window_bounds = array<i64: 8, 16, 32>}, {pipeline_mode = #tpu.pipeline_mode<synchronous>, transform_indices = @transform_1, window_bounds = array<i64: 32, 256>}, {pipeline_mode = #tpu.pipeline_mode<synchronous>, transform_indices = @transform_2, window_bounds = array<i64: 2, 32, 128>}, {pipeline_mode = #tpu.pipeline_mode<synchronous>, transform_indices = @transform_3, window_bounds = array<i64: 1, 256>}, {pipeline_mode = #tpu.pipeline_mode<synchronous>, transform_indices = @transform_4, window_bounds = array<i64: 64, 256>}, {pipeline_mode = #tpu.pipeline_mode<synchronous>, transform_indices = @transform_5, window_bounds = array<i64: 2, 32, 128>}, {pipeline_mode = #tpu.pipeline_mode<synchronous>, transform_indices = @transform_6, window_bounds = array<i64: 1, 256>}, {pipeline_mode = #tpu.pipeline_mode<synchronous>, transform_indices = @transform_7, window_bounds = array<i64: 64, 32>}, {pipeline_mode = #tpu.pipeline_mode<synchronous>, transform_indices = @transform_8, window_bounds = array<i64: 1, 32>}, {transform_indices = @transform_9, window_bounds = array<i64: 8, 16, 32>}]} {
    %c0 = arith.constant 0 : index
    %c0_0 = arith.constant 0 : index
    %c0_1 = arith.constant 0 : index
    %0 = vector.load %arg1[%c0, %c0_0, %c0_1] : memref<8x16x32xbf16, #tpu.memory_space<vmem>>, vector<8x16x32xbf16>
    %1 = vector.shape_cast %0 : vector<8x16x32xbf16> to vector<128x32xbf16>
    %c0_2 = arith.constant 0 : index
    %c0_3 = arith.constant 0 : index
    %2 = vector.load %arg2[%c0_2, %c0_3] : memref<32x256xbf16, #tpu.memory_space<vmem>>, vector<32x256xbf16>
    %cst = arith.constant dense<0.000000e+00> : vector<128x256xf32>
    %3 = tpu.matmul %1, %2, %cst {dimension_numbers = #tpu.dot_dimension_numbers<[1], [0], [0], [1], [0, 0, 1, 1], [], []>} : vector<128x32xbf16>, vector<32x256xbf16>, vector<128x256xf32> -> vector<128x256xf32>
    %c0_4 = arith.constant 0 : index
    %c0_5 = arith.constant 0 : index
    %4 = vector.load %arg4[%c0_4, %c0_5] : memref<1x256xf32, #tpu.memory_space<vmem>>, vector<1x256xf32>
    %5 = vector.broadcast %4 : vector<1x256xf32> to vector<128x256xf32>
    %6 = arith.addf %3, %5 : vector<128x256xf32>
    %7 = vector.shape_cast %6 : vector<128x256xf32> to vector<8x16x256xf32>
    %c0_6 = arith.constant 0 : index
    %c0_7 = arith.constant 0 : index
    %c0_8 = arith.constant 0 : index
    %8 = vector.load %arg11[%c0_6, %c0_7, %c0_8] : memref<8x16x256xf32, #tpu.memory_space<vmem>>, vector<8x16x256xf32>
    tpu.vector_store %arg11[%c0_6, %c0_7, %c0_8], %7 {strides = array<i32>} : memref<8x16x256xf32, #tpu.memory_space<vmem>>, vector<8x16x256xf32>,
    %c0_9 = arith.constant 0 : index
    %c0_10 = arith.constant 0 : index
    %c0_11 = arith.constant 0 : index
    %9 = vector.load %arg3[%c0_9, %c0_10, %c0_11] : memref<2x32x128xbf16, #tpu.memory_space<vmem>>, vector<1x32x128xbf16>
    %10 = vector.shape_cast %9 : vector<1x32x128xbf16> to vector<32x128xbf16>
    %c1 = arith.constant 1 : index
    %c0_12 = arith.constant 0 : index
    %c0_13 = arith.constant 0 : index
    %11 = vector.load %arg3[%c1, %c0_12, %c0_13] : memref<2x32x128xbf16, #tpu.memory_space<vmem>>, vector<1x32x128xbf16>
    %12 = vector.shape_cast %11 : vector<1x32x128xbf16> to vector<32x128xbf16>
    %cst_14 = arith.constant 0.000000e+00 : f32
    %13 = vector.broadcast %cst_14 : f32 to vector<16x32xf32>
    %c0_i32 = arith.constant 0 : i32
    %c2_i32 = arith.constant 2 : i32
    %14 = arith.addi %c0_i32, %c2_i32 : i32
    %c1_i32 = arith.constant 1 : i32
    %15:4 = scf.for %arg13 = %c0_i32 to %14 step %c1_i32 iter_args(%arg14 = %13, %arg15 = %13, %arg16 = %13, %arg17 = %13) -> (vector<16x32xf32>, vector<16x32xf32>, vector<16x32xf32>, vector<16x32xf32>)  : i32 {
      %c4_i32 = arith.constant 4 : i32
      %48 = arith.muli %arg13, %c4_i32 : i32
      %c0_i32_50 = arith.constant 0 : i32
      %49 = arith.addi %48, %c0_i32_50 : i32
      %c7_i32 = arith.constant 7 : i32
      %50 = arith.subi %c7_i32, %49 : i32
      %51 = arith.index_cast %49 : i32 to index
      %c0_51 = arith.constant 0 : index
      %c0_52 = arith.constant 0 : index
      %52 = vector.load %arg11[%51, %c0_51, %c0_52] : memref<8x16x256xf32, #tpu.memory_space<vmem>>, vector<1x16x128xf32>
      %53 = vector.shape_cast %52 : vector<1x16x128xf32> to vector<16x128xf32>
      %54 = arith.truncf %arg14 : vector<16x32xf32> to vector<16x32xbf16>
      %cst_53 = arith.constant dense<0.000000e+00> : vector<16x128xf32>
      %55 = tpu.matmul %54, %10, %cst_53 {dimension_numbers = #tpu.dot_dimension_numbers<[1], [0], [0], [1], [0, 0, 1, 1], [], []>} : vector<16x32xbf16>, vector<32x128xbf16>, vector<16x128xf32> -> vector<16x128xf32>
      %56 = arith.addf %53, %55 : vector<16x128xf32>
      %57 = arith.index_cast %50 : i32 to index
      %c0_54 = arith.constant 0 : index
      %c128 = arith.constant 128 : index
      %58 = vector.load %arg11[%57, %c0_54, %c128] : memref<8x16x256xf32, #tpu.memory_space<vmem>>, vector<1x16x128xf32>
      %59 = vector.shape_cast %58 : vector<1x16x128xf32> to vector<16x128xf32>
      %60 = arith.truncf %arg16 : vector<16x32xf32> to vector<16x32xbf16>
      %cst_55 = arith.constant dense<0.000000e+00> : vector<16x128xf32>
      %61 = tpu.matmul %60, %12, %cst_55 {dimension_numbers = #tpu.dot_dimension_numbers<[1], [0], [0], [1], [0, 0, 1, 1], [], []>} : vector<16x32xbf16>, vector<32x128xbf16>, vector<16x128xf32> -> vector<16x128xf32>
      %62 = arith.addf %59, %61 : vector<16x128xf32>
      %63 = math.tanh %56 : vector<16x128xf32>
      %64 = math.tanh %62 : vector<16x128xf32>
      %65 = vector.extract_strided_slice %63 {offsets = [0, 0], sizes = [16, 32], strides = [1, 1]} : vector<16x128xf32> to vector<16x32xf32>
      %cst_56 = arith.constant 5.000000e-01 : f32
      %66 = vector.broadcast %cst_56 : f32 to vector<16x32xf32>
      %67 = arith.mulf %66, %65 : vector<16x32xf32>
      %cst_57 = arith.constant 5.000000e-01 : f32
      %68 = vector.broadcast %cst_57 : f32 to vector<16x32xf32>
      %69 = arith.addf %68, %67 : vector<16x32xf32>
      %70 = vector.extract_strided_slice %63 {offsets = [0, 32], sizes = [16, 32], strides = [1, 1]} : vector<16x128xf32> to vector<16x32xf32>
      %cst_58 = arith.constant 5.000000e-01 : f32
      %71 = vector.broadcast %cst_58 : f32 to vector<16x32xf32>
      %72 = arith.mulf %71, %70 : vector<16x32xf32>
      %cst_59 = arith.constant 5.000000e-01 : f32
      %73 = vector.broadcast %cst_59 : f32 to vector<16x32xf32>
      %74 = arith.addf %73, %72 : vector<16x32xf32>
      %75 = vector.extract_strided_slice %63 {offsets = [0, 64], sizes = [16, 32], strides = [1, 1]} : vector<16x128xf32> to vector<16x32xf32>
      %76 = vector.extract_strided_slice %63 {offsets = [0, 96], sizes = [16, 32], strides = [1, 1]} : vector<16x128xf32> to vector<16x32xf32>
      %cst_60 = arith.constant 5.000000e-01 : f32
      %77 = vector.broadcast %cst_60 : f32 to vector<16x32xf32>
      %78 = arith.mulf %77, %76 : vector<16x32xf32>
      %cst_61 = arith.constant 5.000000e-01 : f32
      %79 = vector.broadcast %cst_61 : f32 to vector<16x32xf32>
      %80 = arith.addf %79, %78 : vector<16x32xf32>
      %81 = arith.mulf %74, %arg15 : vector<16x32xf32>
      %82 = arith.mulf %69, %75 : vector<16x32xf32>
      %83 = arith.addf %81, %82 : vector<16x32xf32>
      %84 = math.tanh %83 : vector<16x32xf32>
      %85 = arith.mulf %80, %84 : vector<16x32xf32>
      %86 = vector.extract_strided_slice %64 {offsets = [0, 0], sizes = [16, 32], strides = [1, 1]} : vector<16x128xf32> to vector<16x32xf32>
      %cst_62 = arith.constant 5.000000e-01 : f32
      %87 = vector.broadcast %cst_62 : f32 to vector<16x32xf32>
      %88 = arith.mulf %87, %86 : vector<16x32xf32>
      %cst_63 = arith.constant 5.000000e-01 : f32
      %89 = vector.broadcast %cst_63 : f32 to vector<16x32xf32>
      %90 = arith.addf %89, %88 : vector<16x32xf32>
      %91 = vector.extract_strided_slice %64 {offsets = [0, 32], sizes = [16, 32], strides = [1, 1]} : vector<16x128xf32> to vector<16x32xf32>
      %cst_64 = arith.constant 5.000000e-01 : f32
      %92 = vector.broadcast %cst_64 : f32 to vector<16x32xf32>
      %93 = arith.mulf %92, %91 : vector<16x32xf32>
      %cst_65 = arith.constant 5.000000e-01 : f32
      %94 = vector.broadcast %cst_65 : f32 to vector<16x32xf32>
      %95 = arith.addf %94, %93 : vector<16x32xf32>
      %96 = vector.extract_strided_slice %64 {offsets = [0, 64], sizes = [16, 32], strides = [1, 1]} : vector<16x128xf32> to vector<16x32xf32>
      %97 = vector.extract_strided_slice %64 {offsets = [0, 96], sizes = [16, 32], strides = [1, 1]} : vector<16x128xf32> to vector<16x32xf32>
      %cst_66 = arith.constant 5.000000e-01 : f32
      %98 = vector.broadcast %cst_66 : f32 to vector<16x32xf32>
      %99 = arith.mulf %98, %97 : vector<16x32xf32>
      %cst_67 = arith.constant 5.000000e-01 : f32
      %100 = vector.broadcast %cst_67 : f32 to vector<16x32xf32>
      %101 = arith.addf %100, %99 : vector<16x32xf32>
      %102 = arith.mulf %95, %arg17 : vector<16x32xf32>
      %103 = arith.mulf %90, %96 : vector<16x32xf32>
      %104 = arith.addf %102, %103 : vector<16x32xf32>
      %105 = math.tanh %104 : vector<16x32xf32>
      %106 = arith.mulf %101, %105 : vector<16x32xf32>
      %107 = arith.index_cast %49 : i32 to index
      %c0_68 = arith.constant 0 : index
      %c0_69 = arith.constant 0 : index
      %108 = vector.load %arg12[%107, %c0_68, %c0_69] : memref<8x16x64xf32, #tpu.memory_space<vmem>>, vector<1x16x32xf32>
      %109 = vector.shape_cast %108 : vector<1x16x32xf32> to vector<16x32xf32>
      %110 = vector.shape_cast %85 : vector<16x32xf32> to vector<1x16x32xf32>
      tpu.vector_store %arg12[%107, %c0_68, %c0_69], %110 {strides = array<i32>} : memref<8x16x64xf32, #tpu.memory_space<vmem>>, vector<1x16x32xf32>,
      %111 = arith.index_cast %50 : i32 to index
      %c0_70 = arith.constant 0 : index
      %c32 = arith.constant 32 : index
      %112 = vector.load %arg12[%111, %c0_70, %c32] : memref<8x16x64xf32, #tpu.memory_space<vmem>>, vector<1x16x32xf32>
      %113 = vector.shape_cast %112 : vector<1x16x32xf32> to vector<16x32xf32>
      %114 = vector.shape_cast %106 : vector<16x32xf32> to vector<1x16x32xf32>
      tpu.vector_store %arg12[%111, %c0_70, %c32], %114 {strides = array<i32>} : memref<8x16x64xf32, #tpu.memory_space<vmem>>, vector<1x16x32xf32>,
      %c4_i32_71 = arith.constant 4 : i32
      %115 = arith.muli %arg13, %c4_i32_71 : i32
      %c1_i32_72 = arith.constant 1 : i32
      %116 = arith.addi %115, %c1_i32_72 : i32
      %c7_i32_73 = arith.constant 7 : i32
      %117 = arith.subi %c7_i32_73, %116 : i32
      %118 = arith.index_cast %116 : i32 to index
      %c0_74 = arith.constant 0 : index
      %c0_75 = arith.constant 0 : index
      %119 = vector.load %arg11[%118, %c0_74, %c0_75] : memref<8x16x256xf32, #tpu.memory_space<vmem>>, vector<1x16x128xf32>
      %120 = vector.shape_cast %119 : vector<1x16x128xf32> to vector<16x128xf32>
      %121 = arith.truncf %85 : vector<16x32xf32> to vector<16x32xbf16>
      %cst_76 = arith.constant dense<0.000000e+00> : vector<16x128xf32>
      %122 = tpu.matmul %121, %10, %cst_76 {dimension_numbers = #tpu.dot_dimension_numbers<[1], [0], [0], [1], [0, 0, 1, 1], [], []>} : vector<16x32xbf16>, vector<32x128xbf16>, vector<16x128xf32> -> vector<16x128xf32>
      %123 = arith.addf %120, %122 : vector<16x128xf32>
      %124 = arith.index_cast %117 : i32 to index
      %c0_77 = arith.constant 0 : index
      %c128_78 = arith.constant 128 : index
      %125 = vector.load %arg11[%124, %c0_77, %c128_78] : memref<8x16x256xf32, #tpu.memory_space<vmem>>, vector<1x16x128xf32>
      %126 = vector.shape_cast %125 : vector<1x16x128xf32> to vector<16x128xf32>
      %127 = arith.truncf %106 : vector<16x32xf32> to vector<16x32xbf16>
      %cst_79 = arith.constant dense<0.000000e+00> : vector<16x128xf32>
      %128 = tpu.matmul %127, %12, %cst_79 {dimension_numbers = #tpu.dot_dimension_numbers<[1], [0], [0], [1], [0, 0, 1, 1], [], []>} : vector<16x32xbf16>, vector<32x128xbf16>, vector<16x128xf32> -> vector<16x128xf32>
      %129 = arith.addf %126, %128 : vector<16x128xf32>
      %130 = math.tanh %123 : vector<16x128xf32>
      %131 = math.tanh %129 : vector<16x128xf32>
      %132 = vector.extract_strided_slice %130 {offsets = [0, 0], sizes = [16, 32], strides = [1, 1]} : vector<16x128xf32> to vector<16x32xf32>
      %cst_80 = arith.constant 5.000000e-01 : f32
      %133 = vector.broadcast %cst_80 : f32 to vector<16x32xf32>
      %134 = arith.mulf %133, %132 : vector<16x32xf32>
      %cst_81 = arith.constant 5.000000e-01 : f32
      %135 = vector.broadcast %cst_81 : f32 to vector<16x32xf32>
      %136 = arith.addf %135, %134 : vector<16x32xf32>
      %137 = vector.extract_strided_slice %130 {offsets = [0, 32], sizes = [16, 32], strides = [1, 1]} : vector<16x128xf32> to vector<16x32xf32>
      %cst_82 = arith.constant 5.000000e-01 : f32
      %138 = vector.broadcast %cst_82 : f32 to vector<16x32xf32>
      %139 = arith.mulf %138, %137 : vector<16x32xf32>
      %cst_83 = arith.constant 5.000000e-01 : f32
      %140 = vector.broadcast %cst_83 : f32 to vector<16x32xf32>
      %141 = arith.addf %140, %139 : vector<16x32xf32>
      %142 = vector.extract_strided_slice %130 {offsets = [0, 64], sizes = [16, 32], strides = [1, 1]} : vector<16x128xf32> to vector<16x32xf32>
      %143 = vector.extract_strided_slice %130 {offsets = [0, 96], sizes = [16, 32], strides = [1, 1]} : vector<16x128xf32> to vector<16x32xf32>
      %cst_84 = arith.constant 5.000000e-01 : f32
      %144 = vector.broadcast %cst_84 : f32 to vector<16x32xf32>
      %145 = arith.mulf %144, %143 : vector<16x32xf32>
      %cst_85 = arith.constant 5.000000e-01 : f32
      %146 = vector.broadcast %cst_85 : f32 to vector<16x32xf32>
      %147 = arith.addf %146, %145 : vector<16x32xf32>
      %148 = arith.mulf %141, %83 : vector<16x32xf32>
      %149 = arith.mulf %136, %142 : vector<16x32xf32>
      %150 = arith.addf %148, %149 : vector<16x32xf32>
      %151 = math.tanh %150 : vector<16x32xf32>
      %152 = arith.mulf %147, %151 : vector<16x32xf32>
      %153 = vector.extract_strided_slice %131 {offsets = [0, 0], sizes = [16, 32], strides = [1, 1]} : vector<16x128xf32> to vector<16x32xf32>
      %cst_86 = arith.constant 5.000000e-01 : f32
      %154 = vector.broadcast %cst_86 : f32 to vector<16x32xf32>
      %155 = arith.mulf %154, %153 : vector<16x32xf32>
      %cst_87 = arith.constant 5.000000e-01 : f32
      %156 = vector.broadcast %cst_87 : f32 to vector<16x32xf32>
      %157 = arith.addf %156, %155 : vector<16x32xf32>
      %158 = vector.extract_strided_slice %131 {offsets = [0, 32], sizes = [16, 32], strides = [1, 1]} : vector<16x128xf32> to vector<16x32xf32>
      %cst_88 = arith.constant 5.000000e-01 : f32
      %159 = vector.broadcast %cst_88 : f32 to vector<16x32xf32>
      %160 = arith.mulf %159, %158 : vector<16x32xf32>
      %cst_89 = arith.constant 5.000000e-01 : f32
      %161 = vector.broadcast %cst_89 : f32 to vector<16x32xf32>
      %162 = arith.addf %161, %160 : vector<16x32xf32>
      %163 = vector.extract_strided_slice %131 {offsets = [0, 64], sizes = [16, 32], strides = [1, 1]} : vector<16x128xf32> to vector<16x32xf32>
      %164 = vector.extract_strided_slice %131 {offsets = [0, 96], sizes = [16, 32], strides = [1, 1]} : vector<16x128xf32> to vector<16x32xf32>
      %cst_90 = arith.constant 5.000000e-01 : f32
      %165 = vector.broadcast %cst_90 : f32 to vector<16x32xf32>
      %166 = arith.mulf %165, %164 : vector<16x32xf32>
      %cst_91 = arith.constant 5.000000e-01 : f32
      %167 = vector.broadcast %cst_91 : f32 to vector<16x32xf32>
      %168 = arith.addf %167, %166 : vector<16x32xf32>
      %169 = arith.mulf %162, %104 : vector<16x32xf32>
      %170 = arith.mulf %157, %163 : vector<16x32xf32>
      %171 = arith.addf %169, %170 : vector<16x32xf32>
      %172 = math.tanh %171 : vector<16x32xf32>
      %173 = arith.mulf %168, %172 : vector<16x32xf32>
      %174 = arith.index_cast %116 : i32 to index
      %c0_92 = arith.constant 0 : index
      %c0_93 = arith.constant 0 : index
      %175 = vector.load %arg12[%174, %c0_92, %c0_93] : memref<8x16x64xf32, #tpu.memory_space<vmem>>, vector<1x16x32xf32>
      %176 = vector.shape_cast %175 : vector<1x16x32xf32> to vector<16x32xf32>
      %177 = vector.shape_cast %152 : vector<16x32xf32> to vector<1x16x32xf32>
      tpu.vector_store %arg12[%174, %c0_92, %c0_93], %177 {strides = array<i32>} : memref<8x16x64xf32, #tpu.memory_space<vmem>>, vector<1x16x32xf32>,
      %178 = arith.index_cast %117 : i32 to index
      %c0_94 = arith.constant 0 : index
      %c32_95 = arith.constant 32 : index
      %179 = vector.load %arg12[%178, %c0_94, %c32_95] : memref<8x16x64xf32, #tpu.memory_space<vmem>>, vector<1x16x32xf32>
      %180 = vector.shape_cast %179 : vector<1x16x32xf32> to vector<16x32xf32>
      %181 = vector.shape_cast %173 : vector<16x32xf32> to vector<1x16x32xf32>
      tpu.vector_store %arg12[%178, %c0_94, %c32_95], %181 {strides = array<i32>} : memref<8x16x64xf32, #tpu.memory_space<vmem>>, vector<1x16x32xf32>,
      %c4_i32_96 = arith.constant 4 : i32
      %182 = arith.muli %arg13, %c4_i32_96 : i32
      %c2_i32_97 = arith.constant 2 : i32
      %183 = arith.addi %182, %c2_i32_97 : i32
      %c7_i32_98 = arith.constant 7 : i32
      %184 = arith.subi %c7_i32_98, %183 : i32
      %185 = arith.index_cast %183 : i32 to index
      %c0_99 = arith.constant 0 : index
      %c0_100 = arith.constant 0 : index
      %186 = vector.load %arg11[%185, %c0_99, %c0_100] : memref<8x16x256xf32, #tpu.memory_space<vmem>>, vector<1x16x128xf32>
      %187 = vector.shape_cast %186 : vector<1x16x128xf32> to vector<16x128xf32>
      %188 = arith.truncf %152 : vector<16x32xf32> to vector<16x32xbf16>
      %cst_101 = arith.constant dense<0.000000e+00> : vector<16x128xf32>
      %189 = tpu.matmul %188, %10, %cst_101 {dimension_numbers = #tpu.dot_dimension_numbers<[1], [0], [0], [1], [0, 0, 1, 1], [], []>} : vector<16x32xbf16>, vector<32x128xbf16>, vector<16x128xf32> -> vector<16x128xf32>
      %190 = arith.addf %187, %189 : vector<16x128xf32>
      %191 = arith.index_cast %184 : i32 to index
      %c0_102 = arith.constant 0 : index
      %c128_103 = arith.constant 128 : index
      %192 = vector.load %arg11[%191, %c0_102, %c128_103] : memref<8x16x256xf32, #tpu.memory_space<vmem>>, vector<1x16x128xf32>
      %193 = vector.shape_cast %192 : vector<1x16x128xf32> to vector<16x128xf32>
      %194 = arith.truncf %173 : vector<16x32xf32> to vector<16x32xbf16>
      %cst_104 = arith.constant dense<0.000000e+00> : vector<16x128xf32>
      %195 = tpu.matmul %194, %12, %cst_104 {dimension_numbers = #tpu.dot_dimension_numbers<[1], [0], [0], [1], [0, 0, 1, 1], [], []>} : vector<16x32xbf16>, vector<32x128xbf16>, vector<16x128xf32> -> vector<16x128xf32>
      %196 = arith.addf %193, %195 : vector<16x128xf32>
      %197 = math.tanh %190 : vector<16x128xf32>
      %198 = math.tanh %196 : vector<16x128xf32>
      %199 = vector.extract_strided_slice %197 {offsets = [0, 0], sizes = [16, 32], strides = [1, 1]} : vector<16x128xf32> to vector<16x32xf32>
      %cst_105 = arith.constant 5.000000e-01 : f32
      %200 = vector.broadcast %cst_105 : f32 to vector<16x32xf32>
      %201 = arith.mulf %200, %199 : vector<16x32xf32>
      %cst_106 = arith.constant 5.000000e-01 : f32
      %202 = vector.broadcast %cst_106 : f32 to vector<16x32xf32>
      %203 = arith.addf %202, %201 : vector<16x32xf32>
      %204 = vector.extract_strided_slice %197 {offsets = [0, 32], sizes = [16, 32], strides = [1, 1]} : vector<16x128xf32> to vector<16x32xf32>
      %cst_107 = arith.constant 5.000000e-01 : f32
      %205 = vector.broadcast %cst_107 : f32 to vector<16x32xf32>
      %206 = arith.mulf %205, %204 : vector<16x32xf32>
      %cst_108 = arith.constant 5.000000e-01 : f32
      %207 = vector.broadcast %cst_108 : f32 to vector<16x32xf32>
      %208 = arith.addf %207, %206 : vector<16x32xf32>
      %209 = vector.extract_strided_slice %197 {offsets = [0, 64], sizes = [16, 32], strides = [1, 1]} : vector<16x128xf32> to vector<16x32xf32>
      %210 = vector.extract_strided_slice %197 {offsets = [0, 96], sizes = [16, 32], strides = [1, 1]} : vector<16x128xf32> to vector<16x32xf32>
      %cst_109 = arith.constant 5.000000e-01 : f32
      %211 = vector.broadcast %cst_109 : f32 to vector<16x32xf32>
      %212 = arith.mulf %211, %210 : vector<16x32xf32>
      %cst_110 = arith.constant 5.000000e-01 : f32
      %213 = vector.broadcast %cst_110 : f32 to vector<16x32xf32>
      %214 = arith.addf %213, %212 : vector<16x32xf32>
      %215 = arith.mulf %208, %150 : vector<16x32xf32>
      %216 = arith.mulf %203, %209 : vector<16x32xf32>
      %217 = arith.addf %215, %216 : vector<16x32xf32>
      %218 = math.tanh %217 : vector<16x32xf32>
      %219 = arith.mulf %214, %218 : vector<16x32xf32>
      %220 = vector.extract_strided_slice %198 {offsets = [0, 0], sizes = [16, 32], strides = [1, 1]} : vector<16x128xf32> to vector<16x32xf32>
      %cst_111 = arith.constant 5.000000e-01 : f32
      %221 = vector.broadcast %cst_111 : f32 to vector<16x32xf32>
      %222 = arith.mulf %221, %220 : vector<16x32xf32>
      %cst_112 = arith.constant 5.000000e-01 : f32
      %223 = vector.broadcast %cst_112 : f32 to vector<16x32xf32>
      %224 = arith.addf %223, %222 : vector<16x32xf32>
      %225 = vector.extract_strided_slice %198 {offsets = [0, 32], sizes = [16, 32], strides = [1, 1]} : vector<16x128xf32> to vector<16x32xf32>
      %cst_113 = arith.constant 5.000000e-01 : f32
      %226 = vector.broadcast %cst_113 : f32 to vector<16x32xf32>
      %227 = arith.mulf %226, %225 : vector<16x32xf32>
      %cst_114 = arith.constant 5.000000e-01 : f32
      %228 = vector.broadcast %cst_114 : f32 to vector<16x32xf32>
      %229 = arith.addf %228, %227 : vector<16x32xf32>
      %230 = vector.extract_strided_slice %198 {offsets = [0, 64], sizes = [16, 32], strides = [1, 1]} : vector<16x128xf32> to vector<16x32xf32>
      %231 = vector.extract_strided_slice %198 {offsets = [0, 96], sizes = [16, 32], strides = [1, 1]} : vector<16x128xf32> to vector<16x32xf32>
      %cst_115 = arith.constant 5.000000e-01 : f32
      %232 = vector.broadcast %cst_115 : f32 to vector<16x32xf32>
      %233 = arith.mulf %232, %231 : vector<16x32xf32>
      %cst_116 = arith.constant 5.000000e-01 : f32
      %234 = vector.broadcast %cst_116 : f32 to vector<16x32xf32>
      %235 = arith.addf %234, %233 : vector<16x32xf32>
      %236 = arith.mulf %229, %171 : vector<16x32xf32>
      %237 = arith.mulf %224, %230 : vector<16x32xf32>
      %238 = arith.addf %236, %237 : vector<16x32xf32>
      %239 = math.tanh %238 : vector<16x32xf32>
      %240 = arith.mulf %235, %239 : vector<16x32xf32>
      %241 = arith.index_cast %183 : i32 to index
      %c0_117 = arith.constant 0 : index
      %c0_118 = arith.constant 0 : index
      %242 = vector.load %arg12[%241, %c0_117, %c0_118] : memref<8x16x64xf32, #tpu.memory_space<vmem>>, vector<1x16x32xf32>
      %243 = vector.shape_cast %242 : vector<1x16x32xf32> to vector<16x32xf32>
      %244 = vector.shape_cast %219 : vector<16x32xf32> to vector<1x16x32xf32>
      tpu.vector_store %arg12[%241, %c0_117, %c0_118], %244 {strides = array<i32>} : memref<8x16x64xf32, #tpu.memory_space<vmem>>, vector<1x16x32xf32>,
      %245 = arith.index_cast %184 : i32 to index
      %c0_119 = arith.constant 0 : index
      %c32_120 = arith.constant 32 : index
      %246 = vector.load %arg12[%245, %c0_119, %c32_120] : memref<8x16x64xf32, #tpu.memory_space<vmem>>, vector<1x16x32xf32>
      %247 = vector.shape_cast %246 : vector<1x16x32xf32> to vector<16x32xf32>
      %248 = vector.shape_cast %240 : vector<16x32xf32> to vector<1x16x32xf32>
      tpu.vector_store %arg12[%245, %c0_119, %c32_120], %248 {strides = array<i32>} : memref<8x16x64xf32, #tpu.memory_space<vmem>>, vector<1x16x32xf32>,
      %c4_i32_121 = arith.constant 4 : i32
      %249 = arith.muli %arg13, %c4_i32_121 : i32
      %c3_i32 = arith.constant 3 : i32
      %250 = arith.addi %249, %c3_i32 : i32
      %c7_i32_122 = arith.constant 7 : i32
      %251 = arith.subi %c7_i32_122, %250 : i32
      %252 = arith.index_cast %250 : i32 to index
      %c0_123 = arith.constant 0 : index
      %c0_124 = arith.constant 0 : index
      %253 = vector.load %arg11[%252, %c0_123, %c0_124] : memref<8x16x256xf32, #tpu.memory_space<vmem>>, vector<1x16x128xf32>
      %254 = vector.shape_cast %253 : vector<1x16x128xf32> to vector<16x128xf32>
      %255 = arith.truncf %219 : vector<16x32xf32> to vector<16x32xbf16>
      %cst_125 = arith.constant dense<0.000000e+00> : vector<16x128xf32>
      %256 = tpu.matmul %255, %10, %cst_125 {dimension_numbers = #tpu.dot_dimension_numbers<[1], [0], [0], [1], [0, 0, 1, 1], [], []>} : vector<16x32xbf16>, vector<32x128xbf16>, vector<16x128xf32> -> vector<16x128xf32>
      %257 = arith.addf %254, %256 : vector<16x128xf32>
      %258 = arith.index_cast %251 : i32 to index
      %c0_126 = arith.constant 0 : index
      %c128_127 = arith.constant 128 : index
      %259 = vector.load %arg11[%258, %c0_126, %c128_127] : memref<8x16x256xf32, #tpu.memory_space<vmem>>, vector<1x16x128xf32>
      %260 = vector.shape_cast %259 : vector<1x16x128xf32> to vector<16x128xf32>
      %261 = arith.truncf %240 : vector<16x32xf32> to vector<16x32xbf16>
      %cst_128 = arith.constant dense<0.000000e+00> : vector<16x128xf32>
      %262 = tpu.matmul %261, %12, %cst_128 {dimension_numbers = #tpu.dot_dimension_numbers<[1], [0], [0], [1], [0, 0, 1, 1], [], []>} : vector<16x32xbf16>, vector<32x128xbf16>, vector<16x128xf32> -> vector<16x128xf32>
      %263 = arith.addf %260, %262 : vector<16x128xf32>
      %264 = math.tanh %257 : vector<16x128xf32>
      %265 = math.tanh %263 : vector<16x128xf32>
      %266 = vector.extract_strided_slice %264 {offsets = [0, 0], sizes = [16, 32], strides = [1, 1]} : vector<16x128xf32> to vector<16x32xf32>
      %cst_129 = arith.constant 5.000000e-01 : f32
      %267 = vector.broadcast %cst_129 : f32 to vector<16x32xf32>
      %268 = arith.mulf %267, %266 : vector<16x32xf32>
      %cst_130 = arith.constant 5.000000e-01 : f32
      %269 = vector.broadcast %cst_130 : f32 to vector<16x32xf32>
      %270 = arith.addf %269, %268 : vector<16x32xf32>
      %271 = vector.extract_strided_slice %264 {offsets = [0, 32], sizes = [16, 32], strides = [1, 1]} : vector<16x128xf32> to vector<16x32xf32>
      %cst_131 = arith.constant 5.000000e-01 : f32
      %272 = vector.broadcast %cst_131 : f32 to vector<16x32xf32>
      %273 = arith.mulf %272, %271 : vector<16x32xf32>
      %cst_132 = arith.constant 5.000000e-01 : f32
      %274 = vector.broadcast %cst_132 : f32 to vector<16x32xf32>
      %275 = arith.addf %274, %273 : vector<16x32xf32>
      %276 = vector.extract_strided_slice %264 {offsets = [0, 64], sizes = [16, 32], strides = [1, 1]} : vector<16x128xf32> to vector<16x32xf32>
      %277 = vector.extract_strided_slice %264 {offsets = [0, 96], sizes = [16, 32], strides = [1, 1]} : vector<16x128xf32> to vector<16x32xf32>
      %cst_133 = arith.constant 5.000000e-01 : f32
      %278 = vector.broadcast %cst_133 : f32 to vector<16x32xf32>
      %279 = arith.mulf %278, %277 : vector<16x32xf32>
      %cst_134 = arith.constant 5.000000e-01 : f32
      %280 = vector.broadcast %cst_134 : f32 to vector<16x32xf32>
      %281 = arith.addf %280, %279 : vector<16x32xf32>
      %282 = arith.mulf %275, %217 : vector<16x32xf32>
      %283 = arith.mulf %270, %276 : vector<16x32xf32>
      %284 = arith.addf %282, %283 : vector<16x32xf32>
      %285 = math.tanh %284 : vector<16x32xf32>
      %286 = arith.mulf %281, %285 : vector<16x32xf32>
      %287 = vector.extract_strided_slice %265 {offsets = [0, 0], sizes = [16, 32], strides = [1, 1]} : vector<16x128xf32> to vector<16x32xf32>
      %cst_135 = arith.constant 5.000000e-01 : f32
      %288 = vector.broadcast %cst_135 : f32 to vector<16x32xf32>
      %289 = arith.mulf %288, %287 : vector<16x32xf32>
      %cst_136 = arith.constant 5.000000e-01 : f32
      %290 = vector.broadcast %cst_136 : f32 to vector<16x32xf32>
      %291 = arith.addf %290, %289 : vector<16x32xf32>
      %292 = vector.extract_strided_slice %265 {offsets = [0, 32], sizes = [16, 32], strides = [1, 1]} : vector<16x128xf32> to vector<16x32xf32>
      %cst_137 = arith.constant 5.000000e-01 : f32
      %293 = vector.broadcast %cst_137 : f32 to vector<16x32xf32>
      %294 = arith.mulf %293, %292 : vector<16x32xf32>
      %cst_138 = arith.constant 5.000000e-01 : f32
      %295 = vector.broadcast %cst_138 : f32 to vector<16x32xf32>
      %296 = arith.addf %295, %294 : vector<16x32xf32>
      %297 = vector.extract_strided_slice %265 {offsets = [0, 64], sizes = [16, 32], strides = [1, 1]} : vector<16x128xf32> to vector<16x32xf32>
      %298 = vector.extract_strided_slice %265 {offsets = [0, 96], sizes = [16, 32], strides = [1, 1]} : vector<16x128xf32> to vector<16x32xf32>
      %cst_139 = arith.constant 5.000000e-01 : f32
      %299 = vector.broadcast %cst_139 : f32 to vector<16x32xf32>
      %300 = arith.mulf %299, %298 : vector<16x32xf32>
      %cst_140 = arith.constant 5.000000e-01 : f32
      %301 = vector.broadcast %cst_140 : f32 to vector<16x32xf32>
      %302 = arith.addf %301, %300 : vector<16x32xf32>
      %303 = arith.mulf %296, %238 : vector<16x32xf32>
      %304 = arith.mulf %291, %297 : vector<16x32xf32>
      %305 = arith.addf %303, %304 : vector<16x32xf32>
      %306 = math.tanh %305 : vector<16x32xf32>
      %307 = arith.mulf %302, %306 : vector<16x32xf32>
      %308 = arith.index_cast %250 : i32 to index
      %c0_141 = arith.constant 0 : index
      %c0_142 = arith.constant 0 : index
      %309 = vector.load %arg12[%308, %c0_141, %c0_142] : memref<8x16x64xf32, #tpu.memory_space<vmem>>, vector<1x16x32xf32>
      %310 = vector.shape_cast %309 : vector<1x16x32xf32> to vector<16x32xf32>
      %311 = vector.shape_cast %286 : vector<16x32xf32> to vector<1x16x32xf32>
      tpu.vector_store %arg12[%308, %c0_141, %c0_142], %311 {strides = array<i32>} : memref<8x16x64xf32, #tpu.memory_space<vmem>>, vector<1x16x32xf32>,
      %312 = arith.index_cast %251 : i32 to index
      %c0_143 = arith.constant 0 : index
      %c32_144 = arith.constant 32 : index
      %313 = vector.load %arg12[%312, %c0_143, %c32_144] : memref<8x16x64xf32, #tpu.memory_space<vmem>>, vector<1x16x32xf32>
      %314 = vector.shape_cast %313 : vector<1x16x32xf32> to vector<16x32xf32>
      %315 = vector.shape_cast %307 : vector<16x32xf32> to vector<1x16x32xf32>
      tpu.vector_store %arg12[%312, %c0_143, %c32_144], %315 {strides = array<i32>} : memref<8x16x64xf32, #tpu.memory_space<vmem>>, vector<1x16x32xf32>,
      scf.yield %286, %284, %307, %305 : vector<16x32xf32>, vector<16x32xf32>, vector<16x32xf32>, vector<16x32xf32>
    }
    %c2_i32_15 = arith.constant 2 : i32
    %c0_16 = arith.constant 0 : index
    %c0_17 = arith.constant 0 : index
    %c0_18 = arith.constant 0 : index
    %16 = vector.load %arg12[%c0_16, %c0_17, %c0_18] : memref<8x16x64xf32, #tpu.memory_space<vmem>>, vector<8x16x64xf32>
    %17 = vector.shape_cast %16 : vector<8x16x64xf32> to vector<128x64xf32>
    %18 = arith.truncf %17 : vector<128x64xf32> to vector<128x64xbf16>
    %c0_19 = arith.constant 0 : index
    %c0_20 = arith.constant 0 : index
    %19 = vector.load %arg5[%c0_19, %c0_20] : memref<64x256xbf16, #tpu.memory_space<vmem>>, vector<64x256xbf16>
    %cst_21 = arith.constant dense<0.000000e+00> : vector<128x256xf32>
    %20 = tpu.matmul %18, %19, %cst_21 {dimension_numbers = #tpu.dot_dimension_numbers<[1], [0], [0], [1], [0, 0, 1, 1], [], []>} : vector<128x64xbf16>, vector<64x256xbf16>, vector<128x256xf32> -> vector<128x256xf32>
    %c0_22 = arith.constant 0 : index
    %c0_23 = arith.constant 0 : index
    %21 = vector.load %arg7[%c0_22, %c0_23] : memref<1x256xf32, #tpu.memory_space<vmem>>, vector<1x256xf32>
    %22 = vector.broadcast %21 : vector<1x256xf32> to vector<128x256xf32>
    %23 = arith.addf %20, %22 : vector<128x256xf32>
    %24 = vector.shape_cast %23 : vector<128x256xf32> to vector<8x16x256xf32>
    %c0_24 = arith.constant 0 : index
    %c0_25 = arith.constant 0 : index
    %c0_26 = arith.constant 0 : index
    %25 = vector.load %arg11[%c0_24, %c0_25, %c0_26] : memref<8x16x256xf32, #tpu.memory_space<vmem>>, vector<8x16x256xf32>
    tpu.vector_store %arg11[%c0_24, %c0_25, %c0_26], %24 {strides = array<i32>} : memref<8x16x256xf32, #tpu.memory_space<vmem>>, vector<8x16x256xf32>,
    %c0_27 = arith.constant 0 : index
    %c0_28 = arith.constant 0 : index
    %c0_29 = arith.constant 0 : index
    %26 = vector.load %arg6[%c0_27, %c0_28, %c0_29] : memref<2x32x128xbf16, #tpu.memory_space<vmem>>, vector<1x32x128xbf16>
    %27 = vector.shape_cast %26 : vector<1x32x128xbf16> to vector<32x128xbf16>
    %c1_30 = arith.constant 1 : index
    %c0_31 = arith.constant 0 : index
    %c0_32 = arith.constant 0 : index
    %28 = vector.load %arg6[%c1_30, %c0_31, %c0_32] : memref<2x32x128xbf16, #tpu.memory_space<vmem>>, vector<1x32x128xbf16>
    %29 = vector.shape_cast %28 : vector<1x32x128xbf16> to vector<32x128xbf16>
    %cst_33 = arith.constant 0.000000e+00 : f32
    %30 = vector.broadcast %cst_33 : f32 to vector<16x32xf32>
    %c0_i32_34 = arith.constant 0 : i32
    %c2_i32_35 = arith.constant 2 : i32
    %31 = arith.addi %c0_i32_34, %c2_i32_35 : i32
    %c1_i32_36 = arith.constant 1 : i32
    %32:4 = scf.for %arg13 = %c0_i32_34 to %31 step %c1_i32_36 iter_args(%arg14 = %30, %arg15 = %30, %arg16 = %30, %arg17 = %30) -> (vector<16x32xf32>, vector<16x32xf32>, vector<16x32xf32>, vector<16x32xf32>)  : i32 {
      %c4_i32 = arith.constant 4 : i32
      %48 = arith.muli %arg13, %c4_i32 : i32
      %c0_i32_50 = arith.constant 0 : i32
      %49 = arith.addi %48, %c0_i32_50 : i32
      %c7_i32 = arith.constant 7 : i32
      %50 = arith.subi %c7_i32, %49 : i32
      %51 = arith.index_cast %49 : i32 to index
      %c0_51 = arith.constant 0 : index
      %c0_52 = arith.constant 0 : index
      %52 = vector.load %arg11[%51, %c0_51, %c0_52] : memref<8x16x256xf32, #tpu.memory_space<vmem>>, vector<1x16x128xf32>
      %53 = vector.shape_cast %52 : vector<1x16x128xf32> to vector<16x128xf32>
      %54 = arith.truncf %arg14 : vector<16x32xf32> to vector<16x32xbf16>
      %cst_53 = arith.constant dense<0.000000e+00> : vector<16x128xf32>
      %55 = tpu.matmul %54, %27, %cst_53 {dimension_numbers = #tpu.dot_dimension_numbers<[1], [0], [0], [1], [0, 0, 1, 1], [], []>} : vector<16x32xbf16>, vector<32x128xbf16>, vector<16x128xf32> -> vector<16x128xf32>
      %56 = arith.addf %53, %55 : vector<16x128xf32>
      %57 = arith.index_cast %50 : i32 to index
      %c0_54 = arith.constant 0 : index
      %c128 = arith.constant 128 : index
      %58 = vector.load %arg11[%57, %c0_54, %c128] : memref<8x16x256xf32, #tpu.memory_space<vmem>>, vector<1x16x128xf32>
      %59 = vector.shape_cast %58 : vector<1x16x128xf32> to vector<16x128xf32>
      %60 = arith.truncf %arg16 : vector<16x32xf32> to vector<16x32xbf16>
      %cst_55 = arith.constant dense<0.000000e+00> : vector<16x128xf32>
      %61 = tpu.matmul %60, %29, %cst_55 {dimension_numbers = #tpu.dot_dimension_numbers<[1], [0], [0], [1], [0, 0, 1, 1], [], []>} : vector<16x32xbf16>, vector<32x128xbf16>, vector<16x128xf32> -> vector<16x128xf32>
      %62 = arith.addf %59, %61 : vector<16x128xf32>
      %63 = math.tanh %56 : vector<16x128xf32>
      %64 = math.tanh %62 : vector<16x128xf32>
      %65 = vector.extract_strided_slice %63 {offsets = [0, 0], sizes = [16, 32], strides = [1, 1]} : vector<16x128xf32> to vector<16x32xf32>
      %cst_56 = arith.constant 5.000000e-01 : f32
      %66 = vector.broadcast %cst_56 : f32 to vector<16x32xf32>
      %67 = arith.mulf %66, %65 : vector<16x32xf32>
      %cst_57 = arith.constant 5.000000e-01 : f32
      %68 = vector.broadcast %cst_57 : f32 to vector<16x32xf32>
      %69 = arith.addf %68, %67 : vector<16x32xf32>
      %70 = vector.extract_strided_slice %63 {offsets = [0, 32], sizes = [16, 32], strides = [1, 1]} : vector<16x128xf32> to vector<16x32xf32>
      %cst_58 = arith.constant 5.000000e-01 : f32
      %71 = vector.broadcast %cst_58 : f32 to vector<16x32xf32>
      %72 = arith.mulf %71, %70 : vector<16x32xf32>
      %cst_59 = arith.constant 5.000000e-01 : f32
      %73 = vector.broadcast %cst_59 : f32 to vector<16x32xf32>
      %74 = arith.addf %73, %72 : vector<16x32xf32>
      %75 = vector.extract_strided_slice %63 {offsets = [0, 64], sizes = [16, 32], strides = [1, 1]} : vector<16x128xf32> to vector<16x32xf32>
      %76 = vector.extract_strided_slice %63 {offsets = [0, 96], sizes = [16, 32], strides = [1, 1]} : vector<16x128xf32> to vector<16x32xf32>
      %cst_60 = arith.constant 5.000000e-01 : f32
      %77 = vector.broadcast %cst_60 : f32 to vector<16x32xf32>
      %78 = arith.mulf %77, %76 : vector<16x32xf32>
      %cst_61 = arith.constant 5.000000e-01 : f32
      %79 = vector.broadcast %cst_61 : f32 to vector<16x32xf32>
      %80 = arith.addf %79, %78 : vector<16x32xf32>
      %81 = arith.mulf %74, %arg15 : vector<16x32xf32>
      %82 = arith.mulf %69, %75 : vector<16x32xf32>
      %83 = arith.addf %81, %82 : vector<16x32xf32>
      %84 = math.tanh %83 : vector<16x32xf32>
      %85 = arith.mulf %80, %84 : vector<16x32xf32>
      %86 = vector.extract_strided_slice %64 {offsets = [0, 0], sizes = [16, 32], strides = [1, 1]} : vector<16x128xf32> to vector<16x32xf32>
      %cst_62 = arith.constant 5.000000e-01 : f32
      %87 = vector.broadcast %cst_62 : f32 to vector<16x32xf32>
      %88 = arith.mulf %87, %86 : vector<16x32xf32>
      %cst_63 = arith.constant 5.000000e-01 : f32
      %89 = vector.broadcast %cst_63 : f32 to vector<16x32xf32>
      %90 = arith.addf %89, %88 : vector<16x32xf32>
      %91 = vector.extract_strided_slice %64 {offsets = [0, 32], sizes = [16, 32], strides = [1, 1]} : vector<16x128xf32> to vector<16x32xf32>
      %cst_64 = arith.constant 5.000000e-01 : f32
      %92 = vector.broadcast %cst_64 : f32 to vector<16x32xf32>
      %93 = arith.mulf %92, %91 : vector<16x32xf32>
      %cst_65 = arith.constant 5.000000e-01 : f32
      %94 = vector.broadcast %cst_65 : f32 to vector<16x32xf32>
      %95 = arith.addf %94, %93 : vector<16x32xf32>
      %96 = vector.extract_strided_slice %64 {offsets = [0, 64], sizes = [16, 32], strides = [1, 1]} : vector<16x128xf32> to vector<16x32xf32>
      %97 = vector.extract_strided_slice %64 {offsets = [0, 96], sizes = [16, 32], strides = [1, 1]} : vector<16x128xf32> to vector<16x32xf32>
      %cst_66 = arith.constant 5.000000e-01 : f32
      %98 = vector.broadcast %cst_66 : f32 to vector<16x32xf32>
      %99 = arith.mulf %98, %97 : vector<16x32xf32>
      %cst_67 = arith.constant 5.000000e-01 : f32
      %100 = vector.broadcast %cst_67 : f32 to vector<16x32xf32>
      %101 = arith.addf %100, %99 : vector<16x32xf32>
      %102 = arith.mulf %95, %arg17 : vector<16x32xf32>
      %103 = arith.mulf %90, %96 : vector<16x32xf32>
      %104 = arith.addf %102, %103 : vector<16x32xf32>
      %105 = math.tanh %104 : vector<16x32xf32>
      %106 = arith.mulf %101, %105 : vector<16x32xf32>
      %107 = arith.index_cast %49 : i32 to index
      %c0_68 = arith.constant 0 : index
      %c0_69 = arith.constant 0 : index
      %108 = vector.load %arg12[%107, %c0_68, %c0_69] : memref<8x16x64xf32, #tpu.memory_space<vmem>>, vector<1x16x32xf32>
      %109 = vector.shape_cast %108 : vector<1x16x32xf32> to vector<16x32xf32>
      %110 = vector.shape_cast %85 : vector<16x32xf32> to vector<1x16x32xf32>
      tpu.vector_store %arg12[%107, %c0_68, %c0_69], %110 {strides = array<i32>} : memref<8x16x64xf32, #tpu.memory_space<vmem>>, vector<1x16x32xf32>,
      %111 = arith.index_cast %50 : i32 to index
      %c0_70 = arith.constant 0 : index
      %c32 = arith.constant 32 : index
      %112 = vector.load %arg12[%111, %c0_70, %c32] : memref<8x16x64xf32, #tpu.memory_space<vmem>>, vector<1x16x32xf32>
      %113 = vector.shape_cast %112 : vector<1x16x32xf32> to vector<16x32xf32>
      %114 = vector.shape_cast %106 : vector<16x32xf32> to vector<1x16x32xf32>
      tpu.vector_store %arg12[%111, %c0_70, %c32], %114 {strides = array<i32>} : memref<8x16x64xf32, #tpu.memory_space<vmem>>, vector<1x16x32xf32>,
      %c4_i32_71 = arith.constant 4 : i32
      %115 = arith.muli %arg13, %c4_i32_71 : i32
      %c1_i32_72 = arith.constant 1 : i32
      %116 = arith.addi %115, %c1_i32_72 : i32
      %c7_i32_73 = arith.constant 7 : i32
      %117 = arith.subi %c7_i32_73, %116 : i32
      %118 = arith.index_cast %116 : i32 to index
      %c0_74 = arith.constant 0 : index
      %c0_75 = arith.constant 0 : index
      %119 = vector.load %arg11[%118, %c0_74, %c0_75] : memref<8x16x256xf32, #tpu.memory_space<vmem>>, vector<1x16x128xf32>
      %120 = vector.shape_cast %119 : vector<1x16x128xf32> to vector<16x128xf32>
      %121 = arith.truncf %85 : vector<16x32xf32> to vector<16x32xbf16>
      %cst_76 = arith.constant dense<0.000000e+00> : vector<16x128xf32>
      %122 = tpu.matmul %121, %27, %cst_76 {dimension_numbers = #tpu.dot_dimension_numbers<[1], [0], [0], [1], [0, 0, 1, 1], [], []>} : vector<16x32xbf16>, vector<32x128xbf16>, vector<16x128xf32> -> vector<16x128xf32>
      %123 = arith.addf %120, %122 : vector<16x128xf32>
      %124 = arith.index_cast %117 : i32 to index
      %c0_77 = arith.constant 0 : index
      %c128_78 = arith.constant 128 : index
      %125 = vector.load %arg11[%124, %c0_77, %c128_78] : memref<8x16x256xf32, #tpu.memory_space<vmem>>, vector<1x16x128xf32>
      %126 = vector.shape_cast %125 : vector<1x16x128xf32> to vector<16x128xf32>
      %127 = arith.truncf %106 : vector<16x32xf32> to vector<16x32xbf16>
      %cst_79 = arith.constant dense<0.000000e+00> : vector<16x128xf32>
      %128 = tpu.matmul %127, %29, %cst_79 {dimension_numbers = #tpu.dot_dimension_numbers<[1], [0], [0], [1], [0, 0, 1, 1], [], []>} : vector<16x32xbf16>, vector<32x128xbf16>, vector<16x128xf32> -> vector<16x128xf32>
      %129 = arith.addf %126, %128 : vector<16x128xf32>
      %130 = math.tanh %123 : vector<16x128xf32>
      %131 = math.tanh %129 : vector<16x128xf32>
      %132 = vector.extract_strided_slice %130 {offsets = [0, 0], sizes = [16, 32], strides = [1, 1]} : vector<16x128xf32> to vector<16x32xf32>
      %cst_80 = arith.constant 5.000000e-01 : f32
      %133 = vector.broadcast %cst_80 : f32 to vector<16x32xf32>
      %134 = arith.mulf %133, %132 : vector<16x32xf32>
      %cst_81 = arith.constant 5.000000e-01 : f32
      %135 = vector.broadcast %cst_81 : f32 to vector<16x32xf32>
      %136 = arith.addf %135, %134 : vector<16x32xf32>
      %137 = vector.extract_strided_slice %130 {offsets = [0, 32], sizes = [16, 32], strides = [1, 1]} : vector<16x128xf32> to vector<16x32xf32>
      %cst_82 = arith.constant 5.000000e-01 : f32
      %138 = vector.broadcast %cst_82 : f32 to vector<16x32xf32>
      %139 = arith.mulf %138, %137 : vector<16x32xf32>
      %cst_83 = arith.constant 5.000000e-01 : f32
      %140 = vector.broadcast %cst_83 : f32 to vector<16x32xf32>
      %141 = arith.addf %140, %139 : vector<16x32xf32>
      %142 = vector.extract_strided_slice %130 {offsets = [0, 64], sizes = [16, 32], strides = [1, 1]} : vector<16x128xf32> to vector<16x32xf32>
      %143 = vector.extract_strided_slice %130 {offsets = [0, 96], sizes = [16, 32], strides = [1, 1]} : vector<16x128xf32> to vector<16x32xf32>
      %cst_84 = arith.constant 5.000000e-01 : f32
      %144 = vector.broadcast %cst_84 : f32 to vector<16x32xf32>
      %145 = arith.mulf %144, %143 : vector<16x32xf32>
      %cst_85 = arith.constant 5.000000e-01 : f32
      %146 = vector.broadcast %cst_85 : f32 to vector<16x32xf32>
      %147 = arith.addf %146, %145 : vector<16x32xf32>
      %148 = arith.mulf %141, %83 : vector<16x32xf32>
      %149 = arith.mulf %136, %142 : vector<16x32xf32>
      %150 = arith.addf %148, %149 : vector<16x32xf32>
      %151 = math.tanh %150 : vector<16x32xf32>
      %152 = arith.mulf %147, %151 : vector<16x32xf32>
      %153 = vector.extract_strided_slice %131 {offsets = [0, 0], sizes = [16, 32], strides = [1, 1]} : vector<16x128xf32> to vector<16x32xf32>
      %cst_86 = arith.constant 5.000000e-01 : f32
      %154 = vector.broadcast %cst_86 : f32 to vector<16x32xf32>
      %155 = arith.mulf %154, %153 : vector<16x32xf32>
      %cst_87 = arith.constant 5.000000e-01 : f32
      %156 = vector.broadcast %cst_87 : f32 to vector<16x32xf32>
      %157 = arith.addf %156, %155 : vector<16x32xf32>
      %158 = vector.extract_strided_slice %131 {offsets = [0, 32], sizes = [16, 32], strides = [1, 1]} : vector<16x128xf32> to vector<16x32xf32>
      %cst_88 = arith.constant 5.000000e-01 : f32
      %159 = vector.broadcast %cst_88 : f32 to vector<16x32xf32>
      %160 = arith.mulf %159, %158 : vector<16x32xf32>
      %cst_89 = arith.constant 5.000000e-01 : f32
      %161 = vector.broadcast %cst_89 : f32 to vector<16x32xf32>
      %162 = arith.addf %161, %160 : vector<16x32xf32>
      %163 = vector.extract_strided_slice %131 {offsets = [0, 64], sizes = [16, 32], strides = [1, 1]} : vector<16x128xf32> to vector<16x32xf32>
      %164 = vector.extract_strided_slice %131 {offsets = [0, 96], sizes = [16, 32], strides = [1, 1]} : vector<16x128xf32> to vector<16x32xf32>
      %cst_90 = arith.constant 5.000000e-01 : f32
      %165 = vector.broadcast %cst_90 : f32 to vector<16x32xf32>
      %166 = arith.mulf %165, %164 : vector<16x32xf32>
      %cst_91 = arith.constant 5.000000e-01 : f32
      %167 = vector.broadcast %cst_91 : f32 to vector<16x32xf32>
      %168 = arith.addf %167, %166 : vector<16x32xf32>
      %169 = arith.mulf %162, %104 : vector<16x32xf32>
      %170 = arith.mulf %157, %163 : vector<16x32xf32>
      %171 = arith.addf %169, %170 : vector<16x32xf32>
      %172 = math.tanh %171 : vector<16x32xf32>
      %173 = arith.mulf %168, %172 : vector<16x32xf32>
      %174 = arith.index_cast %116 : i32 to index
      %c0_92 = arith.constant 0 : index
      %c0_93 = arith.constant 0 : index
      %175 = vector.load %arg12[%174, %c0_92, %c0_93] : memref<8x16x64xf32, #tpu.memory_space<vmem>>, vector<1x16x32xf32>
      %176 = vector.shape_cast %175 : vector<1x16x32xf32> to vector<16x32xf32>
      %177 = vector.shape_cast %152 : vector<16x32xf32> to vector<1x16x32xf32>
      tpu.vector_store %arg12[%174, %c0_92, %c0_93], %177 {strides = array<i32>} : memref<8x16x64xf32, #tpu.memory_space<vmem>>, vector<1x16x32xf32>,
      %178 = arith.index_cast %117 : i32 to index
      %c0_94 = arith.constant 0 : index
      %c32_95 = arith.constant 32 : index
      %179 = vector.load %arg12[%178, %c0_94, %c32_95] : memref<8x16x64xf32, #tpu.memory_space<vmem>>, vector<1x16x32xf32>
      %180 = vector.shape_cast %179 : vector<1x16x32xf32> to vector<16x32xf32>
      %181 = vector.shape_cast %173 : vector<16x32xf32> to vector<1x16x32xf32>
      tpu.vector_store %arg12[%178, %c0_94, %c32_95], %181 {strides = array<i32>} : memref<8x16x64xf32, #tpu.memory_space<vmem>>, vector<1x16x32xf32>,
      %c4_i32_96 = arith.constant 4 : i32
      %182 = arith.muli %arg13, %c4_i32_96 : i32
      %c2_i32_97 = arith.constant 2 : i32
      %183 = arith.addi %182, %c2_i32_97 : i32
      %c7_i32_98 = arith.constant 7 : i32
      %184 = arith.subi %c7_i32_98, %183 : i32
      %185 = arith.index_cast %183 : i32 to index
      %c0_99 = arith.constant 0 : index
      %c0_100 = arith.constant 0 : index
      %186 = vector.load %arg11[%185, %c0_99, %c0_100] : memref<8x16x256xf32, #tpu.memory_space<vmem>>, vector<1x16x128xf32>
      %187 = vector.shape_cast %186 : vector<1x16x128xf32> to vector<16x128xf32>
      %188 = arith.truncf %152 : vector<16x32xf32> to vector<16x32xbf16>
      %cst_101 = arith.constant dense<0.000000e+00> : vector<16x128xf32>
      %189 = tpu.matmul %188, %27, %cst_101 {dimension_numbers = #tpu.dot_dimension_numbers<[1], [0], [0], [1], [0, 0, 1, 1], [], []>} : vector<16x32xbf16>, vector<32x128xbf16>, vector<16x128xf32> -> vector<16x128xf32>
      %190 = arith.addf %187, %189 : vector<16x128xf32>
      %191 = arith.index_cast %184 : i32 to index
      %c0_102 = arith.constant 0 : index
      %c128_103 = arith.constant 128 : index
      %192 = vector.load %arg11[%191, %c0_102, %c128_103] : memref<8x16x256xf32, #tpu.memory_space<vmem>>, vector<1x16x128xf32>
      %193 = vector.shape_cast %192 : vector<1x16x128xf32> to vector<16x128xf32>
      %194 = arith.truncf %173 : vector<16x32xf32> to vector<16x32xbf16>
      %cst_104 = arith.constant dense<0.000000e+00> : vector<16x128xf32>
      %195 = tpu.matmul %194, %29, %cst_104 {dimension_numbers = #tpu.dot_dimension_numbers<[1], [0], [0], [1], [0, 0, 1, 1], [], []>} : vector<16x32xbf16>, vector<32x128xbf16>, vector<16x128xf32> -> vector<16x128xf32>
      %196 = arith.addf %193, %195 : vector<16x128xf32>
      %197 = math.tanh %190 : vector<16x128xf32>
      %198 = math.tanh %196 : vector<16x128xf32>
      %199 = vector.extract_strided_slice %197 {offsets = [0, 0], sizes = [16, 32], strides = [1, 1]} : vector<16x128xf32> to vector<16x32xf32>
      %cst_105 = arith.constant 5.000000e-01 : f32
      %200 = vector.broadcast %cst_105 : f32 to vector<16x32xf32>
      %201 = arith.mulf %200, %199 : vector<16x32xf32>
      %cst_106 = arith.constant 5.000000e-01 : f32
      %202 = vector.broadcast %cst_106 : f32 to vector<16x32xf32>
      %203 = arith.addf %202, %201 : vector<16x32xf32>
      %204 = vector.extract_strided_slice %197 {offsets = [0, 32], sizes = [16, 32], strides = [1, 1]} : vector<16x128xf32> to vector<16x32xf32>
      %cst_107 = arith.constant 5.000000e-01 : f32
      %205 = vector.broadcast %cst_107 : f32 to vector<16x32xf32>
      %206 = arith.mulf %205, %204 : vector<16x32xf32>
      %cst_108 = arith.constant 5.000000e-01 : f32
      %207 = vector.broadcast %cst_108 : f32 to vector<16x32xf32>
      %208 = arith.addf %207, %206 : vector<16x32xf32>
      %209 = vector.extract_strided_slice %197 {offsets = [0, 64], sizes = [16, 32], strides = [1, 1]} : vector<16x128xf32> to vector<16x32xf32>
      %210 = vector.extract_strided_slice %197 {offsets = [0, 96], sizes = [16, 32], strides = [1, 1]} : vector<16x128xf32> to vector<16x32xf32>
      %cst_109 = arith.constant 5.000000e-01 : f32
      %211 = vector.broadcast %cst_109 : f32 to vector<16x32xf32>
      %212 = arith.mulf %211, %210 : vector<16x32xf32>
      %cst_110 = arith.constant 5.000000e-01 : f32
      %213 = vector.broadcast %cst_110 : f32 to vector<16x32xf32>
      %214 = arith.addf %213, %212 : vector<16x32xf32>
      %215 = arith.mulf %208, %150 : vector<16x32xf32>
      %216 = arith.mulf %203, %209 : vector<16x32xf32>
      %217 = arith.addf %215, %216 : vector<16x32xf32>
      %218 = math.tanh %217 : vector<16x32xf32>
      %219 = arith.mulf %214, %218 : vector<16x32xf32>
      %220 = vector.extract_strided_slice %198 {offsets = [0, 0], sizes = [16, 32], strides = [1, 1]} : vector<16x128xf32> to vector<16x32xf32>
      %cst_111 = arith.constant 5.000000e-01 : f32
      %221 = vector.broadcast %cst_111 : f32 to vector<16x32xf32>
      %222 = arith.mulf %221, %220 : vector<16x32xf32>
      %cst_112 = arith.constant 5.000000e-01 : f32
      %223 = vector.broadcast %cst_112 : f32 to vector<16x32xf32>
      %224 = arith.addf %223, %222 : vector<16x32xf32>
      %225 = vector.extract_strided_slice %198 {offsets = [0, 32], sizes = [16, 32], strides = [1, 1]} : vector<16x128xf32> to vector<16x32xf32>
      %cst_113 = arith.constant 5.000000e-01 : f32
      %226 = vector.broadcast %cst_113 : f32 to vector<16x32xf32>
      %227 = arith.mulf %226, %225 : vector<16x32xf32>
      %cst_114 = arith.constant 5.000000e-01 : f32
      %228 = vector.broadcast %cst_114 : f32 to vector<16x32xf32>
      %229 = arith.addf %228, %227 : vector<16x32xf32>
      %230 = vector.extract_strided_slice %198 {offsets = [0, 64], sizes = [16, 32], strides = [1, 1]} : vector<16x128xf32> to vector<16x32xf32>
      %231 = vector.extract_strided_slice %198 {offsets = [0, 96], sizes = [16, 32], strides = [1, 1]} : vector<16x128xf32> to vector<16x32xf32>
      %cst_115 = arith.constant 5.000000e-01 : f32
      %232 = vector.broadcast %cst_115 : f32 to vector<16x32xf32>
      %233 = arith.mulf %232, %231 : vector<16x32xf32>
      %cst_116 = arith.constant 5.000000e-01 : f32
      %234 = vector.broadcast %cst_116 : f32 to vector<16x32xf32>
      %235 = arith.addf %234, %233 : vector<16x32xf32>
      %236 = arith.mulf %229, %171 : vector<16x32xf32>
      %237 = arith.mulf %224, %230 : vector<16x32xf32>
      %238 = arith.addf %236, %237 : vector<16x32xf32>
      %239 = math.tanh %238 : vector<16x32xf32>
      %240 = arith.mulf %235, %239 : vector<16x32xf32>
      %241 = arith.index_cast %183 : i32 to index
      %c0_117 = arith.constant 0 : index
      %c0_118 = arith.constant 0 : index
      %242 = vector.load %arg12[%241, %c0_117, %c0_118] : memref<8x16x64xf32, #tpu.memory_space<vmem>>, vector<1x16x32xf32>
      %243 = vector.shape_cast %242 : vector<1x16x32xf32> to vector<16x32xf32>
      %244 = vector.shape_cast %219 : vector<16x32xf32> to vector<1x16x32xf32>
      tpu.vector_store %arg12[%241, %c0_117, %c0_118], %244 {strides = array<i32>} : memref<8x16x64xf32, #tpu.memory_space<vmem>>, vector<1x16x32xf32>,
      %245 = arith.index_cast %184 : i32 to index
      %c0_119 = arith.constant 0 : index
      %c32_120 = arith.constant 32 : index
      %246 = vector.load %arg12[%245, %c0_119, %c32_120] : memref<8x16x64xf32, #tpu.memory_space<vmem>>, vector<1x16x32xf32>
      %247 = vector.shape_cast %246 : vector<1x16x32xf32> to vector<16x32xf32>
      %248 = vector.shape_cast %240 : vector<16x32xf32> to vector<1x16x32xf32>
      tpu.vector_store %arg12[%245, %c0_119, %c32_120], %248 {strides = array<i32>} : memref<8x16x64xf32, #tpu.memory_space<vmem>>, vector<1x16x32xf32>,
      %c4_i32_121 = arith.constant 4 : i32
      %249 = arith.muli %arg13, %c4_i32_121 : i32
      %c3_i32 = arith.constant 3 : i32
      %250 = arith.addi %249, %c3_i32 : i32
      %c7_i32_122 = arith.constant 7 : i32
      %251 = arith.subi %c7_i32_122, %250 : i32
      %252 = arith.index_cast %250 : i32 to index
      %c0_123 = arith.constant 0 : index
      %c0_124 = arith.constant 0 : index
      %253 = vector.load %arg11[%252, %c0_123, %c0_124] : memref<8x16x256xf32, #tpu.memory_space<vmem>>, vector<1x16x128xf32>
      %254 = vector.shape_cast %253 : vector<1x16x128xf32> to vector<16x128xf32>
      %255 = arith.truncf %219 : vector<16x32xf32> to vector<16x32xbf16>
      %cst_125 = arith.constant dense<0.000000e+00> : vector<16x128xf32>
      %256 = tpu.matmul %255, %27, %cst_125 {dimension_numbers = #tpu.dot_dimension_numbers<[1], [0], [0], [1], [0, 0, 1, 1], [], []>} : vector<16x32xbf16>, vector<32x128xbf16>, vector<16x128xf32> -> vector<16x128xf32>
      %257 = arith.addf %254, %256 : vector<16x128xf32>
      %258 = arith.index_cast %251 : i32 to index
      %c0_126 = arith.constant 0 : index
      %c128_127 = arith.constant 128 : index
      %259 = vector.load %arg11[%258, %c0_126, %c128_127] : memref<8x16x256xf32, #tpu.memory_space<vmem>>, vector<1x16x128xf32>
      %260 = vector.shape_cast %259 : vector<1x16x128xf32> to vector<16x128xf32>
      %261 = arith.truncf %240 : vector<16x32xf32> to vector<16x32xbf16>
      %cst_128 = arith.constant dense<0.000000e+00> : vector<16x128xf32>
      %262 = tpu.matmul %261, %29, %cst_128 {dimension_numbers = #tpu.dot_dimension_numbers<[1], [0], [0], [1], [0, 0, 1, 1], [], []>} : vector<16x32xbf16>, vector<32x128xbf16>, vector<16x128xf32> -> vector<16x128xf32>
      %263 = arith.addf %260, %262 : vector<16x128xf32>
      %264 = math.tanh %257 : vector<16x128xf32>
      %265 = math.tanh %263 : vector<16x128xf32>
      %266 = vector.extract_strided_slice %264 {offsets = [0, 0], sizes = [16, 32], strides = [1, 1]} : vector<16x128xf32> to vector<16x32xf32>
      %cst_129 = arith.constant 5.000000e-01 : f32
      %267 = vector.broadcast %cst_129 : f32 to vector<16x32xf32>
      %268 = arith.mulf %267, %266 : vector<16x32xf32>
      %cst_130 = arith.constant 5.000000e-01 : f32
      %269 = vector.broadcast %cst_130 : f32 to vector<16x32xf32>
      %270 = arith.addf %269, %268 : vector<16x32xf32>
      %271 = vector.extract_strided_slice %264 {offsets = [0, 32], sizes = [16, 32], strides = [1, 1]} : vector<16x128xf32> to vector<16x32xf32>
      %cst_131 = arith.constant 5.000000e-01 : f32
      %272 = vector.broadcast %cst_131 : f32 to vector<16x32xf32>
      %273 = arith.mulf %272, %271 : vector<16x32xf32>
      %cst_132 = arith.constant 5.000000e-01 : f32
      %274 = vector.broadcast %cst_132 : f32 to vector<16x32xf32>
      %275 = arith.addf %274, %273 : vector<16x32xf32>
      %276 = vector.extract_strided_slice %264 {offsets = [0, 64], sizes = [16, 32], strides = [1, 1]} : vector<16x128xf32> to vector<16x32xf32>
      %277 = vector.extract_strided_slice %264 {offsets = [0, 96], sizes = [16, 32], strides = [1, 1]} : vector<16x128xf32> to vector<16x32xf32>
      %cst_133 = arith.constant 5.000000e-01 : f32
      %278 = vector.broadcast %cst_133 : f32 to vector<16x32xf32>
      %279 = arith.mulf %278, %277 : vector<16x32xf32>
      %cst_134 = arith.constant 5.000000e-01 : f32
      %280 = vector.broadcast %cst_134 : f32 to vector<16x32xf32>
      %281 = arith.addf %280, %279 : vector<16x32xf32>
      %282 = arith.mulf %275, %217 : vector<16x32xf32>
      %283 = arith.mulf %270, %276 : vector<16x32xf32>
      %284 = arith.addf %282, %283 : vector<16x32xf32>
      %285 = math.tanh %284 : vector<16x32xf32>
      %286 = arith.mulf %281, %285 : vector<16x32xf32>
      %287 = vector.extract_strided_slice %265 {offsets = [0, 0], sizes = [16, 32], strides = [1, 1]} : vector<16x128xf32> to vector<16x32xf32>
      %cst_135 = arith.constant 5.000000e-01 : f32
      %288 = vector.broadcast %cst_135 : f32 to vector<16x32xf32>
      %289 = arith.mulf %288, %287 : vector<16x32xf32>
      %cst_136 = arith.constant 5.000000e-01 : f32
      %290 = vector.broadcast %cst_136 : f32 to vector<16x32xf32>
      %291 = arith.addf %290, %289 : vector<16x32xf32>
      %292 = vector.extract_strided_slice %265 {offsets = [0, 32], sizes = [16, 32], strides = [1, 1]} : vector<16x128xf32> to vector<16x32xf32>
      %cst_137 = arith.constant 5.000000e-01 : f32
      %293 = vector.broadcast %cst_137 : f32 to vector<16x32xf32>
      %294 = arith.mulf %293, %292 : vector<16x32xf32>
      %cst_138 = arith.constant 5.000000e-01 : f32
      %295 = vector.broadcast %cst_138 : f32 to vector<16x32xf32>
      %296 = arith.addf %295, %294 : vector<16x32xf32>
      %297 = vector.extract_strided_slice %265 {offsets = [0, 64], sizes = [16, 32], strides = [1, 1]} : vector<16x128xf32> to vector<16x32xf32>
      %298 = vector.extract_strided_slice %265 {offsets = [0, 96], sizes = [16, 32], strides = [1, 1]} : vector<16x128xf32> to vector<16x32xf32>
      %cst_139 = arith.constant 5.000000e-01 : f32
      %299 = vector.broadcast %cst_139 : f32 to vector<16x32xf32>
      %300 = arith.mulf %299, %298 : vector<16x32xf32>
      %cst_140 = arith.constant 5.000000e-01 : f32
      %301 = vector.broadcast %cst_140 : f32 to vector<16x32xf32>
      %302 = arith.addf %301, %300 : vector<16x32xf32>
      %303 = arith.mulf %296, %238 : vector<16x32xf32>
      %304 = arith.mulf %291, %297 : vector<16x32xf32>
      %305 = arith.addf %303, %304 : vector<16x32xf32>
      %306 = math.tanh %305 : vector<16x32xf32>
      %307 = arith.mulf %302, %306 : vector<16x32xf32>
      %308 = arith.index_cast %250 : i32 to index
      %c0_141 = arith.constant 0 : index
      %c0_142 = arith.constant 0 : index
      %309 = vector.load %arg12[%308, %c0_141, %c0_142] : memref<8x16x64xf32, #tpu.memory_space<vmem>>, vector<1x16x32xf32>
      %310 = vector.shape_cast %309 : vector<1x16x32xf32> to vector<16x32xf32>
      %311 = vector.shape_cast %286 : vector<16x32xf32> to vector<1x16x32xf32>
      tpu.vector_store %arg12[%308, %c0_141, %c0_142], %311 {strides = array<i32>} : memref<8x16x64xf32, #tpu.memory_space<vmem>>, vector<1x16x32xf32>,
      %312 = arith.index_cast %251 : i32 to index
      %c0_143 = arith.constant 0 : index
      %c32_144 = arith.constant 32 : index
      %313 = vector.load %arg12[%312, %c0_143, %c32_144] : memref<8x16x64xf32, #tpu.memory_space<vmem>>, vector<1x16x32xf32>
      %314 = vector.shape_cast %313 : vector<1x16x32xf32> to vector<16x32xf32>
      %315 = vector.shape_cast %307 : vector<16x32xf32> to vector<1x16x32xf32>
      tpu.vector_store %arg12[%312, %c0_143, %c32_144], %315 {strides = array<i32>} : memref<8x16x64xf32, #tpu.memory_space<vmem>>, vector<1x16x32xf32>,
      scf.yield %286, %284, %307, %305 : vector<16x32xf32>, vector<16x32xf32>, vector<16x32xf32>, vector<16x32xf32>
    }
    %c2_i32_37 = arith.constant 2 : i32
    %c0_38 = arith.constant 0 : index
    %c0_39 = arith.constant 0 : index
    %c0_40 = arith.constant 0 : index
    %33 = vector.load %arg12[%c0_38, %c0_39, %c0_40] : memref<8x16x64xf32, #tpu.memory_space<vmem>>, vector<8x16x64xf32>
    %34 = vector.shape_cast %33 : vector<8x16x64xf32> to vector<128x64xf32>
    %35 = arith.truncf %34 : vector<128x64xf32> to vector<128x64xbf16>
    %c0_41 = arith.constant 0 : index
    %c0_42 = arith.constant 0 : index
    %36 = vector.load %arg8[%c0_41, %c0_42] : memref<64x32xbf16, #tpu.memory_space<vmem>>, vector<64x32xbf16>
    %cst_43 = arith.constant dense<0.000000e+00> : vector<128x32xf32>
    %37 = tpu.matmul %35, %36, %cst_43 {dimension_numbers = #tpu.dot_dimension_numbers<[1], [0], [0], [1], [0, 0, 1, 1], [], []>} : vector<128x64xbf16>, vector<64x32xbf16>, vector<128x32xf32> -> vector<128x32xf32>
    %c0_44 = arith.constant 0 : index
    %c0_45 = arith.constant 0 : index
    %38 = vector.load %arg9[%c0_44, %c0_45] : memref<1x32xf32, #tpu.memory_space<vmem>>, vector<1x32xf32>
    %39 = vector.broadcast %38 : vector<1x32xf32> to vector<128x32xf32>
    %40 = arith.addf %37, %39 : vector<128x32xf32>
    %41 = arith.negf %40 : vector<128x32xf32>
    %42 = math.exp %41 : vector<128x32xf32>
    %cst_46 = arith.constant 1.000000e+00 : f32
    %43 = vector.broadcast %cst_46 : f32 to vector<128x32xf32>
    %44 = arith.addf %43, %42 : vector<128x32xf32>
    %45 = arith.divf %43, %44 : vector<128x32xf32>
    %46 = vector.shape_cast %45 : vector<128x32xf32> to vector<8x16x32xf32>
    %c0_47 = arith.constant 0 : index
    %c0_48 = arith.constant 0 : index
    %c0_49 = arith.constant 0 : index
    %47 = vector.load %arg10[%c0_47, %c0_48, %c0_49] : memref<8x16x32xf32, #tpu.memory_space<vmem>>, vector<8x16x32xf32>
    tpu.vector_store %arg10[%c0_47, %c0_48, %c0_49], %46 {strides = array<i32>} : memref<8x16x32xf32, #tpu.memory_space<vmem>>, vector<8x16x32xf32>,
    return
  }
  func.func @transform_0(%arg0: i32) -> (i32, i32, i32) {
    %c0_i32 = arith.constant 0 : i32
    %c0_i32_0 = arith.constant 0 : i32
    %c0_i32_1 = arith.constant 0 : i32
    return %c0_i32, %arg0, %c0_i32_0 : i32, i32, i32
  }
  func.func @transform_1(%arg0: i32) -> (i32, i32) {
    %c0_i32 = arith.constant 0 : i32
    %c0_i32_0 = arith.constant 0 : i32
    %c0_i32_1 = arith.constant 0 : i32
    return %c0_i32, %c0_i32_0 : i32, i32
  }
  func.func @transform_2(%arg0: i32) -> (i32, i32, i32) {
    %c0_i32 = arith.constant 0 : i32
    %c0_i32_0 = arith.constant 0 : i32
    %c0_i32_1 = arith.constant 0 : i32
    %c0_i32_2 = arith.constant 0 : i32
    return %c0_i32, %c0_i32_0, %c0_i32_1 : i32, i32, i32
  }
  func.func @transform_3(%arg0: i32) -> (i32, i32) {
    %c0_i32 = arith.constant 0 : i32
    %c0_i32_0 = arith.constant 0 : i32
    %c0_i32_1 = arith.constant 0 : i32
    return %c0_i32, %c0_i32_0 : i32, i32
  }
  func.func @transform_4(%arg0: i32) -> (i32, i32) {
    %c0_i32 = arith.constant 0 : i32
    %c0_i32_0 = arith.constant 0 : i32
    %c0_i32_1 = arith.constant 0 : i32
    return %c0_i32, %c0_i32_0 : i32, i32
  }
  func.func @transform_5(%arg0: i32) -> (i32, i32, i32) {
    %c0_i32 = arith.constant 0 : i32
    %c0_i32_0 = arith.constant 0 : i32
    %c0_i32_1 = arith.constant 0 : i32
    %c0_i32_2 = arith.constant 0 : i32
    return %c0_i32, %c0_i32_0, %c0_i32_1 : i32, i32, i32
  }
  func.func @transform_6(%arg0: i32) -> (i32, i32) {
    %c0_i32 = arith.constant 0 : i32
    %c0_i32_0 = arith.constant 0 : i32
    %c0_i32_1 = arith.constant 0 : i32
    return %c0_i32, %c0_i32_0 : i32, i32
  }
  func.func @transform_7(%arg0: i32) -> (i32, i32) {
    %c0_i32 = arith.constant 0 : i32
    %c0_i32_0 = arith.constant 0 : i32
    %c0_i32_1 = arith.constant 0 : i32
    return %c0_i32, %c0_i32_0 : i32, i32
  }
  func.func @transform_8(%arg0: i32) -> (i32, i32) {
    %c0_i32 = arith.constant 0 : i32
    %c0_i32_0 = arith.constant 0 : i32
    %c0_i32_1 = arith.constant 0 : i32
    return %c0_i32, %c0_i32_0 : i32, i32
  }
  func.func @transform_9(%arg0: i32) -> (i32, i32, i32) {
    %c0_i32 = arith.constant 0 : i32
    %c0_i32_0 = arith.constant 0 : i32
    %c0_i32_1 = arith.constant 0 : i32
    return %c0_i32, %arg0, %c0_i32_0 : i32, i32, i32
  }
}

</mosaic_0001>

<bundles_post_ra>
// kernel: tile.18
= control target key start
LH: loop header
LB: loop body
LE: loop exit
PB: predicated region body
PF: predicated region fallthrough
CT: control target
= control target key end

     0   :  { %s22_s0 = inlined_call_operand.vmem [shape: f32[128], index: 0, kind: input, shape index: {}]   ;;  %s23_s1 = inlined_call_operand.vmem [shape: f32[2,128], index: 1, kind: output, shape index: {}]  }
   0x1   :  { %v4_v0 = vld [vmem:[%s22_s0] ss:$0 sm:$0xff] }
   0x2   :  { %5 = vst [vmem:[%s23_s1] sm:$0x3] %v4_v0 }

// kernel: bilstm_forward.1
= control target key start
LH: loop header
LB: loop body
LE: loop exit
PB: predicated region body
PF: predicated region fallthrough
CT: control target
= control target key end

     0   :  { %s4032_s30 = smov 0   ;;  %s4034_s10 = smov 0   ;;  %s5286_s0 = inlined_call_operand.vmem [shape: bf16[8,32,32], index: 0, kind: input, shape index: {}]   ;;  %s5287_s1 = inlined_call_operand.vmem [shape: bf16[32,256], index: 1, kind: input, shape index: {}]   ;;  %s5288_s2 = inlined_call_operand.vmem [shape: bf16[2,32,128], index: 2, kind: input, shape index: {}]   ;;  %s5289_s3 = inlined_call_operand.vmem [shape: f32[1,256], index: 3, kind: input, shape index: {}]   ;;  %s5290_s4 = inlined_call_operand.vmem [shape: bf16[64,256], index: 4, kind: input, shape index: {}]   ;;  %s5291_s5 = inlined_call_operand.vmem [shape: bf16[2,32,128], index: 5, kind: input, shape index: {}]   ;;  %s5292_s6 = inlined_call_operand.vmem [shape: f32[1,256], index: 6, kind: input, shape index: {}]   ;;  %s5293_s7 = inlined_call_operand.vmem [shape: bf16[64,32], index: 7, kind: input, shape index: {}]   ;;  %s5294_s8 = inlined_call_operand.vmem [shape: f32[1,32], index: 8, kind: input, shape index: {}]   ;;  %s5295_s9 = inlined_call_operand.vmem [shape: f32[8,32,32], index: 9, kind: output, shape index: {}]  }
   0x1   :  { %s4036_s11 = smov 0  }
   0x2 LB: > { %s3058_s12 = sadd.s32 4294967295, %s3904_s11   ;;  %s4049_s13 = sadd.s32 1, %s3904_s11   ;;  %s3904_s11 = sphi %s4036_s11, %s5321_s11   ;;  %s3900_s10 = sphi %s4034_s10, %s5320_s10   ;;  %s3896_s30 = sphi %s4032_s30, %s5319_s30  }
   0x3   : > { %s23_s14 = ssub.s32 %s3904_s11, %s4049_s13  ;;  %s26_s15 = sadd.s32 1, %s3900_s10 }
   0x4   : > { %p24_p0 = scmp.eq.s32.totalorder %s23_s14, 0  ;;  %p33_p1 = scmp.ne.s32.totalorder %s3900_s10, %s3896_s30 }
   0x5   : > { %p34_p2 = scmp.eq.s32.totalorder %s3904_s11, 0  ;;  %p231_p3 = scmp.eq.s32.totalorder %s3058_s12, 1 }
   0x6   : > { %s4060_s16 = scalar_select %p24_p0, %s3900_s10, %s26_s15  }
   0x7   : > { %p35_p4 = por %p34_p2, %p33_p1  ;;  %p4062_p5 = por %p231_p3, %p33_p1 }
   0x8   : > { %p3061_p6 = scmp.ge.s32.totalorder %s3904_s11, 2 }
   0xa   : > { %277 = sbr.rel (%p3061_p6) target bundleno = 27 (0x1b), region = 48 }
   0xf   : > { %280 = sbr.rel (!%p35_p4) target bundleno = 27 (0x1b), region = 52  ;;  %s282_s18 = sand.u32 (%p35_p4), 1, %s3900_s10  }
  0x10   : > { %s3361_s19 = sshll.u32 (%p35_p4), %s3904_s11, 3  ;;  %s3062_s20 = sshll.u32 (%p35_p4), %s282_s18, 6 }
  0x11   : > { %s287_s23 = scalar_lea.vmem (%p35_p4), %s5286_s0, %s3361_s19  ;;  %s284_s24 = scalar_lea.vmem (%p35_p4), [#allocation4], %s3062_s20 }
  0x12   : > { %v304_v0 = vld [vmem:[%s287_s23] sm:$0xff] (%p35_p4)   ;;  %v308_v1 = vld [vmem:[%s287_s23 + $0x10] sm:$0xff] (%p35_p4)  }
  0x13   : > { %v312_v2 = vld [vmem:[%s287_s23 + $0x20] sm:$0xff] (%p35_p4)   ;;  %305 = vst [vmem:[%s284_s24] sm:$0xff] (%p35_p4), %v304_v0   ;;  %v316_v3 = vld [vmem:[%s287_s23 + $0x30] sm:$0xff] (%p35_p4)  }
  0x14   : > { %309 = vst [vmem:[%s284_s24 + $0x8] sm:$0xff] %v308_v1   ;;  %v320_v4 = vld [vmem:[%s287_s23 + $0x40] sm:$0xff]   ;;  %v324_v5 = vld [vmem:[%s287_s23 + $0x50] sm:$0xff]  }
  0x15   : > { %313 = vst [vmem:[%s284_s24 + $0x10] sm:$0xff] %v312_v2   ;;  %v328_v6 = vld [vmem:[%s287_s23 + $0x60] sm:$0xff]   ;;  %v332_v7 = vld [vmem:[%s287_s23 + $0x70] sm:$0xff]  }
  0x16   : > { %317 = vst [vmem:[%s284_s24 + $0x18] sm:$0xff] %v316_v3  }
  0x17   : > { %321 = vst [vmem:[%s284_s24 + $0x20] sm:$0xff] %v320_v4  }
  0x18   : > { %325 = vst [vmem:[%s284_s24 + $0x28] sm:$0xff] %v324_v5  }
  0x19   : > { %329 = vst [vmem:[%s284_s24 + $0x30] sm:$0xff] %v328_v6  }
  0x1a   : > { %333 = vst [vmem:[%s284_s24 + $0x38] sm:$0xff] %v332_v7  }
  0x1b PF: > { %p3065_p7 = scmp.ge.s32.totalorder %s3904_s11, 1  ;;  %p390_p8 = scmp.lt.s32.totalorder %s3904_s11, 3 }
  0x1d   : > { %p391_p9 = pnand %p3065_p7, %p390_p8 }
  0x1e   : > { %s397_s27 = sand.u32 (!%p391_p9), 1, %s3896_s30   ;;  %s4215_s21 = smov (!%p391_p9), 0  }
  0x1f   : > { %394 = sbr.rel (%p391_p9) target bundleno = 5661 (0x161d), region = 93  ;;  %s3066_s28 = sshll.u32 (!%p391_p9), %s397_s27, 6 }
  0x20   : > { %s4099_s29 = sshll.u32 (!%p391_p9), %s397_s27, 7  ;;  %s399_s14 = scalar_lea.vmem (!%p391_p9), [#allocation4], %s3066_s28 }
  0x21   : > { %s4197_s20 = scalar_lea.vmem (!%p391_p9), [#allocation5], %s4099_s29 }
  0x24   : > { %v3110_v8 = vld [vmem:[%s5287_s1 + $0x10] sm:$0xf]  ;;  %v3373_v9 = vld [vmem:[%s5287_s1 + $0x14] sm:$0xf0]  ;;  %v3372_v10 = vld [vmem:[%s5287_s1 + $0x14] sm:$0xf] }
  0x25   : > { %v3111_v11 = vor.u32 %v3373_v9, %v3110_v8  ;;  %v3112_v12 = vld [vmem:[%s5287_s1 + $0x18] sm:$0xf0]  ;;  %v3102_v13 = vld [vmem:[%s5287_s1] sm:$0xf]  ;;  %v3371_v14 = vld [vmem:[%s5287_s1 + $0x4] sm:$0xf0] }
  0x26   : > { %v3115_v15 = vor.u32 %v3372_v10, %v3112_v12  ;;  %v3370_v16 = vld [vmem:[%s5287_s1 + $0x4] sm:$0xf]  ;;  %v3104_v17 = vld [vmem:[%s5287_s1 + $0x8] sm:$0xf0]  ;;  %v3103_v18 = vor.u32 %v3371_v14, %v3102_v13  ;;  %vm520_vm0 = vcmask 261120   ;;  %v3363_v22 = vld [vmem:[%s399_s14 + $0x8] sm:$0xff] }
  0x27   : > { %551 = vmatpush.bf16.msra.mxu0 %v3111_v11  ;;  %3421 = vmatpush.bf16.msra.mxu2 %v3111_v11  ;;  %v3107_v19 = vor.u32 %v3370_v16, %v3104_v17  ;;  %v3362_v20 = vld [vmem:[%s399_s14] sm:$0xff]  ;;  %v3367_v23 = vld [vmem:[%s399_s14 + $0x28] sm:$0xff]  ;;  %v3364_v24 = vld [vmem:[%s399_s14 + $0x10] sm:$0xff] }
  0x28   : > { %600 = vmatpush.bf16.msra.mxu1 %v3115_v15  ;;  %3423 = vmatpush.bf16.msra.mxu3 %v3115_v15  ;;  %v3366_v21 = vld [vmem:[%s399_s14 + $0x20] sm:$0xff]  ;;  %v3368_v25 = vld [vmem:[%s399_s14 + $0x30] sm:$0xff]  ;;  %v3365_v26 = vld [vmem:[%s399_s14 + $0x18] sm:$0xff] }
  0x29   : > { %v3369_v27 = vld [vmem:[%s399_s14 + $0x38] sm:$0xff]  ;;  %v4155_v5 = vld [vmem:[%s5288_s2 + $0x8] sm:$0xf]  ;;  %v4160_v6 = vld [vmem:[%s5288_s2 + $0x8] sm:$0xf0] }
  0x2a   : > { %v454_v28 = vld [vmem:[%s5289_s3] sm:$0x3]  ;;  %v4150_v4 = vld [vmem:[%s5288_s2] sm:$0xf0]  ;;  %v4165_v7 = vld [vmem:[%s5288_s2 + $0x10] sm:$0xf] }
  0x2b   : > { %552 = vmatpush.bf16.msra.mxu0 %v3103_v18  ;;  %3422 = vmatpush.bf16.msra.mxu2 %v3103_v18  ;;  %v4120_v29 = vperm.slane %v454_v28, 0  ;;  %v4122_v30 = vperm.slane %v454_v28, 1  ;;  %v4145_v3 = vld [vmem:[%s5288_s2] sm:$0xf]  ;;  %v4170_v8 = vld [vmem:[%s5288_s2 + $0x10] sm:$0xf0] }
  0x2c   : > { %601 = vmatpush.bf16.msra.mxu1 %v3107_v19  ;;  %3424 = vmatpush.bf16.msra.mxu3 %v3107_v19  ;;  %v4175_v9 = vld [vmem:[%s5288_s2 + $0x18] sm:$0xf]  ;;  %v4180_v10 = vld [vmem:[%s5288_s2 + $0x18] sm:$0xf0] }
  0x2e   : > { %3116 = vmatmul.msk.bf16.vlgmr.msra.gmra.mxu0 %vm520_vm0, %v3362_v20  ;;  %3120 = vmatmul.msk.bf16.vlgmr.msra.gmra.mxu2 %vm520_vm0, %v3366_v21 }
  0x2f   : > { %3124 = vmatmul.msk.bf16.vlgmr.msra.gmra.mxu1 %vm520_vm0, %v3362_v20  ;;  %3128 = vmatmul.msk.bf16.vlgmr.msra.gmra.mxu3 %vm520_vm0, %v3366_v21 }
  0x3e   : > { %3117 = vmatmul.msk.bf16.gmra.mxu0 %vm520_vm0, %v3363_v22  ;;  %3121 = vmatmul.msk.bf16.gmra.mxu2 %vm520_vm0, %v3367_v23 }
  0x3f   : > { %3125 = vmatmul.msk.bf16.gmra.mxu1 %vm520_vm0, %v3363_v22  ;;  %3129 = vmatmul.msk.bf16.gmra.mxu3 %vm520_vm0, %v3367_v23 }
  0x4e   : > { %3118 = vmatmul.msk.bf16.gmra.mxu0 %vm520_vm0, %v3364_v24  ;;  %3122 = vmatmul.msk.bf16.gmra.mxu2 %vm520_vm0, %v3368_v25 }
  0x4f   : > { %3126 = vmatmul.msk.bf16.gmra.mxu1 %vm520_vm0, %v3364_v24  ;;  %3130 = vmatmul.msk.bf16.gmra.mxu3 %vm520_vm0, %v3368_v25 }
  0x5e   : > { %3119 = vmatmul.msk.bf16.gmra.mxu0 %vm520_vm0, %v3365_v26  ;;  %3123 = vmatmul.msk.bf16.gmra.mxu2 %vm520_vm0, %v3369_v27 }
  0x5f   : > { %3127 = vmatmul.msk.bf16.gmra.mxu1 %vm520_vm0, %v3365_v26  ;;  %3131 = vmatmul.msk.bf16.gmra.mxu3 %vm520_vm0, %v3369_v27 }
  0xab   : > { %v554_v31 = vpop.f32.mrf.mxu0 }
  0xac   : > { %v555_v32 = vadd.f32 %v554_v31, %v4120_v29  ;;  %v603_v33 = vpop.f32.mrf.mxu1 }
  0xad   : > { %v604_v34 = vadd.f32 %v603_v33, %v4122_v30 }
  0xae   : > { %643 = vst [vmem:[#allocation2] sm:$0xff] %v555_v32 }
  0xaf   : > { %644 = vst [vmem:[#allocation2 + $0x8] sm:$0xff] %v604_v34 }
  0xb1   : > { %v574_v35 = vpop.f32.mrf.mxu2 }
  0xb2   : > { %v575_v36 = vadd.f32 %v574_v35, %v4120_v29  ;;  %v623_v37 = vpop.f32.mrf.mxu3 }
  0xb3   : > { %v624_v38 = vadd.f32 %v623_v37, %v4122_v30  ;;  %v556_v39 = vpop.f32.mrf.mxu0 }
  0xb4   : > { %659 = vst [vmem:[#allocation2 + $0x80] sm:$0xff] %v575_v36  ;;  %v557_v40 = vadd.f32 %v556_v39, %v4120_v29  ;;  %v605_v41 = vpop.f32.mrf.mxu1 }
  0xb5   : > { %660 = vst [vmem:[#allocation2 + $0x88] sm:$0xff] %v624_v38  ;;  %v606_v42 = vadd.f32 %v605_v41, %v4122_v30  ;;  %v4199_v41 = vmov 0.0  }
  0xb6   : > { %645 = vst [vmem:[#allocation2 + $0x10] sm:$0xff] %v557_v40 }
  0xb7   : > { %646 = vst [vmem:[#allocation2 + $0x18] sm:$0xff] %v606_v42  ;;  %v4201_v42 = vmov 0.0  }
  0xb9   : > { %v576_v43 = vpop.f32.mrf.mxu2 }
  0xba   : > { %v577_v44 = vadd.f32 %v576_v43, %v4120_v29  ;;  %v625_v45 = vpop.f32.mrf.mxu3  ;;  %v4203_v43 = vmov 0.0  }
  0xbb   : > { %v626_v46 = vadd.f32 %v625_v45, %v4122_v30  ;;  %v559_v47 = vpop.f32.mrf.mxu0  ;;  %v4207_v45 = vmov 0.0  }
  0xbc   : > { %661 = vst [vmem:[#allocation2 + $0x90] sm:$0xff] %v577_v44  ;;  %v560_v48 = vadd.f32 %v559_v47, %v4120_v29  ;;  %v608_v49 = vpop.f32.mrf.mxu1  ;;  %v4205_v44 = vmov 0.0   ;;  %v4213_v47 = vmov 0.0  }
  0xbd   : > { %662 = vst [vmem:[#allocation2 + $0x98] sm:$0xff] %v626_v46  ;;  %v609_v50 = vadd.f32 %v608_v49, %v4122_v30  ;;  %v4209_v46 = vmov 0.0  }
  0xbe   : > { %647 = vst [vmem:[#allocation2 + $0x20] sm:$0xff] %v560_v48 }
  0xbf   : > { %648 = vst [vmem:[#allocation2 + $0x28] sm:$0xff] %v609_v50 }
  0xc1   : > { %v579_v51 = vpop.f32.mrf.mxu2 }
  0xc2   : > { %v580_v52 = vadd.f32 %v579_v51, %v4120_v29  ;;  %v628_v53 = vpop.f32.mrf.mxu3 }
  0xc3   : > { %v629_v54 = vadd.f32 %v628_v53, %v4122_v30  ;;  %v561_v55 = vpop.f32.mrf.mxu0 }
  0xc4   : > { %663 = vst [vmem:[#allocation2 + $0xa0] sm:$0xff] %v580_v52  ;;  %v562_v56 = vadd.f32 %v561_v55, %v4120_v29  ;;  %v610_v57 = vpop.f32.mrf.mxu1 }
  0xc5   : > { %664 = vst [vmem:[#allocation2 + $0xa8] sm:$0xff] %v629_v54  ;;  %v611_v58 = vadd.f32 %v610_v57, %v4122_v30 }
  0xc6   : > { %649 = vst [vmem:[#allocation2 + $0x30] sm:$0xff] %v562_v56 }
  0xc7   : > { %650 = vst [vmem:[#allocation2 + $0x38] sm:$0xff] %v611_v58 }
  0xc9   : > { %v581_v59 = vpop.f32.mrf.mxu2 }
  0xca   : > { %v582_v60 = vadd.f32 %v581_v59, %v4120_v29  ;;  %v630_v61 = vpop.f32.mrf.mxu3 }
  0xcb   : > { %v631_v62 = vadd.f32 %v630_v61, %v4122_v30  ;;  %v564_v63 = vpop.f32.mrf.mxu0 }
  0xcc   : > { %665 = vst [vmem:[#allocation2 + $0xb0] sm:$0xff] %v582_v60  ;;  %v565_v0 = vadd.f32 %v564_v63, %v4120_v29  ;;  %v613_v1 = vpop.f32.mrf.mxu1 }
  0xcd   : > { %666 = vst [vmem:[#allocation2 + $0xb8] sm:$0xff] %v631_v62  ;;  %v614_v2 = vadd.f32 %v613_v1, %v4122_v30 }
  0xce   : > { %651 = vst [vmem:[#allocation2 + $0x40] sm:$0xff] %v565_v0 }
  0xcf   : > { %652 = vst [vmem:[#allocation2 + $0x48] sm:$0xff] %v614_v2 }
  0xd1   : > { %v584_v11 = vpop.f32.mrf.mxu2 }
  0xd2   : > { %v585_v12 = vadd.f32 %v584_v11, %v4120_v29  ;;  %v633_v13 = vpop.f32.mrf.mxu3 }
  0xd3   : > { %v634_v14 = vadd.f32 %v633_v13, %v4122_v30  ;;  %v566_v15 = vpop.f32.mrf.mxu0 }
  0xd4   : > { %667 = vst [vmem:[#allocation2 + $0xc0] sm:$0xff] %v585_v12  ;;  %v567_v16 = vadd.f32 %v566_v15, %v4120_v29  ;;  %v615_v17 = vpop.f32.mrf.mxu1 }
  0xd5   : > { %668 = vst [vmem:[#allocation2 + $0xc8] sm:$0xff] %v634_v14  ;;  %v616_v18 = vadd.f32 %v615_v17, %v4122_v30 }
  0xd6   : > { %653 = vst [vmem:[#allocation2 + $0x50] sm:$0xff] %v567_v16 }
  0xd7   : > { %654 = vst [vmem:[#allocation2 + $0x58] sm:$0xff] %v616_v18 }
  0xd9   : > { %v586_v19 = vpop.f32.mrf.mxu2 }
  0xda   : > { %v587_v20 = vadd.f32 %v586_v19, %v4120_v29  ;;  %v635_v21 = vpop.f32.mrf.mxu3 }
  0xdb   : > { %v636_v22 = vadd.f32 %v635_v21, %v4122_v30  ;;  %v569_v23 = vpop.f32.mrf.mxu0 }
  0xdc   : > { %669 = vst [vmem:[#allocation2 + $0xd0] sm:$0xff] %v587_v20  ;;  %v570_v24 = vadd.f32 %v569_v23, %v4120_v29  ;;  %v618_v25 = vpop.f32.mrf.mxu1 }
  0xdd   : > { %670 = vst [vmem:[#allocation2 + $0xd8] sm:$0xff] %v636_v22  ;;  %v619_v26 = vadd.f32 %v618_v25, %v4122_v30 }
  0xde   : > { %655 = vst [vmem:[#allocation2 + $0x60] sm:$0xff] %v570_v24 }
  0xdf   : > { %656 = vst [vmem:[#allocation2 + $0x68] sm:$0xff] %v619_v26 }
  0xe1   : > { %v589_v27 = vpop.f32.mrf.mxu2 }
  0xe2   : > { %v590_v28 = vadd.f32 %v589_v27, %v4120_v29  ;;  %v638_v31 = vpop.f32.mrf.mxu3 }
  0xe3   : > { %v639_v32 = vadd.f32 %v638_v31, %v4122_v30  ;;  %v571_v33 = vpop.f32.mrf.mxu0 }
  0xe4   : > { %671 = vst [vmem:[#allocation2 + $0xe0] sm:$0xff] %v590_v28  ;;  %v572_v34 = vadd.f32 %v571_v33, %v4120_v29  ;;  %v620_v35 = vpop.f32.mrf.mxu1 }
  0xe5   : > { %672 = vst [vmem:[#allocation2 + $0xe8] sm:$0xff] %v639_v32  ;;  %v621_v36 = vadd.f32 %v620_v35, %v4122_v30 }
  0xe6   : > { %657 = vst [vmem:[#allocation2 + $0x70] sm:$0xff] %v572_v34 }
  0xe7   : > { %658 = vst [vmem:[#allocation2 + $0x78] sm:$0xff] %v621_v36 }
  0xe9   : > { %v591_v37 = vpop.f32.mrf.mxu2 }
  0xea   : > { %v592_v38 = vadd.f32 %v591_v37, %v4120_v29  ;;  %v640_v39 = vpop.f32.mrf.mxu3  ;;  %v4211_v29 = vmov 0.0  }
  0xeb   : > { %v641_v40 = vadd.f32 %v640_v39, %v4122_v30 }
  0xec   : > { %673 = vst [vmem:[#allocation2 + $0xf0] sm:$0xff] %v592_v38 }
  0xed   : > { %674 = vst [vmem:[#allocation2 + $0xf8] sm:$0xff] %v641_v40 }
  0xee LB: >> { %v705_v30 = vpack.c.bf16 %v3932_v29, %v3936_v47  ;;  %v3146_v48 = vor.u32 %v4160_v6, %v4155_v5  ;;  %s3978_s29 = smov 32   ;;  %v3142_v49 = vor.u32 %v4150_v4, %v4145_v3  ;;  %v745_v50 = vpack.c.bf16 %v3916_v43, %v3920_v44  ;;  %s3379_s22 = sshll.u32 %s3940_s21, 7  ;;  %s3940_s21 = sphi %s4215_s21, %s689_s21   ;;  %v3936_v47 = vphi %v4213_v47, %v5298_v47   ;;  %v3932_v29 = vphi %v4211_v29, %v1308_v29   ;;  %v3928_v46 = vphi %v4209_v46, %v5297_v46   ;;  %v3924_v45 = vphi %v4207_v45, %v4436_v45   ;;  %v3920_v44 = vphi %v4205_v44, %v1345_v44   ;;  %v3916_v43 = vphi %v4203_v43, %v1346_v43   ;;  %v3912_v42 = vphi %v4201_v42, %v4422_v42   ;;  %v3908_v41 = vphi %v4199_v41, %v4428_v41  }
  0xef   : >> { %v3157_v51 = vor.u32 %v4180_v10, %v4175_v9  ;;  %v3153_v52 = vor.u32 %v4170_v8, %v4165_v7  ;;  %s4250_s23 = sshll.u32 %s3940_s21, 2  ;;  %s4253_s25 = scalar_lea.vmem [#allocation2], %s3379_s22  ;;  %vm882_vm1 = vcmask 523520  }
  0xf0   : >> { %707 = vrot.lane.b32.xlu0 %v705_v30, %s3978_s29  ;;  %730 = vmatpush.bf16.msra.mxu0 %v3146_v48  ;;  %s699_s24 = ssub.s32 7, %s4250_s23  ;;  %s3979_s28 = smov 64  }
  0xf1   : >> { %905 = vmatpush.bf16.msra.mxu2 %v3146_v48  ;;  %770 = vmatpush.bf16.msra.mxu1 %v3157_v51  ;;  %s3380_s26 = sshll.u32 %s699_s24, 5  ;;  %s886_s14 = ssub.s32 6, %s4250_s23 }
  0xf2   : >> { %933 = vmatpush.bf16.msra.mxu3 %v3157_v51  ;;  %s742_s27 = scalar_lea.vmem [#allocation2], %s3380_s26  ;;  %s3383_s30 = sshll.u32 %s886_s14, 5 }
  0xf3   : >> { %s917_s15 = scalar_lea.vmem [#allocation2], %s3383_s30  ;;  %s1048_s18 = ssub.s32 5, %s4250_s23 }
  0xf4   : >> { %731 = vmatpush.bf16.msra.mxu0 %v3142_v49  ;;  %v703_v55 = vld [vmem:[%s4253_s25] sm:$0xff]  ;;  %v704_v58 = vld [vmem:[%s4253_s25 + $0x10] sm:$0xff]  ;;  %v743_v59 = vld [vmem:[%s742_s27 + $0x8] sm:$0xff]  ;;  %s3386_s19 = sshll.u32 %s1048_s18, 5  ;;  %s1210_s26 = ssub.s32 4, %s4250_s23 }
  0xf5   : >> { %906 = vmatpush.bf16.msra.mxu2 %v3142_v49  ;;  %771 = vmatpush.bf16.msra.mxu1 %v3153_v52  ;;  %v744_v1 = vld [vmem:[%s742_s27 + $0x18] sm:$0xff]  ;;  %s1079_s22 = scalar_lea.vmem [#allocation2], %s3386_s19  ;;  %s3389_s27 = sshll.u32 %s1210_s26, 5 }
  0xf6   : >> { %934 = vmatpush.bf16.msra.mxu3 %v3153_v52  ;;  %s1241_s30 = scalar_lea.vmem [#allocation2], %s3389_s27  ;;  %s3199_s27 = sshll.u32 %s1210_s26, 4 }
  0xf8   : >> { %1067 = vmatpush.bf16.msrb.mxu0 %v3146_v48  ;;  %747 = vrot.lane.b32.xlu0 %v745_v50, %s3978_s29 }
  0xf9   : >> { %1229 = vmatpush.bf16.msrb.mxu2 %v3146_v48  ;;  %1095 = vmatpush.bf16.msrb.mxu1 %v3157_v51 }
  0xfa   : >> { %1257 = vmatpush.bf16.msrb.mxu3 %v3157_v51 }
  0xfc   : >> { %1068 = vmatpush.bf16.msrb.mxu0 %v3142_v49 }
  0xfd   : >> { %1230 = vmatpush.bf16.msrb.mxu2 %v3142_v49  ;;  %1096 = vmatpush.bf16.msrb.mxu1 %v3153_v52 }
  0xfe   : >> { %1258 = vmatpush.bf16.msrb.mxu3 %v3153_v52 }
 0x162   : >> { %v708_v53 = vpop.permute.xlu0 %707 }
 0x163   : >> { %3147 = vmatmul.msk.bf16.vlgmr.msra.gmra.mxu0 %vm520_vm0, %v708_v53 }
 0x16a   : >> { %v748_v54 = vpop.permute.xlu0 %747 }
 0x16b   : >> { %3158 = vmatmul.msk.bf16.vlgmr.msra.gmra.mxu1 %vm520_vm0, %v748_v54 }
 0x1e0   : >> { %v733_v56 = vpop.f32.mrf.mxu0 }
 0x1e1   : >> { %v738_v57 = vadd.f32 %v733_v56, %v703_v55 }
 0x1e3   : >> { %3617 = vtanh.f32 %v738_v57 }
 0x1e8   : >> { %v735_v60 = vpop.f32.mrf.mxu0  ;;  %v773_v61 = vpop.f32.mrf.mxu1 }
 0x1e9   : >> { %v3618_v62 = vpop.eup %3617  ;;  %v739_v63 = vadd.f32 %v735_v60, %v704_v58  ;;  %v778_v0 = vadd.f32 %v773_v61, %v743_v59  ;;  %v3163_v59 = vld [vmem:[%s4253_s25 + $0x20] sm:$0xff] }
 0x1ea   : >> { %792 = vrot.lane.b32.xlu1 %v3618_v62, %s3979_s28  ;;  %v784_v19 = vmul.f32 0.5, %v3618_v62  ;;  %v3164_v62 = vld [vmem:[%s4253_s25 + $0x30] sm:$0xff] }
 0x1eb   : >> { %3619 = vtanh.f32 %v739_v63 }
 0x1ec   : >> { %3621 = vtanh.f32 %v778_v0  ;;  %v786_v20 = vadd.f32 0.5, %v784_v19 }
 0x1ee   : >> { %v788_v37 = vmul.f32 %v3928_v46, %v786_v20 }
 0x1f0   : >> { %v775_v2 = vpop.f32.mrf.mxu1 }
 0x1f1   : >> { %v3620_v11 = vpop.eup %3619  ;;  %v779_v12 = vadd.f32 %v775_v2, %v744_v1 }
 0x1f2   : >> { %v3622_v13 = vpop.eup %3621  ;;  %794 = vrot.lane.b32.xlu1 %v3620_v11, %s3979_s28  ;;  %v785_v24 = vmul.f32 0.5, %v3620_v11  ;;  %v918_v11 = vld [vmem:[%s917_s15 + $0x8] sm:$0xff] }
 0x1f3   : >> { %3623 = vtanh.f32 %v779_v12  ;;  %830 = vrot.lane.b32.xlu2 %v3622_v13, %s3979_s28  ;;  %v822_v15 = vmul.f32 0.5, %v3622_v13 }
 0x1f4   : >> { %v787_v27 = vadd.f32 0.5, %v785_v24 }
 0x1f5   : >> { %v824_v16 = vadd.f32 0.5, %v822_v15 }
 0x1f6   : >> { %v789_v40 = vmul.f32 %v3924_v45, %v787_v27 }
 0x1f7   : >> { %v826_v33 = vmul.f32 %v3912_v42, %v824_v16 }
 0x1f9   : >> { %v3624_v14 = vpop.eup %3623 }
 0x1fa   : >> { %v823_v23 = vmul.f32 0.5, %v3624_v14 }
 0x1fb   : >> { %832 = vrot.lane.b32.xlu2 %v3624_v14, %s3979_s28  ;;  %v919_v14 = vld [vmem:[%s917_s15 + $0x18] sm:$0xff] }
 0x1fc   : >> { %v825_v26 = vadd.f32 0.5, %v823_v23 }
 0x1fe   : >> { %v827_v43 = vmul.f32 %v3908_v41, %v825_v26 }
 0x24d   : >> { %v831_v17 = vpop.permute.xlu2 %830 }
 0x24e   : >> { %v836_v18 = vmul.f32 %v831_v17, %v824_v16 }
 0x250   : >> { %840 = vrot.lane.b32.xlu2 %v836_v18, %s3978_s29 }
 0x255   : >> { %v833_v25 = vpop.permute.xlu2 %832 }
 0x256   : >> { %v837_v31 = vmul.f32 %v833_v25, %v825_v26 }
 0x25c   : >> { %v793_v21 = vpop.permute.xlu1 %792 }
 0x25d   : >> { %v798_v22 = vmul.f32 %v793_v21, %v786_v20 }
 0x25f   : >> { %802 = vrot.lane.b32.xlu0 %v798_v22, %s3978_s29 }
 0x264   : >> { %v795_v28 = vpop.permute.xlu1 %794 }
 0x265   : >> { %v799_v32 = vmul.f32 %v795_v28, %v787_v27 }
 0x267   : >> { %804 = vrot.lane.b32.xlu1 %v799_v32, %s3978_s29  ;;  %842 = vrot.lane.b32.xlu0 %v837_v31, %s3978_s29 }
 0x2aa   : >> { %v841_v34 = vpop.permute.xlu2 %840 }
 0x2ab   : >> { %v4268_v35 = vadd.f32 %v841_v34, %v826_v33 }
 0x2ad   : >> { %3625 = vtanh.f32 %v4268_v35 }
 0x2b3   : >> { %v3626_v36 = vpop.eup %3625 }
 0x2b4   : >> { %852 = vrot.lane.b32.xlu0 %v3626_v36, %s3979_s28 }
 0x2d1   : >> { %v803_v38 = vpop.permute.xlu0 %802 }
 0x2d2   : >> { %v4273_v39 = vadd.f32 %v803_v38, %v788_v37 }
 0x2d4   : >> { %3627 = vtanh.f32 %v4273_v39 }
 0x2d9   : >> { %v805_v42 = vpop.permute.xlu1 %804  ;;  %v843_v44 = vpop.permute.xlu0 %842 }
 0x2da   : >> { %v3628_v29 = vpop.eup %3627  ;;  %v4278_v47 = vadd.f32 %v805_v42, %v789_v40  ;;  %v4280_v30 = vadd.f32 %v843_v44, %v827_v43 }
 0x2db   : >> { %814 = vrot.lane.b32.xlu1 %v3628_v29, %s3979_s28 }
 0x2dc   : >> { %3629 = vtanh.f32 %v4278_v47 }
 0x2dd   : >> { %3631 = vtanh.f32 %v4280_v30 }
 0x2e2   : >> { %v3630_v46 = vpop.eup %3629 }
 0x2e3   : >> { %v3632_v48 = vpop.eup %3631  ;;  %816 = vrot.lane.b32.xlu2 %v3630_v46, %s3979_s28 }
 0x2e4   : >> { %854 = vrot.lane.b32.xlu1 %v3632_v48, %s3979_s28 }
 0x326   : >> { %v853_v52 = vpop.permute.xlu0 %852 }
 0x327   : >> { %v4294_v54 = vmul.f32 %v853_v52, %v824_v16 }
 0x33d   : >> { %v817_v41 = vpop.permute.xlu2 %816 }
 0x33e   : >> { %v4287_v49 = vmul.f32 %v817_v41, %v787_v27 }
 0x34d   : >> { %v815_v45 = vpop.permute.xlu1 %814 }
 0x34e   : >> { %v4289_v50 = vmul.f32 %v815_v45, %v786_v20 }
 0x350   : >> { %v892_v51 = vpack.c.bf16 %v4287_v49, %v4289_v50 }
 0x352   : >> { %894 = vrot.lane.b32.xlu2 %v892_v51, %s3978_s29 }
 0x356   : >> { %v855_v53 = vpop.permute.xlu1 %854 }
 0x357   : >> { %v4296_v55 = vmul.f32 %v855_v53, %v825_v26 }
 0x359   : >> { %v920_v56 = vpack.c.bf16 %v4296_v55, %v4294_v54 }
 0x35b   : >> { %922 = vrot.lane.b32.xlu0 %v920_v56, %s3978_s29 }
 0x3ac   : >> { %v895_v57 = vpop.permute.xlu2 %894 }
 0x3ad   : >> { %3165 = vmatmul.msk.bf16.vlgmr.msra.gmra.mxu2 %vm520_vm0, %v895_v57 }
 0x3cd   : >> { %v923_v58 = vpop.permute.xlu0 %922 }
 0x3ce   : >> { %3168 = vmatmul.msk.bf16.vlgmr.msra.gmra.mxu3 %vm520_vm0, %v923_v58 }
 0x430   : >> { %v908_v60 = vpop.f32.mrf.mxu2 }
 0x431   : >> { %v913_v61 = vadd.f32 %v3163_v59, %v908_v60 }
 0x433   : >> { %3633 = vtanh.f32 %v913_v61 }
 0x438   : >> { %v910_v63 = vpop.f32.mrf.mxu2 }
 0x439   : >> { %v3634_v0 = vpop.eup %3633  ;;  %v914_v1 = vadd.f32 %v3164_v62, %v910_v63 }
 0x43a   : >> { %955 = vrot.lane.b32.xlu1 %v3634_v0, %s3979_s28  ;;  %v947_v23 = vmul.f32 0.5, %v3634_v0 }
 0x43b   : >> { %3635 = vtanh.f32 %v914_v1 }
 0x43c   : >> { %v949_v24 = vadd.f32 0.5, %v947_v23 }
 0x43e   : >> { %v951_v38 = vmul.f32 %v949_v24, %v4273_v39 }
 0x441   : >> { %v3636_v2 = vpop.eup %3635 }
 0x442   : >> { %957 = vrot.lane.b32.xlu2 %v3636_v2, %s3979_s28  ;;  %v948_v19 = vmul.f32 0.5, %v3636_v2 }
 0x444   : >> { %v950_v20 = vadd.f32 0.5, %v948_v19 }
 0x446   : >> { %v952_v42 = vmul.f32 %v950_v20, %v4278_v47 }
 0x451   : >> { %v936_v12 = vpop.f32.mrf.mxu3 }
 0x452   : >> { %v941_v13 = vadd.f32 %v936_v12, %v918_v11  ;;  %v3176_v11 = vld [vmem:[%s4253_s25 + $0x40] sm:$0xff] }
 0x454   : >> { %3637 = vtanh.f32 %v941_v13 }
 0x459   : >> { %v938_v15 = vpop.f32.mrf.mxu3 }
 0x45a   : >> { %v3638_v16 = vpop.eup %3637  ;;  %v942_v17 = vadd.f32 %v938_v15, %v919_v14  ;;  %v3177_v14 = vld [vmem:[%s4253_s25 + $0x50] sm:$0xff]  ;;  %v1080_v15 = vld [vmem:[%s1079_s22 + $0x8] sm:$0xff] }
 0x45b   : >> { %993 = vrot.lane.b32.xlu0 %v3638_v16, %s3979_s28  ;;  %v985_v27 = vmul.f32 0.5, %v3638_v16 }
 0x45c   : >> { %3639 = vtanh.f32 %v942_v17 }
 0x45d   : >> { %v987_v28 = vadd.f32 0.5, %v985_v27 }
 0x45f   : >> { %v989_v47 = vmul.f32 %v987_v28, %v4268_v35 }
 0x462   : >> { %v3640_v18 = vpop.eup %3639 }
 0x463   : >> { %995 = vrot.lane.b32.xlu1 %v3640_v18, %s3979_s28  ;;  %v986_v33 = vmul.f32 0.5, %v3640_v18 }
 0x465   : >> { %v988_v34 = vadd.f32 0.5, %v986_v33 }
 0x467   : >> { %v990_v39 = vmul.f32 %v988_v34, %v4280_v30 }
 0x49c   : >> { %v958_v21 = vpop.permute.xlu2 %957 }
 0x49d   : >> { %v962_v22 = vmul.f32 %v958_v21, %v950_v20  ;;  %v1081_v21 = vld [vmem:[%s1079_s22 + $0x18] sm:$0xff]  ;;  %s3173_s22 = sshll.u32 %s886_s14, 4 }
 0x49f   : >> { %967 = vrot.lane.b32.xlu0 %v962_v22, %s3978_s29 }
 0x4ac   : >> { %v956_v25 = vpop.permute.xlu1 %955 }
 0x4ad   : >> { %v961_v26 = vmul.f32 %v956_v25, %v949_v24 }
 0x4af   : >> { %965 = vrot.lane.b32.xlu2 %v961_v26, %s3978_s29 }
 0x4cd   : >> { %v994_v31 = vpop.permute.xlu0 %993 }
 0x4ce   : >> { %v999_v32 = vmul.f32 %v994_v31, %v987_v28 }
 0x4d0   : >> { %1003 = vrot.lane.b32.xlu1 %v999_v32, %s3978_s29 }
 0x4d5   : >> { %v996_v36 = vpop.permute.xlu1 %995 }
 0x4d6   : >> { %v1000_v37 = vmul.f32 %v996_v36, %v988_v34 }
 0x4d8   : >> { %1005 = vrot.lane.b32.xlu2 %v1000_v37, %s3978_s29 }
 0x509   : >> { %v966_v40 = vpop.permute.xlu2 %965 }
 0x50a   : >> { %v4317_v43 = vadd.f32 %v966_v40, %v951_v38 }
 0x50c   : >> { %3641 = vtanh.f32 %v4317_v43 }
 0x511   : >> { %v968_v44 = vpop.permute.xlu0 %967 }
 0x512   : >> { %v3642_v29 = vpop.eup %3641  ;;  %v4321_v46 = vadd.f32 %v968_v44, %v952_v42 }
 0x513   : >> { %977 = vrot.lane.b32.xlu0 %v3642_v29, %s3979_s28 }
 0x514   : >> { %3643 = vtanh.f32 %v4321_v46 }
 0x51a   : >> { %v3644_v48 = vpop.eup %3643 }
 0x51b   : >> { %979 = vrot.lane.b32.xlu1 %v3644_v48, %s3979_s28 }
 0x532   : >> { %v1006_v41 = vpop.permute.xlu2 %1005 }
 0x533   : >> { %v4327_v45 = vadd.f32 %v1006_v41, %v990_v39 }
 0x535   : >> { %3645 = vtanh.f32 %v4327_v45 }
 0x53b   : >> { %v3646_v51 = vpop.eup %3645 }
 0x53c   : >> { %1017 = vrot.lane.b32.xlu0 %v3646_v51, %s3979_s28 }
 0x542   : >> { %v1004_v52 = vpop.permute.xlu1 %1003 }
 0x543   : >> { %v4332_v53 = vadd.f32 %v1004_v52, %v989_v47 }
 0x545   : >> { %3647 = vtanh.f32 %v4332_v53 }
 0x54b   : >> { %v3648_v56 = vpop.eup %3647 }
 0x54c   : >> { %1015 = vrot.lane.b32.xlu2 %v3648_v56, %s3979_s28 }
 0x585   : >> { %v978_v57 = vpop.permute.xlu0 %977 }
 0x586   : >> { %v4336_v58 = vmul.f32 %v978_v57, %v949_v24 }
 0x58d   : >> { %v980_v30 = vpop.permute.xlu1 %979 }
 0x58e   : >> { %v4338_v59 = vmul.f32 %v980_v30, %v950_v20 }
 0x590   : >> { %v1054_v60 = vpack.c.bf16 %v4338_v59, %v4336_v58 }
 0x592   : >> { %1056 = vrot.lane.b32.xlu1 %v1054_v60, %s3978_s29 }
 0x5a6   : >> { %v1016_v35 = vpop.permute.xlu2 %1015 }
 0x5a7   : >> { %v4343_v62 = vmul.f32 %v1016_v35, %v987_v28 }
 0x5ae   : >> { %v1018_v61 = vpop.permute.xlu0 %1017 }
 0x5af   : >> { %v4345_v63 = vmul.f32 %v1018_v61, %v988_v34 }
 0x5b1   : >> { %v1082_v0 = vpack.c.bf16 %v4345_v63, %v4343_v62 }
 0x5b3   : >> { %1084 = vrot.lane.b32.xlu2 %v1082_v0, %s3978_s29 }
 0x604   : >> { %v1057_v1 = vpop.permute.xlu1 %1056 }
 0x605   : >> { %3178 = vmatmul.msk.bf16.vlgmr.msrb.gmra.mxu0 %vm520_vm0, %v1057_v1 }
 0x60d   : >> { %v1085_v2 = vpop.permute.xlu2 %1084 }
 0x60e   : >> { %3181 = vmatmul.msk.bf16.vlgmr.msrb.gmra.mxu1 %vm520_vm0, %v1085_v2 }
 0x682   : >> { %v1070_v12 = vpop.f32.mrf.mxu0 }
 0x683   : >> { %v1075_v13 = vadd.f32 %v3176_v11, %v1070_v12 }
 0x685   : >> { %3649 = vtanh.f32 %v1075_v13 }
 0x68a   : >> { %v1072_v16 = vpop.f32.mrf.mxu0 }
 0x68b   : >> { %v3650_v17 = vpop.eup %3649  ;;  %v1076_v18 = vadd.f32 %v3177_v14, %v1072_v16  ;;  %v1098_v19 = vpop.f32.mrf.mxu1 }
 0x68c   : >> { %v1103_v20 = vadd.f32 %v1098_v19, %v1080_v15  ;;  %1117 = vrot.lane.b32.xlu0 %v3650_v17, %s3979_s28  ;;  %v1109_v33 = vmul.f32 0.5, %v3650_v17 }
 0x68d   : >> { %3651 = vtanh.f32 %v1076_v18 }
 0x68e   : >> { %3653 = vtanh.f32 %v1103_v20  ;;  %v1111_v34 = vadd.f32 0.5, %v1109_v33 }
 0x693   : >> { %v3652_v22 = vpop.eup %3651  ;;  %v1100_v23 = vpop.f32.mrf.mxu1 }
 0x694   : >> { %v3654_v24 = vpop.eup %3653  ;;  %v1104_v25 = vadd.f32 %v1100_v23, %v1081_v21  ;;  %1119 = vrot.lane.b32.xlu1 %v3652_v22, %s3979_s28  ;;  %v1110_v38 = vmul.f32 0.5, %v3652_v22  ;;  %v3189_v23 = vld [vmem:[%s4253_s25 + $0x60] sm:$0xff] }
 0x695   : >> { %1155 = vrot.lane.b32.xlu2 %v3654_v24, %s3979_s28  ;;  %v1147_v27 = vmul.f32 0.5, %v3654_v24 }
 0x696   : >> { %3655 = vtanh.f32 %v1104_v25  ;;  %v1112_v40 = vadd.f32 0.5, %v1110_v38 }
 0x697   : >> { %v1149_v28 = vadd.f32 0.5, %v1147_v27  ;;  %v1242_v27 = vld [vmem:[%s1241_s30 + $0x8] sm:$0xff] }
 0x698   : >> { %v1114_v51 = vmul.f32 %v1112_v40, %v4321_v46  ;;  %v1113_v46 = vmul.f32 %v1111_v34, %v4317_v43 }
 0x699   : >> { %v1151_v47 = vmul.f32 %v1149_v28, %v4332_v53 }
 0x69c   : >> { %v3656_v26 = vpop.eup %3655 }
 0x69d   : >> { %1157 = vrot.lane.b32.xlu0 %v3656_v26, %s3979_s28  ;;  %v1148_v29 = vmul.f32 0.5, %v3656_v26  ;;  %v3190_v26 = vld [vmem:[%s4253_s25 + $0x70] sm:$0xff]  ;;  %s3381_s25 = sshll.u32 %s3940_s21, 6  ;;  %s689_s21 = sadd.s32 1, %s3940_s21  }
 0x69e   : >> { %s4466_s15 = scalar_lea.vmem [#allocation3], %s3381_s25  ;;  %p686_p10 = scmp.ge.s32.totalorder %s689_s21, 2  }
 0x69f   : >> { %v1150_v48 = vadd.f32 0.5, %v1148_v29  ;;  %v3218_v3 = vld [vmem:[%s5290_s4 + $0x20] sm:$0xf] (%p686_p10)  ;;  %v3396_v4 = vld [vmem:[%s5290_s4 + $0x24] sm:$0xf0] (%p686_p10)  ;;  %vm1449_vm2 = vcmask (%p686_p10), 523264  }
 0x6a0   : > { %v3395_v6 = vld [vmem:[%s5290_s4 + $0x24] sm:$0xf] (%p686_p10)  ;;  %v3220_v7 = vld [vmem:[%s5290_s4 + $0x28] sm:$0xf0] (%p686_p10)  ;;  %v3219_v8 = vor.u32 (%p686_p10), %v3396_v4, %v3218_v3  ;;  %v3210_v10 = vld [vmem:[%s5290_s4 + $0x10] sm:$0xf] (%p686_p10) }
 0x6a1   : >> { %v1152_v1 = vmul.f32 %v1150_v48, %v4327_v45  ;;  %v3223_v9 = vor.u32 (%p686_p10), %v3395_v6, %v3220_v7 }
 0x6ef   : >> { %v1156_v31 = vpop.permute.xlu2 %1155 }
 0x6f0   : >> { %v1161_v32 = vmul.f32 %v1156_v31, %v1149_v28 }
 0x6f2   : >> { %1165 = vrot.lane.b32.xlu0 %v1161_v32, %s3978_s29 }
 0x6fe   : >> { %v1118_v36 = vpop.permute.xlu0 %1117 }
 0x6ff   : >> { %v1123_v37 = vmul.f32 %v1118_v36, %v1111_v34  ;;  %v1243_v36 = vld [vmem:[%s1241_s30 + $0x18] sm:$0xff] }
 0x701   : >> { %1127 = vrot.lane.b32.xlu1 %v1123_v37, %s3978_s29 }
 0x706   : >> { %v1120_v42 = vpop.permute.xlu1 %1119 }
 0x707   : >> { %v1124_v44 = vmul.f32 %v1120_v42, %v1112_v40 }
 0x709   : >> { %1129 = vrot.lane.b32.xlu2 %v1124_v44, %s3978_s29 }
 0x70f   : >> { %v1158_v39 = vpop.permute.xlu0 %1157 }
 0x710   : >> { %v1162_v41 = vmul.f32 %v1158_v39, %v1150_v48 }
 0x712   : >> { %1167 = vrot.lane.b32.xlu1 %v1162_v41, %s3978_s29 }
 0x763   : >> { %v1130_v52 = vpop.permute.xlu2 %1129 }
 0x764   : >> { %v1166_v56 = vpop.permute.xlu0 %1165  ;;  %v4367_v57 = vadd.f32 %v1130_v52, %v1114_v51 }
 0x765   : >> { %v4369_v30 = vadd.f32 %v1166_v56, %v1151_v47 }
 0x766   : >> { %3657 = vtanh.f32 %v4367_v57 }
 0x767   : >> { %3659 = vtanh.f32 %v4369_v30 }
 0x76c   : >> { %v3658_v60 = vpop.eup %3657 }
 0x76d   : >> { %v3660_v35 = vpop.eup %3659  ;;  %1141 = vrot.lane.b32.xlu0 %v3658_v60, %s3979_s28 }
 0x76e   : >> { %1177 = vrot.lane.b32.xlu1 %v3660_v35, %s3979_s28 }
 0x773   : >> { %v1128_v61 = vpop.permute.xlu1 %1127 }
 0x774   : >> { %v4376_v53 = vadd.f32 %v1128_v61, %v1113_v46 }
 0x776   : >> { %3661 = vtanh.f32 %v4376_v53 }
 0x77c   : >> { %v3662_v0 = vpop.eup %3661 }
 0x77d   : >> { %1139 = vrot.lane.b32.xlu2 %v3662_v0, %s3979_s28 }
 0x784   : >> { %v1168_v2 = vpop.permute.xlu1 %1167 }
 0x785   : >> { %v4381_v11 = vadd.f32 %v1168_v2, %v1152_v1 }
 0x787   : >> { %3663 = vtanh.f32 %v4381_v11 }
 0x78d   : >> { %v3664_v12 = vpop.eup %3663 }
 0x78e   : >> { %1179 = vrot.lane.b32.xlu2 %v3664_v12, %s3979_s28 }
 0x7d7   : >> { %v1140_v13 = vpop.permute.xlu2 %1139 }
 0x7d8   : >> { %v4385_v14 = vmul.f32 %v1140_v13, %v1111_v34 }
 0x7df   : >> { %v1142_v43 = vpop.permute.xlu0 %1141 }
 0x7e0   : >> { %v4387_v15 = vmul.f32 %v1142_v43, %v1112_v40  ;;  %v1178_v45 = vpop.permute.xlu1 %1177 }
 0x7e1   : >> { %v4392_v18 = vmul.f32 %v1178_v45, %v1149_v28 }
 0x7e2   : >> { %v1216_v16 = vpack.c.bf16 %v4387_v15, %v4385_v14 }
 0x7e4   : >> { %1218 = vrot.lane.b32.xlu0 %v1216_v16, %s3978_s29 }
 0x7e8   : >> { %v1180_v17 = vpop.permute.xlu2 %1179 }
 0x7e9   : >> { %v4394_v19 = vmul.f32 %v1180_v17, %v1150_v48 }
 0x7eb   : >> { %v1244_v20 = vpack.c.bf16 %v4394_v19, %v4392_v18 }
 0x7ed   : >> { %1246 = vrot.lane.b32.xlu1 %v1244_v20, %s3978_s29 }
 0x856   : >> { %v1219_v21 = vpop.permute.xlu0 %1218 }
 0x857   : >> { %3191 = vmatmul.msk.bf16.vlgmr.msrb.gmra.mxu2 %vm520_vm0, %v1219_v21 }
 0x85f   : >> { %v1247_v22 = vpop.permute.xlu1 %1246 }
 0x860   : >> { %3194 = vmatmul.msk.bf16.vlgmr.msrb.gmra.mxu3 %vm520_vm0, %v1247_v22 }
 0x8da   : >> { %v1232_v24 = vpop.f32.mrf.mxu2 }
 0x8db   : >> { %v1237_v25 = vadd.f32 %v3189_v23, %v1232_v24 }
 0x8dd   : >> { %3665 = vtanh.f32 %v1237_v25 }
 0x8e2   : >> { %v1234_v28 = vpop.f32.mrf.mxu2 }
 0x8e3   : >> { %v3666_v31 = vpop.eup %3665  ;;  %v1238_v32 = vadd.f32 %v3190_v26, %v1234_v28  ;;  %v1260_v33 = vpop.f32.mrf.mxu3 }
 0x8e4   : >> { %v1265_v34 = vadd.f32 %v1260_v33, %v1242_v27  ;;  %1279 = vrot.lane.b32.xlu2 %v3666_v31, %s3979_s28  ;;  %v1271_v29 = vmul.f32 0.5, %v3666_v31 }
 0x8e5   : >> { %3667 = vtanh.f32 %v1238_v32 }
 0x8e6   : >> { %3669 = vtanh.f32 %v1265_v34  ;;  %v1273_v48 = vadd.f32 0.5, %v1271_v29 }
 0x8e8   : >> { %v1275_v13 = vmul.f32 %v1273_v48, %v4376_v53 }
 0x8eb   : >> { %v3668_v37 = vpop.eup %3667  ;;  %v1262_v38 = vpop.f32.mrf.mxu3 }
 0x8ec   : >> { %v3670_v40 = vpop.eup %3669  ;;  %v1266_v42 = vadd.f32 %v1262_v38, %v1243_v36  ;;  %1281 = vrot.lane.b32.xlu0 %v3668_v37, %s3979_s28  ;;  %v1272_v60 = vmul.f32 0.5, %v3668_v37  ;;  %v3226_v36 = vld [vmem:[%s5290_s4 + $0x30] sm:$0xf] (%p686_p10)  ;;  %v3398_v37 = vld [vmem:[%s5290_s4 + $0x34] sm:$0xf0] (%p686_p10) }
 0x8ed   : >> { %1317 = vrot.lane.b32.xlu1 %v3670_v40, %s3979_s28  ;;  %v1309_v35 = vmul.f32 0.5, %v3670_v40  ;;  %v3397_v38 = vld [vmem:[%s5290_s4 + $0x34] sm:$0xf] (%p686_p10)  ;;  %v3227_v40 = vor.u32 (%p686_p10), %v3398_v37, %v3226_v36 }
 0x8ee   : >> { %3671 = vtanh.f32 %v1266_v42  ;;  %v1274_v46 = vadd.f32 0.5, %v1272_v60 }
 0x8ef   : >> { %v1311_v61 = vadd.f32 0.5, %v1309_v35  ;;  %1478 = vmatpush.bf16.msra.mxu0 (%p686_p10), %v3227_v40  ;;  %3425 = vmatpush.bf16.msra.mxu2 (%p686_p10), %v3227_v40 }
 0x8f0   : >> { %v1276_v23 = vmul.f32 %v1274_v46, %v4367_v57 }
 0x8f1   : >> { %v1313_v45 = vmul.f32 %v1311_v61, %v4369_v30 }
 0x8f3   : > { %1479 = vmatpush.bf16.msra.mxu0 (%p686_p10), %v3219_v8  ;;  %3426 = vmatpush.bf16.msra.mxu2 (%p686_p10), %v3219_v8 }
 0x8f4   : >> { %v3672_v44 = vpop.eup %3671 }
 0x8f5   : >> { %1319 = vrot.lane.b32.xlu2 %v3672_v44, %s3979_s28  ;;  %v1310_v51 = vmul.f32 0.5, %v3672_v44 }
 0x8f7   : >> { %v4411_v47 = vadd.f32 0.5, %v1310_v51  ;;  %v3202_v51 = vld [vmem:[%s5290_s4] sm:$0xf] (%p686_p10) }
 0x8f9   : >> { %v1314_v21 = vmul.f32 %v4411_v47, %v4381_v11 }
 0x93e   : >> { %v1280_v39 = vpop.permute.xlu2 %1279 }
 0x93f   : >> { %v1285_v41 = vmul.f32 %v1280_v39, %v1273_v48 }
 0x941   : >> { %1289 = vrot.lane.b32.xlu0 %v1285_v41, %s3978_s29 }
 0x94f   : >> { %v1320_v52 = vpop.permute.xlu2 %1319 }
 0x950   : >> { %v1324_v56 = vmul.f32 %v1320_v52, %v4411_v47  ;;  %v3391_v52 = vld [vmem:[%s5290_s4 + $0x4] sm:$0xf] (%p686_p10) }
 0x952   : >> { %1329 = vrot.lane.b32.xlu0 %v1324_v56, %s3978_s29  ;;  %v3204_v56 = vld [vmem:[%s5290_s4 + $0x8] sm:$0xf0] (%p686_p10) }
 0x95e   : >> { %v1282_v0 = vpop.permute.xlu0 %1281 }
 0x95f   : >> { %v1318_v1 = vpop.permute.xlu1 %1317  ;;  %v1286_v2 = vmul.f32 %v1282_v0, %v1274_v46 }
 0x960   : >> { %v1323_v12 = vmul.f32 %v1318_v1, %v1311_v61  ;;  %v3207_v1 = vor.u32 (%p686_p10), %v3391_v52, %v3204_v56 }
 0x961   : >> { %1291 = vrot.lane.b32.xlu1 %v1286_v2, %s3978_s29 }
 0x962   : >> { %1327 = vrot.lane.b32.xlu2 %v1323_v12, %s3978_s29 }
 0x9b3   : >> { %v1290_v43 = vpop.permute.xlu0 %1289 }
 0x9b4   : >> { %v4418_v16 = vadd.f32 %v1290_v43, %v1275_v13  }
 0x9b6   : >> { %3673 = vtanh.f32 %v4418_v16 }
 0x9bc   : >> { %v3674_v17 = vpop.eup %3673  ;;  %v1328_v20 = vpop.permute.xlu2 %1327 }
 0x9bd   : >> { %v4422_v42 = vadd.f32 %v1328_v20, %v1313_v45   ;;  %1301 = vrot.lane.b32.xlu1 %v3674_v17, %s3979_s28 }
 0x9bf   : >> { %3675 = vtanh.f32 %v4422_v42  ;;  %v3394_v42 = vld [vmem:[%s5290_s4 + $0x14] sm:$0xf0] (%p686_p10) }
 0x9c0   : > { %v3211_v39 = vor.u32 (%p686_p10), %v3394_v42, %v3210_v10 }
 0x9c2   : > { %1480 = vmatpush.bf16.msra.mxu0 (%p686_p10), %v3211_v39  ;;  %3427 = vmatpush.bf16.msra.mxu2 (%p686_p10), %v3211_v39 }
 0x9c4   : >> { %v1330_v22 = vpop.permute.xlu0 %1329 }
 0x9c5   : >> { %v3676_v53 = vpop.eup %3675  ;;  %v4428_v41 = vadd.f32 %v1330_v22, %v1314_v21  }
 0x9c6   : >> { %1339 = vrot.lane.b32.xlu0 %v3676_v53, %s3979_s28 }
 0x9c7   : >> { %3677 = vtanh.f32 %v4428_v41 }
 0x9cd   : >> { %v3678_v30 = vpop.eup %3677 }
 0x9ce   : >> { %864 = vrot.lane.b32.xlu0 %v4287_v49, %s3978_s29  ;;  %1341 = vrot.lane.b32.xlu1 %v3678_v30, %s3979_s28 }
 0x9d3   : >> { %v1292_v24 = vpop.permute.xlu1 %1291 }
 0x9d4   : >> { %v4436_v45 = vadd.f32 %v1292_v24, %v1276_v23  }
 0x9d6   : >> { %3679 = vtanh.f32 %v4436_v45  ;;  %1025 = vrot.lane.b32.xlu0 %v4336_v58, %s3978_s29  ;;  %874 = vrot.lane.b32.xlu1 %v4294_v54, %s3979_s28 }
 0x9dc   : >> { %v3680_v11 = vpop.eup %3679 }
 0x9dd   : >> { %1303 = vrot.lane.b32.xlu2 %v3680_v11, %s3979_s28 }
 0x9de   : >> { %1039 = vrot.lane.b32.xlu0 %v4345_v63, %s3979_s28  ;;  %1027 = vrot.lane.b32.xlu1 %v4338_v59, %s3978_s29 }
 0x9e5   : >> { %862 = vrot.lane.b32.xlu2 %v4289_v50, %s3978_s29 }
 0x9e6   : >> { %1199 = vrot.lane.b32.xlu0 %v4392_v18, %s3979_s28  ;;  %1187 = vrot.lane.b32.xlu1 %v4385_v14, %s3978_s29 }
 0x9ed   : >> { %876 = vrot.lane.b32.xlu2 %v4296_v55, %s3979_s28 }
 0x9ee   : >> { %1201 = vrot.lane.b32.xlu1 %v4394_v19, %s3979_s28 }
 0x9f5   : >> { %1037 = vrot.lane.b32.xlu2 %v4343_v62, %s3979_s28 }
 0x9fd   : >> { %1189 = vrot.lane.b32.xlu2 %v4387_v15, %s3978_s29 }
 0xa2f   : >> { %v1302_v49 = vpop.permute.xlu1 %1301 }
 0xa30   : >> { %v1307_v50 = vmul.f32 %v1302_v49, %v1273_v48   ;;  %v3228_v48 = vld [vmem:[%s5290_s4 + $0x38] sm:$0xf0] (%p686_p10) }
 0xa31   : > { %v3231_v5 = vor.u32 (%p686_p10), %v3397_v38, %v3228_v48 }
 0xa32   : >> { %1349 = vrot.lane.b32.xlu2 %v1307_v50, %s3978_s29 }
 0xa33   : > { %1527 = vmatpush.bf16.msra.mxu1 (%p686_p10), %v3231_v5  ;;  %3429 = vmatpush.bf16.msra.mxu3 (%p686_p10), %v3231_v5 }
 0xa37   : >> { %v1304_v54 = vpop.permute.xlu2 %1303  ;;  %1528 = vmatpush.bf16.msra.mxu1 (%p686_p10), %v3223_v9  ;;  %3430 = vmatpush.bf16.msra.mxu3 (%p686_p10), %v3223_v9 }
 0xa38   : >> { %v1340_v58 = vpop.permute.xlu0 %1339  ;;  %v1308_v29 = vmul.f32 %v1304_v54, %v1274_v46   ;;  %v5297_v46 = vmov %v4418_v16 }
 0xa39   : >> { %v1345_v44 = vmul.f32 %v1340_v58, %v1311_v61  }
 0xa3a   : >> { %1351 = vrot.lane.b32.xlu0 %v1308_v29, %s3978_s29  ;;  %s3160_s29 = sshll.u32 %s699_s24, 4  ;;  %s1044_s24 = scalar_lea.vmem [#allocation3], %s3173_s22  ;;  %v3212_v29 = vld [vmem:[%s5290_s4 + $0x18] sm:$0xf0] (%p686_p10) }
 0xa3b   : >> { %1361 = vrot.lane.b32.xlu1 %v1345_v44, %s3979_s28  ;;  %s881_s19 = scalar_lea.vmem [#allocation3], %s3160_s29  ;;  %v3393_v44 = vld [vmem:[%s5290_s4 + $0x14] sm:$0xf] (%p686_p10) }
 0xa3c   : > { %v3215_v41 = vor.u32 (%p686_p10), %v3393_v44, %v3212_v29 }
 0xa3e   : > { %1529 = vmatpush.bf16.msra.mxu1 (%p686_p10), %v3215_v41  ;;  %3431 = vmatpush.bf16.msra.mxu3 (%p686_p10), %v3215_v41 }
 0xa3f   : >> { %v863_v55 = vpop.permute.xlu2 %862 }
 0xa40   : >> { %v865_v59 = vpop.permute.xlu0 %864  ;;  %v1342_v62 = vpop.permute.xlu1 %1341  ;;  %870 = vst.msk [vmem:[%s4466_s15] sm:$0xff] %vm520_vm0, %v863_v55 }
 0xa41   : >> { %871 = vst.msk [vmem:[%s4466_s15 + $0x8] sm:$0xff] %vm520_vm0, %v865_v59  ;;  %v1346_v43 = vmul.f32 %v1342_v62, %v4411_v47   ;;  %v5298_v47 = vmov %v1307_v50  ;;  %v1403_v59 = vld [vmem:[%s5292_s6] sm:$0x3] (%p686_p10) }
 0xa42   : > { %v3392_v47 = vld [vmem:[%s5290_s4 + $0x4] sm:$0xf0] (%p686_p10)  ;;  %1530 = vmatpush.bf16.msra.mxu1 (%p686_p10), %v3207_v1  ;;  %3432 = vmatpush.bf16.msra.mxu3 (%p686_p10), %v3207_v1  ;;  %v4592_v62 = vperm.slane (%p686_p10), %v1403_v59, 0  ;;  %v4637_v1 = vld [vmem:[%s5291_s5 + $0x10] sm:$0xf] (%p686_p10) }
 0xa43   : >> { %1363 = vrot.lane.b32.xlu2 %v1346_v43, %s3979_s28  ;;  %s3186_s28 = sshll.u32 %s1048_s18, 4  ;;  %s1368_s18 = scalar_lea.vmem [#allocation3], %s3199_s27  ;;  %v3203_v35 = vor.u32 (%p686_p10), %v3392_v47, %v3202_v51 }
 0xa44   : >> { %s1206_s14 = scalar_lea.vmem [#allocation3], %s3186_s28 }
 0xa45   : > { %1481 = vmatpush.bf16.msra.mxu0 (%p686_p10), %v3203_v35  ;;  %3428 = vmatpush.bf16.msra.mxu2 (%p686_p10), %v3203_v35  ;;  %v4617_v35 = vld [vmem:[%s5291_s5] sm:$0xf] (%p686_p10) }
 0xa47   : >> { %v877_v63 = vpop.permute.xlu2 %876 }
 0xa48   : >> { %v1026_v57 = vpop.permute.xlu0 %1025  ;;  %v875_v14 = vpop.permute.xlu1 %874  ;;  %884 = vst.msk [vmem:[%s881_s19 + $0x8] sm:$0xff] %vm882_vm1, %v877_v63  ;;  %v4594_v63 = vperm.slane (%p686_p10), %v1403_v59, 1 }
 0xa49   : >> { %883 = vst.msk [vmem:[%s881_s19] sm:$0xff] %vm882_vm1, %v875_v14 }
 0xa4a   : >> { %3171 = vst.msk [vmem:[%s4466_s15 + $0x10] sm:$0xff] %vm520_vm0, %v1026_v57 }
 0xa4f   : >> { %v1038_v15 = vpop.permute.xlu2 %1037 }
 0xa50   : >> { %v1040_v18 = vpop.permute.xlu0 %1039  ;;  %v1028_v19 = vpop.permute.xlu1 %1027 }
 0xa51   : >> { %3172 = vst.msk [vmem:[%s4466_s15 + $0x18] sm:$0xff] %vm520_vm0, %v1028_v19 }
 0xa52   : >> { %1046 = vst.msk [vmem:[%s1044_s24 + $0x8] sm:$0xff] %vm882_vm1, %v1040_v18 }
 0xa53   : >> { %1045 = vst.msk [vmem:[%s1044_s24] sm:$0xff] %vm882_vm1, %v1038_v15  ;;  %s4684_s24 = smov (%p686_p10), 0  }
 0xa57   : >> { %v1190_v25 = vpop.permute.xlu2 %1189 }
 0xa58   : >> { %v1200_v26 = vpop.permute.xlu0 %1199  ;;  %v1188_v27 = vpop.permute.xlu1 %1187  ;;  %3185 = vst.msk [vmem:[%s4466_s15 + $0x28] sm:$0xff] %vm520_vm0, %v1190_v25 }
 0xa59   : >> { %3184 = vst.msk [vmem:[%s4466_s15 + $0x20] sm:$0xff] %vm520_vm0, %v1188_v27 }
 0xa5a   : >> { %1207 = vst.msk [vmem:[%s1206_s14] sm:$0xff] %vm882_vm1, %v1200_v26 }
 0xa60   : >> { %v1202_v28 = vpop.permute.xlu1 %1201 }
 0xa61   : >> { %1208 = vst.msk [vmem:[%s1206_s14 + $0x8] sm:$0xff] %vm882_vm1, %v1202_v28 }
 0xa8c   : >> { %v1350_v31 = vpop.permute.xlu2 %1349 }
 0xa8d   : >> { %3197 = vst.msk [vmem:[%s4466_s15 + $0x30] sm:$0xff] %vm520_vm0, %v1350_v31 }
 0xa9d   : >> { %v1364_v34 = vpop.permute.xlu2 %1363 }
 0xaab   : > { %688 = sbr.rel (!%p686_p10) target bundleno = 238 (0xee), region = 218 }
 0xaac   : >> { %v1352_v32 = vpop.permute.xlu0 %1351 }
 0xaad   : >> { %v1362_v33 = vpop.permute.xlu1 %1361  ;;  %3198 = vst.msk [vmem:[%s4466_s15 + $0x38] sm:$0xff] %vm520_vm0, %v1352_v32 }
 0xaae   : >> { %1369 = vst.msk [vmem:[%s1368_s18] sm:$0xff] %vm882_vm1, %v1362_v33 }
 0xaaf   : >> { %1370 = vst.msk [vmem:[%s1368_s18 + $0x8] sm:$0xff] %vm882_vm1, %v1364_v34 }
 0xab6   : > { %v1371_v60 = vld [vmem:[#allocation3] sm:$0xff]  ;;  %v1372_v46 = vld [vmem:[#allocation3 + $0x8] sm:$0xff]  ;;  %v1373_v13 = vld [vmem:[#allocation3 + $0x10] sm:$0xff] }
 0xab7   : > { %v1379_v61 = vld [vmem:[#allocation3 + $0x40] sm:$0xff]  ;;  %v1380_v0 = vld [vmem:[#allocation3 + $0x48] sm:$0xff]  ;;  %v1387_v2 = vpack.c.bf16 %v1372_v46, %v1371_v60  ;;  %v1374_v43 = vld [vmem:[#allocation3 + $0x18] sm:$0xff] }
 0xab8   : > { %v1391_v12 = vpack.c.bf16 %v1380_v0, %v1379_v61  ;;  %v1381_v16 = vld [vmem:[#allocation3 + $0x50] sm:$0xff]  ;;  %v1382_v45 = vld [vmem:[#allocation3 + $0x58] sm:$0xff]  ;;  %v1388_v17 = vpack.c.bf16 %v1374_v43, %v1373_v13  ;;  %v1375_v21 = vld [vmem:[#allocation3 + $0x20] sm:$0xff] }
 0xab9   : > { %3232 = vmatmul.msk.bf16.vlgmr.msra.gmra.mxu0 %vm1449_vm2, %v1387_v2  ;;  %3240 = vmatmul.msk.bf16.vlgmr.msra.gmra.mxu1 %vm1449_vm2, %v1387_v2  ;;  %v1392_v20 = vpack.c.bf16 %v1382_v45, %v1381_v16  ;;  %v1376_v22 = vld [vmem:[#allocation3 + $0x28] sm:$0xff]  ;;  %v1383_v53 = vld [vmem:[#allocation3 + $0x60] sm:$0xff]  ;;  %v1377_v11 = vld [vmem:[#allocation3 + $0x30] sm:$0xff] }
 0xaba   : > { %3236 = vmatmul.msk.bf16.vlgmr.msra.gmra.mxu2 %vm1449_vm2, %v1391_v12  ;;  %3244 = vmatmul.msk.bf16.vlgmr.msra.gmra.mxu3 %vm1449_vm2, %v1391_v12  ;;  %v1384_v30 = vld [vmem:[#allocation3 + $0x68] sm:$0xff]  ;;  %v1389_v23 = vpack.c.bf16 %v1376_v22, %v1375_v21  ;;  %v1378_v49 = vld [vmem:[#allocation3 + $0x38] sm:$0xff]  ;;  %v1385_v50 = vld [vmem:[#allocation3 + $0x70] sm:$0xff] }
 0xabb   : > { %v1393_v24 = vpack.c.bf16 %v1384_v30, %v1383_v53  ;;  %v1386_v54 = vld [vmem:[#allocation3 + $0x78] sm:$0xff]  ;;  %v1390_v58 = vpack.c.bf16 %v1378_v49, %v1377_v11  ;;  %v4627_v61 = vld [vmem:[%s5291_s5 + $0x8] sm:$0xf]  ;;  %v4632_v0 = vld [vmem:[%s5291_s5 + $0x8] sm:$0xf0] }
 0xabc   : > { %v1394_v55 = vpack.c.bf16 %v1386_v54, %v1385_v50  ;;  %v4622_v46 = vld [vmem:[%s5291_s5] sm:$0xf0]  ;;  %v4642_v2 = vld [vmem:[%s5291_s5 + $0x10] sm:$0xf0]  ;;  %v4647_v12 = vld [vmem:[%s5291_s5 + $0x18] sm:$0xf] }
 0xabd   : > { %v4652_v13 = vld [vmem:[%s5291_s5 + $0x18] sm:$0xf0] }
 0xac9   : > { %3233 = vmatmul.msk.bf16.gmra.mxu0 %vm1449_vm2, %v1388_v17  ;;  %3241 = vmatmul.msk.bf16.gmra.mxu1 %vm1449_vm2, %v1388_v17 }
 0xaca   : > { %3237 = vmatmul.msk.bf16.gmra.mxu2 %vm1449_vm2, %v1392_v20  ;;  %3245 = vmatmul.msk.bf16.gmra.mxu3 %vm1449_vm2, %v1392_v20 }
 0xad9   : > { %3234 = vmatmul.msk.bf16.gmra.mxu0 %vm1449_vm2, %v1389_v23  ;;  %3242 = vmatmul.msk.bf16.gmra.mxu1 %vm1449_vm2, %v1389_v23 }
 0xada   : > { %3238 = vmatmul.msk.bf16.gmra.mxu2 %vm1449_vm2, %v1393_v24  ;;  %3246 = vmatmul.msk.bf16.gmra.mxu3 %vm1449_vm2, %v1393_v24 }
 0xae9   : > { %3235 = vmatmul.msk.bf16.gmra.mxu0 %vm1449_vm2, %v1390_v58  ;;  %3243 = vmatmul.msk.bf16.gmra.mxu1 %vm1449_vm2, %v1390_v58 }
 0xaea   : > { %3239 = vmatmul.msk.bf16.gmra.mxu2 %vm1449_vm2, %v1394_v55  ;;  %3247 = vmatmul.msk.bf16.gmra.mxu3 %vm1449_vm2, %v1394_v55 }
 0xb36   : > { %v1483_v57 = vpop.f32.mrf.mxu0  ;;  %v1532_v15 = vpop.f32.mrf.mxu1 }
 0xb37   : > { %v1484_v14 = vadd.f32 %v1483_v57, %v4592_v62  ;;  %v1533_v18 = vadd.f32 %v1532_v15, %v4594_v63 }
 0xb39   : > { %1572 = vst [vmem:[#allocation2] sm:$0xff] %v1484_v14 }
 0xb3a   : > { %1573 = vst [vmem:[#allocation2 + $0x8] sm:$0xff] %v1533_v18 }
 0xb3d   : > { %v1503_v19 = vpop.f32.mrf.mxu2  ;;  %v1552_v26 = vpop.f32.mrf.mxu3 }
 0xb3e   : > { %v1504_v25 = vadd.f32 %v1503_v19, %v4592_v62  ;;  %v1553_v27 = vadd.f32 %v1552_v26, %v4594_v63  ;;  %v1485_v28 = vpop.f32.mrf.mxu0  ;;  %v1534_v32 = vpop.f32.mrf.mxu1 }
 0xb3f   : > { %v1486_v31 = vadd.f32 %v1485_v28, %v4592_v62  ;;  %v1535_v33 = vadd.f32 %v1534_v32, %v4594_v63  ;;  %v4668_v32 = vmov 0.0  }
 0xb40   : > { %1588 = vst [vmem:[#allocation2 + $0x80] sm:$0xff] %v1504_v25 }
 0xb41   : > { %1589 = vst [vmem:[#allocation2 + $0x88] sm:$0xff] %v1553_v27 }
 0xb42   : > { %1574 = vst [vmem:[#allocation2 + $0x10] sm:$0xff] %v1486_v31 }
 0xb43   : > { %1575 = vst [vmem:[#allocation2 + $0x18] sm:$0xff] %v1535_v33  ;;  %v4670_v33 = vmov 0.0  }
 0xb45   : > { %v1505_v34 = vpop.f32.mrf.mxu2  ;;  %v1554_v37 = vpop.f32.mrf.mxu3 }
 0xb46   : > { %v1506_v36 = vadd.f32 %v1505_v34, %v4592_v62  ;;  %v1555_v38 = vadd.f32 %v1554_v37, %v4594_v63  ;;  %v1488_v40 = vpop.f32.mrf.mxu0  ;;  %v1537_v3 = vpop.f32.mrf.mxu1  ;;  %v4672_v34 = vmov 0.0   ;;  %v4676_v37 = vmov 0.0  }
 0xb47   : > { %v1489_v48 = vadd.f32 %v1488_v40, %v4592_v62  ;;  %v1538_v4 = vadd.f32 %v1537_v3, %v4594_v63  ;;  %v4680_v40 = vmov 0.0  }
 0xb48   : > { %1590 = vst [vmem:[#allocation2 + $0x90] sm:$0xff] %v1506_v36  ;;  %v4674_v36 = vmov 0.0  }
 0xb49   : > { %1591 = vst [vmem:[#allocation2 + $0x98] sm:$0xff] %v1555_v38  ;;  %v4678_v38 = vmov 0.0  }
 0xb4a   : > { %1576 = vst [vmem:[#allocation2 + $0x20] sm:$0xff] %v1489_v48 }
 0xb4b   : > { %1577 = vst [vmem:[#allocation2 + $0x28] sm:$0xff] %v1538_v4 }
 0xb4d   : > { %v1508_v5 = vpop.f32.mrf.mxu2  ;;  %v1557_v7 = vpop.f32.mrf.mxu3 }
 0xb4e   : > { %v1509_v6 = vadd.f32 %v1508_v5, %v4592_v62  ;;  %v1558_v8 = vadd.f32 %v1557_v7, %v4594_v63  ;;  %v1490_v9 = vpop.f32.mrf.mxu0  ;;  %v1539_v42 = vpop.f32.mrf.mxu1 }
 0xb4f   : > { %v1491_v10 = vadd.f32 %v1490_v9, %v4592_v62  ;;  %v1540_v44 = vadd.f32 %v1539_v42, %v4594_v63 }
 0xb50   : > { %1592 = vst [vmem:[#allocation2 + $0xa0] sm:$0xff] %v1509_v6 }
 0xb51   : > { %1593 = vst [vmem:[#allocation2 + $0xa8] sm:$0xff] %v1558_v8 }
 0xb52   : > { %1578 = vst [vmem:[#allocation2 + $0x30] sm:$0xff] %v1491_v10 }
 0xb53   : > { %1579 = vst [vmem:[#allocation2 + $0x38] sm:$0xff] %v1540_v44 }
 0xb55   : > { %v1510_v29 = vpop.f32.mrf.mxu2  ;;  %v1559_v41 = vpop.f32.mrf.mxu3 }
 0xb56   : > { %v1511_v39 = vadd.f32 %v1510_v29, %v4592_v62  ;;  %v1560_v51 = vadd.f32 %v1559_v41, %v4594_v63  ;;  %v1493_v47 = vpop.f32.mrf.mxu0  ;;  %v1542_v56 = vpop.f32.mrf.mxu1 }
 0xb57   : > { %v1494_v52 = vadd.f32 %v1493_v47, %v4592_v62  ;;  %v1543_v60 = vadd.f32 %v1542_v56, %v4594_v63 }
 0xb58   : > { %1594 = vst [vmem:[#allocation2 + $0xb0] sm:$0xff] %v1511_v39 }
 0xb59   : > { %1595 = vst [vmem:[#allocation2 + $0xb8] sm:$0xff] %v1560_v51 }
 0xb5a   : > { %1580 = vst [vmem:[#allocation2 + $0x40] sm:$0xff] %v1494_v52 }
 0xb5b   : > { %1581 = vst [vmem:[#allocation2 + $0x48] sm:$0xff] %v1543_v60 }
 0xb5d   : > { %v1513_v43 = vpop.f32.mrf.mxu2  ;;  %v1562_v45 = vpop.f32.mrf.mxu3 }
 0xb5e   : > { %v1514_v16 = vadd.f32 %v1513_v43, %v4592_v62  ;;  %v1563_v17 = vadd.f32 %v1562_v45, %v4594_v63  ;;  %v1495_v20 = vpop.f32.mrf.mxu0  ;;  %v1544_v22 = vpop.f32.mrf.mxu1 }
 0xb5f   : > { %v1496_v21 = vadd.f32 %v1495_v20, %v4592_v62  ;;  %v1545_v53 = vadd.f32 %v1544_v22, %v4594_v63 }
 0xb60   : > { %1596 = vst [vmem:[#allocation2 + $0xc0] sm:$0xff] %v1514_v16 }
 0xb61   : > { %1597 = vst [vmem:[#allocation2 + $0xc8] sm:$0xff] %v1563_v17 }
 0xb62   : > { %1582 = vst [vmem:[#allocation2 + $0x50] sm:$0xff] %v1496_v21 }
 0xb63   : > { %1583 = vst [vmem:[#allocation2 + $0x58] sm:$0xff] %v1545_v53 }
 0xb65   : > { %v1515_v30 = vpop.f32.mrf.mxu2  ;;  %v1564_v24 = vpop.f32.mrf.mxu3 }
 0xb66   : > { %v1516_v23 = vadd.f32 %v1515_v30, %v4592_v62  ;;  %v1565_v11 = vadd.f32 %v1564_v24, %v4594_v63  ;;  %v1498_v49 = vpop.f32.mrf.mxu0  ;;  %v1547_v54 = vpop.f32.mrf.mxu1 }
 0xb67   : > { %v1499_v50 = vadd.f32 %v1498_v49, %v4592_v62  ;;  %v1548_v58 = vadd.f32 %v1547_v54, %v4594_v63 }
 0xb68   : > { %1598 = vst [vmem:[#allocation2 + $0xd0] sm:$0xff] %v1516_v23 }
 0xb69   : > { %1599 = vst [vmem:[#allocation2 + $0xd8] sm:$0xff] %v1565_v11 }
 0xb6a   : > { %1584 = vst [vmem:[#allocation2 + $0x60] sm:$0xff] %v1499_v50 }
 0xb6b   : > { %1585 = vst [vmem:[#allocation2 + $0x68] sm:$0xff] %v1548_v58 }
 0xb6d   : > { %v1518_v55 = vpop.f32.mrf.mxu2  ;;  %v1567_v57 = vpop.f32.mrf.mxu3 }
 0xb6e   : > { %v1519_v59 = vadd.f32 %v1518_v55, %v4592_v62  ;;  %v1568_v14 = vadd.f32 %v1567_v57, %v4594_v63  ;;  %v1500_v15 = vpop.f32.mrf.mxu0  ;;  %v1549_v19 = vpop.f32.mrf.mxu1 }
 0xb6f   : > { %v1501_v18 = vadd.f32 %v1500_v15, %v4592_v62  ;;  %v1550_v25 = vadd.f32 %v1549_v19, %v4594_v63 }
 0xb70   : > { %1600 = vst [vmem:[#allocation2 + $0xe0] sm:$0xff] %v1519_v59 }
 0xb71   : > { %1601 = vst [vmem:[#allocation2 + $0xe8] sm:$0xff] %v1568_v14 }
 0xb72   : > { %1586 = vst [vmem:[#allocation2 + $0x70] sm:$0xff] %v1501_v18 }
 0xb73   : > { %1587 = vst [vmem:[#allocation2 + $0x78] sm:$0xff] %v1550_v25 }
 0xb75   : > { %v1520_v26 = vpop.f32.mrf.mxu2  ;;  %v1569_v28 = vpop.f32.mrf.mxu3 }
 0xb76   : > { %v1521_v27 = vadd.f32 %v1520_v26, %v4592_v62  ;;  %v1570_v31 = vadd.f32 %v1569_v28, %v4594_v63  ;;  %v4682_v62 = vmov 0.0  }
 0xb78   : > { %1602 = vst [vmem:[#allocation2 + $0xf0] sm:$0xff] %v1521_v27 }
 0xb79   : > { %1603 = vst [vmem:[#allocation2 + $0xf8] sm:$0xff] %v1570_v31 }
 0xb7a LB: >> { %v1634_v63 = vpack.c.bf16 %v3968_v40, %v3972_v62  ;;  %v3262_v48 = vor.u32 %v4632_v0, %v4627_v61  ;;  %s3980_s21 = smov 32   ;;  %v3258_v3 = vor.u32 %v4622_v46, %v4617_v35  ;;  %v1674_v4 = vpack.c.bf16 %v3952_v34, %v3956_v36  ;;  %s3404_s28 = sshll.u32 %s3976_s24, 7  ;;  %s3976_s24 = sphi %s4684_s24, %s1618_s24   ;;  %v3972_v62 = vphi %v4682_v62, %v5300_v62   ;;  %v3968_v40 = vphi %v4680_v40, %v2237_v40   ;;  %v3964_v38 = vphi %v4678_v38, %v5299_v38   ;;  %v3960_v37 = vphi %v4676_v37, %v4905_v37   ;;  %v3956_v36 = vphi %v4674_v36, %v2274_v36   ;;  %v3952_v34 = vphi %v4672_v34, %v2275_v34   ;;  %v3948_v33 = vphi %v4670_v33, %v4891_v33   ;;  %v3944_v32 = vphi %v4668_v32, %v4897_v32  }
 0xb7b   : >> { %v3273_v5 = vor.u32 %v4652_v13, %v4647_v12  ;;  %v3269_v6 = vor.u32 %v4642_v2, %v4637_v1  ;;  %s4719_s14 = sshll.u32 %s3976_s24, 2  ;;  %s4722_s18 = scalar_lea.vmem [#allocation2], %s3404_s28 }
 0xb7c   : >> { %1636 = vrot.lane.b32.xlu0 %v1634_v63, %s3980_s21  ;;  %1659 = vmatpush.bf16.msra.mxu0 %v3262_v48  ;;  %s1628_s27 = ssub.s32 7, %s4719_s14  ;;  %s3981_s30 = smov 64  }
 0xb7d   : >> { %1834 = vmatpush.bf16.msra.mxu2 %v3262_v48  ;;  %1699 = vmatpush.bf16.msra.mxu1 %v3273_v5  ;;  %s3405_s23 = sshll.u32 %s1628_s27, 5  ;;  %s1815_s25 = ssub.s32 6, %s4719_s14 }
 0xb7e   : >> { %1862 = vmatpush.bf16.msra.mxu3 %v3273_v5  ;;  %s1671_s26 = scalar_lea.vmem [#allocation2], %s3405_s23  ;;  %s3408_s15 = sshll.u32 %s1815_s25, 5 }
 0xb7f   : >> { %s1846_s29 = scalar_lea.vmem [#allocation2], %s3408_s15  ;;  %s1977_s19 = ssub.s32 5, %s4719_s14 }
 0xb80   : >> { %1660 = vmatpush.bf16.msra.mxu0 %v3258_v3  ;;  %v1632_v9 = vld [vmem:[%s4722_s18] sm:$0xff]  ;;  %v1633_v44 = vld [vmem:[%s4722_s18 + $0x10] sm:$0xff]  ;;  %v1672_v29 = vld [vmem:[%s1671_s26 + $0x8] sm:$0xff]  ;;  %s3411_s22 = sshll.u32 %s1977_s19, 5  ;;  %s2139_s23 = ssub.s32 4, %s4719_s14 }
 0xb81   : >> { %1835 = vmatpush.bf16.msra.mxu2 %v3258_v3  ;;  %1700 = vmatpush.bf16.msra.mxu1 %v3269_v6  ;;  %v1673_v56 = vld [vmem:[%s1671_s26 + $0x18] sm:$0xff]  ;;  %s2008_s28 = scalar_lea.vmem [#allocation2], %s3411_s22  ;;  %s3414_s26 = sshll.u32 %s2139_s23, 5 }
 0xb82   : >> { %1863 = vmatpush.bf16.msra.mxu3 %v3269_v6  ;;  %s2170_s15 = scalar_lea.vmem [#allocation2], %s3414_s26  ;;  %s3315_s26 = sshll.u32 %s2139_s23, 4 }
 0xb84   : >> { %1996 = vmatpush.bf16.msrb.mxu0 %v3262_v48  ;;  %1676 = vrot.lane.b32.xlu0 %v1674_v4, %s3980_s21 }
 0xb85   : >> { %2158 = vmatpush.bf16.msrb.mxu2 %v3262_v48  ;;  %2024 = vmatpush.bf16.msrb.mxu1 %v3273_v5 }
 0xb86   : >> { %2186 = vmatpush.bf16.msrb.mxu3 %v3273_v5 }
 0xb88   : >> { %1997 = vmatpush.bf16.msrb.mxu0 %v3258_v3 }
 0xb89   : >> { %2159 = vmatpush.bf16.msrb.mxu2 %v3258_v3  ;;  %2025 = vmatpush.bf16.msrb.mxu1 %v3269_v6 }
 0xb8a   : >> { %2187 = vmatpush.bf16.msrb.mxu3 %v3269_v6 }
 0xbee   : >> { %v1637_v7 = vpop.permute.xlu0 %1636 }
 0xbef   : >> { %3263 = vmatmul.msk.bf16.vlgmr.msra.gmra.mxu0 %vm520_vm0, %v1637_v7 }
 0xbf6   : >> { %v1677_v8 = vpop.permute.xlu0 %1676 }
 0xbf7   : >> { %3274 = vmatmul.msk.bf16.vlgmr.msra.gmra.mxu1 %vm520_vm0, %v1677_v8 }
 0xc6c   : >> { %v1662_v10 = vpop.f32.mrf.mxu0 }
 0xc6d   : >> { %v1667_v42 = vadd.f32 %v1662_v10, %v1632_v9 }
 0xc6f   : >> { %3681 = vtanh.f32 %v1667_v42 }
 0xc74   : >> { %v1664_v39 = vpop.f32.mrf.mxu0  ;;  %v1702_v41 = vpop.f32.mrf.mxu1 }
 0xc75   : >> { %v3682_v51 = vpop.eup %3681  ;;  %v1668_v47 = vadd.f32 %v1664_v39, %v1633_v44  ;;  %v1707_v52 = vadd.f32 %v1702_v41, %v1672_v29  ;;  %v3279_v29 = vld [vmem:[%s4722_s18 + $0x20] sm:$0xff] }
 0xc76   : >> { %1721 = vrot.lane.b32.xlu1 %v3682_v51, %s3981_s30  ;;  %v1713_v30 = vmul.f32 0.5, %v3682_v51  ;;  %v3280_v51 = vld [vmem:[%s4722_s18 + $0x30] sm:$0xff] }
 0xc77   : >> { %3683 = vtanh.f32 %v1668_v47 }
 0xc78   : >> { %3685 = vtanh.f32 %v1707_v52  ;;  %v1715_v23 = vadd.f32 0.5, %v1713_v30 }
 0xc7a   : >> { %v1717_v26 = vmul.f32 %v3964_v38, %v1715_v23 }
 0xc7c   : >> { %v1704_v60 = vpop.f32.mrf.mxu1 }
 0xc7d   : >> { %v3684_v43 = vpop.eup %3683  ;;  %v1708_v16 = vadd.f32 %v1704_v60, %v1673_v56 }
 0xc7e   : >> { %v3686_v45 = vpop.eup %3685  ;;  %1723 = vrot.lane.b32.xlu1 %v3684_v43, %s3981_s30  ;;  %v1714_v50 = vmul.f32 0.5, %v3684_v43  ;;  %v1847_v43 = vld [vmem:[%s1846_s29 + $0x8] sm:$0xff] }
 0xc7f   : >> { %3687 = vtanh.f32 %v1708_v16  ;;  %1759 = vrot.lane.b32.xlu2 %v3686_v45, %s3981_s30  ;;  %v1751_v20 = vmul.f32 0.5, %v3686_v45 }
 0xc80   : >> { %v1716_v55 = vadd.f32 0.5, %v1714_v50 }
 0xc81   : >> { %v1753_v21 = vadd.f32 0.5, %v1751_v20 }
 0xc82   : >> { %v1718_v31 = vmul.f32 %v3960_v37, %v1716_v55 }
 0xc83   : >> { %v1755_v15 = vmul.f32 %v3948_v33, %v1753_v21 }
 0xc85   : >> { %v3688_v17 = vpop.eup %3687 }
 0xc86   : >> { %v1752_v49 = vmul.f32 0.5, %v3688_v17 }
 0xc87   : >> { %1761 = vrot.lane.b32.xlu2 %v3688_v17, %s3981_s30  ;;  %v1848_v17 = vld [vmem:[%s1846_s29 + $0x18] sm:$0xff] }
 0xc88   : >> { %v1754_v58 = vadd.f32 0.5, %v1752_v49 }
 0xc8a   : >> { %v1756_v34 = vmul.f32 %v3944_v32, %v1754_v58 }
 0xcd9   : >> { %v1760_v22 = vpop.permute.xlu2 %1759 }
 0xcda   : >> { %v1765_v53 = vmul.f32 %v1760_v22, %v1753_v21 }
 0xcdc   : >> { %1769 = vrot.lane.b32.xlu2 %v1765_v53, %s3980_s21 }
 0xce1   : >> { %v1762_v54 = vpop.permute.xlu2 %1761 }
 0xce2   : >> { %v1766_v57 = vmul.f32 %v1762_v54, %v1754_v58 }
 0xce8   : >> { %v1722_v24 = vpop.permute.xlu1 %1721 }
 0xce9   : >> { %v1727_v11 = vmul.f32 %v1722_v24, %v1715_v23 }
 0xceb   : >> { %1731 = vrot.lane.b32.xlu0 %v1727_v11, %s3980_s21 }
 0xcf0   : >> { %v1724_v59 = vpop.permute.xlu1 %1723 }
 0xcf1   : >> { %v1728_v14 = vmul.f32 %v1724_v59, %v1716_v55 }
 0xcf3   : >> { %1733 = vrot.lane.b32.xlu1 %v1728_v14, %s3980_s21  ;;  %1771 = vrot.lane.b32.xlu0 %v1766_v57, %s3980_s21 }
 0xd36   : >> { %v1770_v18 = vpop.permute.xlu2 %1769 }
 0xd37   : >> { %v4737_v19 = vadd.f32 %v1770_v18, %v1755_v15 }
 0xd39   : >> { %3689 = vtanh.f32 %v4737_v19 }
 0xd3f   : >> { %v3690_v25 = vpop.eup %3689 }
 0xd40   : >> { %1781 = vrot.lane.b32.xlu0 %v3690_v25, %s3981_s30 }
 0xd5d   : >> { %v1732_v27 = vpop.permute.xlu0 %1731 }
 0xd5e   : >> { %v4742_v28 = vadd.f32 %v1732_v27, %v1717_v26 }
 0xd60   : >> { %3691 = vtanh.f32 %v4742_v28 }
 0xd65   : >> { %v1734_v33 = vpop.permute.xlu1 %1733  ;;  %v1772_v36 = vpop.permute.xlu0 %1771 }
 0xd66   : >> { %v3692_v40 = vpop.eup %3691  ;;  %v4747_v62 = vadd.f32 %v1734_v33, %v1718_v31  ;;  %v4749_v63 = vadd.f32 %v1772_v36, %v1756_v34 }
 0xd67   : >> { %1743 = vrot.lane.b32.xlu1 %v3692_v40, %s3981_s30 }
 0xd68   : >> { %3693 = vtanh.f32 %v4747_v62 }
 0xd69   : >> { %3695 = vtanh.f32 %v4749_v63 }
 0xd6e   : >> { %v3694_v38 = vpop.eup %3693 }
 0xd6f   : >> { %v3696_v48 = vpop.eup %3695  ;;  %1745 = vrot.lane.b32.xlu2 %v3694_v38, %s3981_s30 }
 0xd70   : >> { %1783 = vrot.lane.b32.xlu1 %v3696_v48, %s3981_s30 }
 0xdb2   : >> { %v1782_v6 = vpop.permute.xlu0 %1781 }
 0xdb3   : >> { %v4763_v8 = vmul.f32 %v1782_v6, %v1753_v21 }
 0xdc9   : >> { %v1746_v32 = vpop.permute.xlu2 %1745 }
 0xdca   : >> { %v4756_v3 = vmul.f32 %v1746_v32, %v1716_v55 }
 0xdd9   : >> { %v1744_v37 = vpop.permute.xlu1 %1743 }
 0xdda   : >> { %v4758_v4 = vmul.f32 %v1744_v37, %v1715_v23 }
 0xddc   : >> { %v1821_v5 = vpack.c.bf16 %v4756_v3, %v4758_v4 }
 0xdde   : >> { %1823 = vrot.lane.b32.xlu2 %v1821_v5, %s3980_s21 }
 0xde2   : >> { %v1784_v7 = vpop.permute.xlu1 %1783 }
 0xde3   : >> { %v4765_v9 = vmul.f32 %v1784_v7, %v1754_v58 }
 0xde5   : >> { %v1849_v10 = vpack.c.bf16 %v4765_v9, %v4763_v8 }
 0xde7   : >> { %1851 = vrot.lane.b32.xlu0 %v1849_v10, %s3980_s21 }
 0xe38   : >> { %v1824_v42 = vpop.permute.xlu2 %1823 }
 0xe39   : >> { %3281 = vmatmul.msk.bf16.vlgmr.msra.gmra.mxu2 %vm520_vm0, %v1824_v42 }
 0xe59   : >> { %v1852_v44 = vpop.permute.xlu0 %1851 }
 0xe5a   : >> { %3284 = vmatmul.msk.bf16.vlgmr.msra.gmra.mxu3 %vm520_vm0, %v1852_v44 }
 0xebc   : >> { %v1837_v39 = vpop.f32.mrf.mxu2 }
 0xebd   : >> { %v1842_v41 = vadd.f32 %v3279_v29, %v1837_v39 }
 0xebf   : >> { %3697 = vtanh.f32 %v1842_v41 }
 0xec4   : >> { %v1839_v47 = vpop.f32.mrf.mxu2 }
 0xec5   : >> { %v3698_v52 = vpop.eup %3697  ;;  %v1843_v56 = vadd.f32 %v3280_v51, %v1839_v47 }
 0xec6   : >> { %1884 = vrot.lane.b32.xlu1 %v3698_v52, %s3981_s30  ;;  %v1876_v49 = vmul.f32 0.5, %v3698_v52 }
 0xec7   : >> { %3699 = vtanh.f32 %v1843_v56 }
 0xec8   : >> { %v1878_v50 = vadd.f32 0.5, %v1876_v49 }
 0xeca   : >> { %v1880_v27 = vmul.f32 %v1878_v50, %v4742_v28 }
 0xecd   : >> { %v3700_v60 = vpop.eup %3699 }
 0xece   : >> { %1886 = vrot.lane.b32.xlu2 %v3700_v60, %s3981_s30  ;;  %v1877_v30 = vmul.f32 0.5, %v3700_v60 }
 0xed0   : >> { %v1879_v23 = vadd.f32 0.5, %v1877_v30 }
 0xed2   : >> { %v1881_v33 = vmul.f32 %v1879_v23, %v4747_v62 }
 0xedd   : >> { %v1865_v16 = vpop.f32.mrf.mxu3 }
 0xede   : >> { %v1870_v45 = vadd.f32 %v1865_v16, %v1847_v43  ;;  %v3292_v43 = vld [vmem:[%s4722_s18 + $0x40] sm:$0xff] }
 0xee0   : >> { %3701 = vtanh.f32 %v1870_v45 }
 0xee5   : >> { %v1867_v20 = vpop.f32.mrf.mxu3 }
 0xee6   : >> { %v3702_v21 = vpop.eup %3701  ;;  %v1871_v22 = vadd.f32 %v1867_v20, %v1848_v17  ;;  %v3293_v17 = vld [vmem:[%s4722_s18 + $0x50] sm:$0xff]  ;;  %v2009_v20 = vld [vmem:[%s2008_s28 + $0x8] sm:$0xff] }
 0xee7   : >> { %1922 = vrot.lane.b32.xlu0 %v3702_v21, %s3981_s30  ;;  %v1914_v55 = vmul.f32 0.5, %v3702_v21 }
 0xee8   : >> { %3703 = vtanh.f32 %v1871_v22 }
 0xee9   : >> { %v1916_v59 = vadd.f32 0.5, %v1914_v55 }
 0xeeb   : >> { %v1918_v62 = vmul.f32 %v1916_v59, %v4737_v19 }
 0xeee   : >> { %v3704_v53 = vpop.eup %3703 }
 0xeef   : >> { %1924 = vrot.lane.b32.xlu1 %v3704_v53, %s3981_s30  ;;  %v1915_v15 = vmul.f32 0.5, %v3704_v53 }
 0xef1   : >> { %v1917_v18 = vadd.f32 0.5, %v1915_v15 }
 0xef3   : >> { %v1919_v28 = vmul.f32 %v1917_v18, %v4749_v63 }
 0xf28   : >> { %v1887_v24 = vpop.permute.xlu2 %1886 }
 0xf29   : >> { %v1891_v11 = vmul.f32 %v1887_v24, %v1879_v23  ;;  %v2010_v24 = vld [vmem:[%s2008_s28 + $0x18] sm:$0xff]  ;;  %s3289_s28 = sshll.u32 %s1815_s25, 4 }
 0xf2b   : >> { %1896 = vrot.lane.b32.xlu0 %v1891_v11, %s3980_s21 }
 0xf38   : >> { %v1885_v54 = vpop.permute.xlu1 %1884 }
 0xf39   : >> { %v1890_v58 = vmul.f32 %v1885_v54, %v1878_v50 }
 0xf3b   : >> { %1894 = vrot.lane.b32.xlu2 %v1890_v58, %s3980_s21 }
 0xf59   : >> { %v1923_v57 = vpop.permute.xlu0 %1922 }
 0xf5a   : >> { %v1928_v14 = vmul.f32 %v1923_v57, %v1916_v59 }
 0xf5c   : >> { %1932 = vrot.lane.b32.xlu1 %v1928_v14, %s3980_s21 }
 0xf61   : >> { %v1925_v25 = vpop.permute.xlu1 %1924 }
 0xf62   : >> { %v1929_v26 = vmul.f32 %v1925_v25, %v1917_v18 }
 0xf64   : >> { %1934 = vrot.lane.b32.xlu2 %v1929_v26, %s3980_s21 }
 0xf95   : >> { %v1895_v31 = vpop.permute.xlu2 %1894 }
 0xf96   : >> { %v4786_v34 = vadd.f32 %v1895_v31, %v1880_v27 }
 0xf98   : >> { %3705 = vtanh.f32 %v4786_v34 }
 0xf9d   : >> { %v1897_v36 = vpop.permute.xlu0 %1896 }
 0xf9e   : >> { %v3706_v40 = vpop.eup %3705  ;;  %v4790_v38 = vadd.f32 %v1897_v36, %v1881_v33 }
 0xf9f   : >> { %1906 = vrot.lane.b32.xlu0 %v3706_v40, %s3981_s30 }
 0xfa0   : >> { %3707 = vtanh.f32 %v4790_v38 }
 0xfa6   : >> { %v3708_v48 = vpop.eup %3707 }
 0xfa7   : >> { %1908 = vrot.lane.b32.xlu1 %v3708_v48, %s3981_s30 }
 0xfbe   : >> { %v1935_v32 = vpop.permute.xlu2 %1934 }
 0xfbf   : >> { %v4796_v37 = vadd.f32 %v1935_v32, %v1919_v28 }
 0xfc1   : >> { %3709 = vtanh.f32 %v4796_v37 }
 0xfc7   : >> { %v3710_v5 = vpop.eup %3709 }
 0xfc8   : >> { %1946 = vrot.lane.b32.xlu0 %v3710_v5, %s3981_s30 }
 0xfce   : >> { %v1933_v6 = vpop.permute.xlu1 %1932 }
 0xfcf   : >> { %v4801_v7 = vadd.f32 %v1933_v6, %v1918_v62 }
 0xfd1   : >> { %3711 = vtanh.f32 %v4801_v7 }
 0xfd7   : >> { %v3712_v10 = vpop.eup %3711 }
 0xfd8   : >> { %1944 = vrot.lane.b32.xlu2 %v3712_v10, %s3981_s30 }
0x1011   : >> { %v1907_v42 = vpop.permute.xlu0 %1906 }
0x1012   : >> { %v4805_v44 = vmul.f32 %v1907_v42, %v1878_v50 }
0x1019   : >> { %v1909_v63 = vpop.permute.xlu1 %1908 }
0x101a   : >> { %v4807_v29 = vmul.f32 %v1909_v63, %v1879_v23 }
0x101c   : >> { %v1983_v39 = vpack.c.bf16 %v4807_v29, %v4805_v44 }
0x101e   : >> { %1985 = vrot.lane.b32.xlu1 %v1983_v39, %s3980_s21 }
0x1032   : >> { %v1945_v19 = vpop.permute.xlu2 %1944 }
0x1033   : >> { %v4812_v51 = vmul.f32 %v1945_v19, %v1916_v59 }
0x103a   : >> { %v1947_v41 = vpop.permute.xlu0 %1946 }
0x103b   : >> { %v4814_v47 = vmul.f32 %v1947_v41, %v1917_v18 }
0x103d   : >> { %v2011_v52 = vpack.c.bf16 %v4814_v47, %v4812_v51 }
0x103f   : >> { %2013 = vrot.lane.b32.xlu2 %v2011_v52, %s3980_s21 }
0x1090   : >> { %v1986_v56 = vpop.permute.xlu1 %1985 }
0x1091   : >> { %3294 = vmatmul.msk.bf16.vlgmr.msrb.gmra.mxu0 %vm520_vm0, %v1986_v56 }
0x1099   : >> { %v2014_v60 = vpop.permute.xlu2 %2013 }
0x109a   : >> { %3297 = vmatmul.msk.bf16.vlgmr.msrb.gmra.mxu1 %vm520_vm0, %v2014_v60 }
0x110e   : >> { %v1999_v16 = vpop.f32.mrf.mxu0 }
0x110f   : >> { %v2004_v45 = vadd.f32 %v3292_v43, %v1999_v16 }
0x1111   : >> { %3713 = vtanh.f32 %v2004_v45 }
0x1116   : >> { %v2001_v21 = vpop.f32.mrf.mxu0 }
0x1117   : >> { %v3714_v22 = vpop.eup %3713  ;;  %v2005_v53 = vadd.f32 %v3293_v17, %v2001_v21  ;;  %v2027_v30 = vpop.f32.mrf.mxu1 }
0x1118   : >> { %v2032_v23 = vadd.f32 %v2027_v30, %v2009_v20  ;;  %2046 = vrot.lane.b32.xlu0 %v3714_v22, %s3981_s30  ;;  %v2038_v15 = vmul.f32 0.5, %v3714_v22 }
0x1119   : >> { %3715 = vtanh.f32 %v2005_v53 }
0x111a   : >> { %3717 = vtanh.f32 %v2032_v23  ;;  %v2040_v18 = vadd.f32 0.5, %v2038_v15 }
0x111f   : >> { %v3716_v11 = vpop.eup %3715  ;;  %v2029_v49 = vpop.f32.mrf.mxu1 }
0x1120   : >> { %v3718_v50 = vpop.eup %3717  ;;  %v2033_v54 = vadd.f32 %v2029_v49, %v2010_v24  ;;  %2048 = vrot.lane.b32.xlu1 %v3716_v11, %s3981_s30  ;;  %v2039_v27 = vmul.f32 0.5, %v3716_v11  ;;  %v3305_v49 = vld [vmem:[%s4722_s18 + $0x60] sm:$0xff] }
0x1121   : >> { %2084 = vrot.lane.b32.xlu2 %v3718_v50, %s3981_s30  ;;  %v2076_v55 = vmul.f32 0.5, %v3718_v50 }
0x1122   : >> { %3719 = vtanh.f32 %v2033_v54  ;;  %v2041_v31 = vadd.f32 0.5, %v2039_v27 }
0x1123   : >> { %v2078_v59 = vadd.f32 0.5, %v2076_v55  ;;  %v2171_v55 = vld [vmem:[%s2170_s15 + $0x8] sm:$0xff] }
0x1124   : >> { %v2043_v5 = vmul.f32 %v2041_v31, %v4790_v38  ;;  %v2042_v38 = vmul.f32 %v2040_v18, %v4786_v34 }
0x1125   : >> { %v2080_v62 = vmul.f32 %v2078_v59, %v4801_v7 }
0x1128   : >> { %v3720_v58 = vpop.eup %3719 }
0x1129   : >> { %2086 = vrot.lane.b32.xlu0 %v3720_v58, %s3981_s30  ;;  %v2077_v40 = vmul.f32 0.5, %v3720_v58  ;;  %v3306_v58 = vld [vmem:[%s4722_s18 + $0x70] sm:$0xff]  ;;  %s3406_s18 = sshll.u32 %s3976_s24, 6  ;;  %s1618_s24 = sadd.s32 1, %s3976_s24  }
0x112a   : >> { %s4935_s29 = scalar_lea.vmem [#allocation3], %s3406_s18  ;;  %p1615_p11 = scmp.ge.s32.totalorder %s1618_s24, 2  }
0x112b   : >> { %v2079_v48 = vadd.f32 0.5, %v2077_v40  ;;  %v3416_v35 = vld [vmem:[%s5293_s7] sm:$0xff] (%p1615_p11) }
0x112d   : >> { %v2081_v56 = vmul.f32 %v2079_v48, %v4796_v37 }
0x117b   : >> { %v2085_v57 = vpop.permute.xlu2 %2084 }
0x117c   : >> { %v2090_v14 = vmul.f32 %v2085_v57, %v2078_v59 }
0x117e   : >> { %2094 = vrot.lane.b32.xlu0 %v2090_v14, %s3980_s21 }
0x118a   : >> { %v2047_v25 = vpop.permute.xlu0 %2046 }
0x118b   : >> { %v2052_v26 = vmul.f32 %v2047_v25, %v2040_v18  ;;  %v2172_v25 = vld [vmem:[%s2170_s15 + $0x18] sm:$0xff] }
0x118d   : >> { %2056 = vrot.lane.b32.xlu1 %v2052_v26, %s3980_s21 }
0x1192   : >> { %v2049_v33 = vpop.permute.xlu1 %2048 }
0x1193   : >> { %v2053_v36 = vmul.f32 %v2049_v33, %v2041_v31 }
0x1195   : >> { %2058 = vrot.lane.b32.xlu2 %v2053_v36, %s3980_s21 }
0x119b   : >> { %v2087_v28 = vpop.permute.xlu0 %2086 }
0x119c   : >> { %v2091_v32 = vmul.f32 %v2087_v28, %v2079_v48 }
0x119e   : >> { %2096 = vrot.lane.b32.xlu1 %v2091_v32, %s3980_s21 }
0x11ef   : >> { %v2059_v6 = vpop.permute.xlu2 %2058 }
0x11f0   : >> { %v2095_v10 = vpop.permute.xlu0 %2094  ;;  %v4836_v42 = vadd.f32 %v2059_v6, %v2043_v5 }
0x11f1   : >> { %v4838_v63 = vadd.f32 %v2095_v10, %v2080_v62 }
0x11f2   : >> { %3721 = vtanh.f32 %v4836_v42 }
0x11f3   : >> { %3723 = vtanh.f32 %v4838_v63 }
0x11f8   : >> { %v3722_v39 = vpop.eup %3721 }
0x11f9   : >> { %v3724_v19 = vpop.eup %3723  ;;  %2070 = vrot.lane.b32.xlu0 %v3722_v39, %s3981_s30 }
0x11fa   : >> { %2106 = vrot.lane.b32.xlu1 %v3724_v19, %s3981_s30 }
0x11ff   : >> { %v2057_v41 = vpop.permute.xlu1 %2056 }
0x1200   : >> { %v4845_v7 = vadd.f32 %v2057_v41, %v2042_v38 }
0x1202   : >> { %3725 = vtanh.f32 %v4845_v7 }
0x1208   : >> { %v3726_v52 = vpop.eup %3725 }
0x1209   : >> { %2068 = vrot.lane.b32.xlu2 %v3726_v52, %s3981_s30 }
0x1210   : >> { %v2097_v60 = vpop.permute.xlu1 %2096 }
0x1211   : >> { %v4850_v43 = vadd.f32 %v2097_v60, %v2081_v56 }
0x1213   : >> { %3727 = vtanh.f32 %v4850_v43 }
0x1219   : >> { %v3728_v16 = vpop.eup %3727 }
0x121a   : >> { %2108 = vrot.lane.b32.xlu2 %v3728_v16, %s3981_s30 }
0x1263   : >> { %v2069_v45 = vpop.permute.xlu2 %2068 }
0x1264   : >> { %v4854_v17 = vmul.f32 %v2069_v45, %v2040_v18 }
0x126b   : >> { %v2071_v34 = vpop.permute.xlu0 %2070 }
0x126c   : >> { %v4856_v20 = vmul.f32 %v2071_v34, %v2041_v31  ;;  %v2107_v37 = vpop.permute.xlu1 %2106 }
0x126d   : >> { %v4861_v53 = vmul.f32 %v2107_v37, %v2078_v59 }
0x126e   : >> { %v2145_v21 = vpack.c.bf16 %v4856_v20, %v4854_v17 }
0x1270   : >> { %2147 = vrot.lane.b32.xlu0 %v2145_v21, %s3980_s21 }
0x1274   : >> { %v2109_v22 = vpop.permute.xlu2 %2108 }
0x1275   : >> { %v4863_v30 = vmul.f32 %v2109_v22, %v2079_v48 }
0x1277   : >> { %v2173_v23 = vpack.c.bf16 %v4863_v30, %v4861_v53 }
0x1279   : >> { %2175 = vrot.lane.b32.xlu1 %v2173_v23, %s3980_s21 }
0x12e2   : >> { %v2148_v24 = vpop.permute.xlu0 %2147 }
0x12e3   : >> { %3307 = vmatmul.msk.bf16.vlgmr.msrb.gmra.mxu2 %vm520_vm0, %v2148_v24 }
0x12eb   : >> { %v2176_v11 = vpop.permute.xlu1 %2175 }
0x12ec   : >> { %3310 = vmatmul.msk.bf16.vlgmr.msrb.gmra.mxu3 %vm520_vm0, %v2176_v11 }
0x1366   : >> { %v2161_v50 = vpop.f32.mrf.mxu2 }
0x1367   : >> { %v2166_v54 = vadd.f32 %v3305_v49, %v2161_v50 }
0x1369   : >> { %3729 = vtanh.f32 %v2166_v54 }
0x136e   : >> { %v2163_v59 = vpop.f32.mrf.mxu2 }
0x136f   : >> { %v3730_v57 = vpop.eup %3729  ;;  %v2167_v14 = vadd.f32 %v3306_v58, %v2163_v59  ;;  %v2189_v15 = vpop.f32.mrf.mxu3 }
0x1370   : >> { %v2194_v18 = vadd.f32 %v2189_v15, %v2171_v55  ;;  %2208 = vrot.lane.b32.xlu2 %v3730_v57, %s3981_s30  ;;  %v2200_v40 = vmul.f32 0.5, %v3730_v57 }
0x1371   : >> { %3731 = vtanh.f32 %v2167_v14 }
0x1372   : >> { %3733 = vtanh.f32 %v2194_v18  ;;  %v2202_v48 = vadd.f32 0.5, %v2200_v40 }
0x1374   : >> { %v2204_v45 = vmul.f32 %v2202_v48, %v4845_v7 }
0x1377   : >> { %v3732_v26 = vpop.eup %3731  ;;  %v2191_v27 = vpop.f32.mrf.mxu3 }
0x1378   : >> { %v3734_v31 = vpop.eup %3733  ;;  %v2195_v33 = vadd.f32 %v2191_v27, %v2172_v25  ;;  %2210 = vrot.lane.b32.xlu0 %v3732_v26, %s3981_s30  ;;  %v2201_v39 = vmul.f32 0.5, %v3732_v26  ;;  %v3419_v25 = vld [vmem:[%s5293_s7 + $0x18] sm:$0xff] (%p1615_p11)  ;;  %v3418_v26 = vld [vmem:[%s5293_s7 + $0x10] sm:$0xff] (%p1615_p11)  ;;  %v3417_v27 = vld [vmem:[%s5293_s7 + $0x8] sm:$0xff] (%p1615_p11) }
0x1379   : >> { %2246 = vrot.lane.b32.xlu1 %v3734_v31, %s3981_s30  ;;  %v2238_v19 = vmul.f32 0.5, %v3734_v31  ;;  %2388 = vmatpush.bf16.msra.mxu0 (%p1615_p11), %v3419_v25 }
0x137a   : >> { %3735 = vtanh.f32 %v2195_v33  ;;  %v2203_v38 = vadd.f32 0.5, %v2201_v39  ;;  %3433 = vmatpush.bf16.msra.mxu1 (%p1615_p11), %v3419_v25  ;;  %3434 = vmatpush.bf16.msra.mxu2 (%p1615_p11), %v3419_v25 }
0x137b   : >> { %v2240_v41 = vadd.f32 0.5, %v2238_v19  ;;  %3435 = vmatpush.bf16.msra.mxu3 (%p1615_p11), %v3419_v25 }
0x137c   : >> { %v2205_v49 = vmul.f32 %v2203_v38, %v4836_v42 }
0x137d   : >> { %v2242_v37 = vmul.f32 %v2240_v41, %v4838_v63  ;;  %2389 = vmatpush.bf16.msra.mxu0 (%p1615_p11), %v3418_v26 }
0x137e   : > { %3436 = vmatpush.bf16.msra.mxu1 (%p1615_p11), %v3418_v26  ;;  %3437 = vmatpush.bf16.msra.mxu2 (%p1615_p11), %v3418_v26 }
0x137f   : > { %3438 = vmatpush.bf16.msra.mxu3 (%p1615_p11), %v3418_v26 }
0x1380   : >> { %v3736_v36 = vpop.eup %3735 }
0x1381   : >> { %2248 = vrot.lane.b32.xlu2 %v3736_v36, %s3981_s30  ;;  %v2239_v5 = vmul.f32 0.5, %v3736_v36  ;;  %2390 = vmatpush.bf16.msra.mxu0 (%p1615_p11), %v3417_v27 }
0x1382   : > { %3439 = vmatpush.bf16.msra.mxu1 (%p1615_p11), %v3417_v27  ;;  %3440 = vmatpush.bf16.msra.mxu2 (%p1615_p11), %v3417_v27 }
0x1383   : >> { %v4880_v62 = vadd.f32 0.5, %v2239_v5  ;;  %3441 = vmatpush.bf16.msra.mxu3 (%p1615_p11), %v3417_v27 }
0x1385   : >> { %v2243_v24 = vmul.f32 %v4880_v62, %v4850_v43  ;;  %2391 = vmatpush.bf16.msra.mxu0 (%p1615_p11), %v3416_v35 }
0x1386   : > { %3442 = vmatpush.bf16.msra.mxu1 (%p1615_p11), %v3416_v35  ;;  %3443 = vmatpush.bf16.msra.mxu2 (%p1615_p11), %v3416_v35 }
0x1387   : > { %3444 = vmatpush.bf16.msra.mxu3 (%p1615_p11), %v3416_v35 }
0x13ca   : >> { %v2209_v28 = vpop.permute.xlu2 %2208 }
0x13cb   : >> { %v2214_v32 = vmul.f32 %v2209_v28, %v2202_v48 }
0x13cd   : >> { %2218 = vrot.lane.b32.xlu0 %v2214_v32, %s3980_s21 }
0x13db   : >> { %v2249_v6 = vpop.permute.xlu2 %2248 }
0x13dc   : >> { %v2253_v10 = vmul.f32 %v2249_v6, %v4880_v62 }
0x13de   : >> { %2258 = vrot.lane.b32.xlu0 %v2253_v10, %s3980_s21 }
0x13ea   : >> { %v2211_v52 = vpop.permute.xlu0 %2210 }
0x13eb   : >> { %v2247_v56 = vpop.permute.xlu1 %2246  ;;  %v2215_v60 = vmul.f32 %v2211_v52, %v2203_v38 }
0x13ec   : >> { %v2252_v16 = vmul.f32 %v2247_v56, %v2240_v41 }
0x13ed   : >> { %2220 = vrot.lane.b32.xlu1 %v2215_v60, %s3980_s21  ;;  %v5017_v60 = vld [vmem:[%s5294_s8] ss:$0 sm:$0xff] (%p1615_p11) }
0x13ee   : >> { %2256 = vrot.lane.b32.xlu2 %v2252_v16, %s3980_s21 }
0x143f   : >> { %v2219_v34 = vpop.permute.xlu0 %2218 }
0x1440   : >> { %v4887_v21 = vadd.f32 %v2219_v34, %v2204_v45  }
0x1442   : >> { %3737 = vtanh.f32 %v4887_v21 }
0x1448   : >> { %v3738_v22 = vpop.eup %3737  ;;  %v2257_v23 = vpop.permute.xlu2 %2256 }
0x1449   : >> { %v4891_v33 = vadd.f32 %v2257_v23, %v2242_v37   ;;  %2230 = vrot.lane.b32.xlu1 %v3738_v22, %s3981_s30 }
0x144b   : >> { %3739 = vtanh.f32 %v4891_v33 }
0x1450   : >> { %v2259_v11 = vpop.permute.xlu0 %2258 }
0x1451   : >> { %v3740_v7 = vpop.eup %3739  ;;  %v4897_v32 = vadd.f32 %v2259_v11, %v2243_v24  }
0x1452   : >> { %2268 = vrot.lane.b32.xlu0 %v3740_v7, %s3981_s30 }
0x1453   : >> { %3741 = vtanh.f32 %v4897_v32 }
0x1459   : >> { %v3742_v63 = vpop.eup %3741 }
0x145a   : >> { %1793 = vrot.lane.b32.xlu0 %v4756_v3, %s3980_s21  ;;  %2270 = vrot.lane.b32.xlu1 %v3742_v63, %s3981_s30 }
0x145f   : >> { %v2221_v50 = vpop.permute.xlu1 %2220 }
0x1460   : >> { %v4905_v37 = vadd.f32 %v2221_v50, %v2205_v49  }
0x1462   : >> { %3743 = vtanh.f32 %v4905_v37  ;;  %1954 = vrot.lane.b32.xlu0 %v4805_v44, %s3980_s21  ;;  %1803 = vrot.lane.b32.xlu1 %v4763_v8, %s3981_s30 }
0x1468   : >> { %v3744_v43 = vpop.eup %3743 }
0x1469   : >> { %2232 = vrot.lane.b32.xlu2 %v3744_v43, %s3981_s30 }
0x146a   : >> { %1968 = vrot.lane.b32.xlu0 %v4814_v47, %s3981_s30  ;;  %1956 = vrot.lane.b32.xlu1 %v4807_v29, %s3980_s21 }
0x1471   : >> { %1791 = vrot.lane.b32.xlu2 %v4758_v4, %s3980_s21 }
0x1472   : >> { %2128 = vrot.lane.b32.xlu0 %v4861_v53, %s3981_s30  ;;  %2116 = vrot.lane.b32.xlu1 %v4854_v17, %s3980_s21 }
0x1479   : >> { %1805 = vrot.lane.b32.xlu2 %v4765_v9, %s3981_s30 }
0x147a   : >> { %2130 = vrot.lane.b32.xlu1 %v4863_v30, %s3981_s30 }
0x1481   : >> { %1966 = vrot.lane.b32.xlu2 %v4812_v51, %s3981_s30 }
0x1489   : >> { %2118 = vrot.lane.b32.xlu2 %v4856_v20, %s3980_s21 }
0x14bb   : >> { %v2231_v3 = vpop.permute.xlu1 %2230 }
0x14bc   : >> { %v2236_v4 = vmul.f32 %v2231_v3, %v2202_v48  }
0x14be   : >> { %2278 = vrot.lane.b32.xlu2 %v2236_v4, %s3980_s21 }
0x14c3   : >> { %v2233_v8 = vpop.permute.xlu2 %2232 }
0x14c4   : >> { %v2269_v44 = vpop.permute.xlu0 %2268  ;;  %v2237_v40 = vmul.f32 %v2233_v8, %v2203_v38   ;;  %v5299_v38 = vmov %v4887_v21 }
0x14c5   : >> { %v2274_v36 = vmul.f32 %v2269_v44, %v2240_v41  }
0x14c6   : >> { %2280 = vrot.lane.b32.xlu0 %v2237_v40, %s3980_s21  ;;  %s3276_s21 = sshll.u32 %s1628_s27, 4  ;;  %s1973_s27 = scalar_lea.vmem [#allocation3], %s3289_s28 }
0x14c7   : >> { %2290 = vrot.lane.b32.xlu1 %v2274_v36, %s3981_s30  ;;  %s1810_s22 = scalar_lea.vmem [#allocation3], %s3276_s21 }
0x14cb   : >> { %v1792_v9 = vpop.permute.xlu2 %1791 }
0x14cc   : >> { %v1794_v29 = vpop.permute.xlu0 %1793  ;;  %v2271_v51 = vpop.permute.xlu1 %2270  ;;  %1799 = vst.msk [vmem:[%s4935_s29] sm:$0xff] %vm520_vm0, %v1792_v9 }
0x14cd   : >> { %1800 = vst.msk [vmem:[%s4935_s29 + $0x8] sm:$0xff] %vm520_vm0, %v1794_v29  ;;  %v2275_v34 = vmul.f32 %v2271_v51, %v4880_v62   ;;  %v5300_v62 = vmov %v2236_v4 }
0x14cf   : >> { %2292 = vrot.lane.b32.xlu2 %v2275_v34, %s3981_s30  ;;  %s3302_s30 = sshll.u32 %s1977_s19, 4  ;;  %s2297_s19 = scalar_lea.vmem [#allocation3], %s3315_s26 }
0x14d0   : >> { %s2135_s25 = scalar_lea.vmem [#allocation3], %s3302_s30 }
0x14d3   : >> { %v1806_v47 = vpop.permute.xlu2 %1805 }
0x14d4   : >> { %v1955_v42 = vpop.permute.xlu0 %1954  ;;  %v1804_v17 = vpop.permute.xlu1 %1803  ;;  %1813 = vst.msk [vmem:[%s1810_s22 + $0x8] sm:$0xff] %vm882_vm1, %v1806_v47 }
0x14d5   : >> { %1812 = vst.msk [vmem:[%s1810_s22] sm:$0xff] %vm882_vm1, %v1804_v17 }
0x14d6   : >> { %3287 = vst.msk [vmem:[%s4935_s29 + $0x10] sm:$0xff] %vm520_vm0, %v1955_v42 }
0x14db   : >> { %v1967_v20 = vpop.permute.xlu2 %1966 }
0x14dc   : >> { %v1969_v53 = vpop.permute.xlu0 %1968  ;;  %v1957_v30 = vpop.permute.xlu1 %1956 }
0x14dd   : >> { %3288 = vst.msk [vmem:[%s4935_s29 + $0x18] sm:$0xff] %vm520_vm0, %v1957_v30 }
0x14de   : >> { %1975 = vst.msk [vmem:[%s1973_s27 + $0x8] sm:$0xff] %vm882_vm1, %v1969_v53 }
0x14df   : >> { %1974 = vst.msk [vmem:[%s1973_s27] sm:$0xff] %vm882_vm1, %v1967_v20 }
0x14e3   : >> { %v2119_v54 = vpop.permute.xlu2 %2118 }
0x14e4   : >> { %v2129_v58 = vpop.permute.xlu0 %2128  ;;  %v2117_v55 = vpop.permute.xlu1 %2116  ;;  %3301 = vst.msk [vmem:[%s4935_s29 + $0x28] sm:$0xff] %vm520_vm0, %v2119_v54 }
0x14e5   : >> { %3300 = vst.msk [vmem:[%s4935_s29 + $0x20] sm:$0xff] %vm520_vm0, %v2117_v55 }
0x14e6   : >> { %2136 = vst.msk [vmem:[%s2135_s25] sm:$0xff] %vm882_vm1, %v2129_v58 }
0x14ec   : >> { %v2131_v59 = vpop.permute.xlu1 %2130 }
0x14ed   : >> { %2137 = vst.msk [vmem:[%s2135_s25 + $0x8] sm:$0xff] %vm882_vm1, %v2131_v59 }
0x1518   : >> { %v2279_v57 = vpop.permute.xlu2 %2278 }
0x1519   : >> { %3313 = vst.msk [vmem:[%s4935_s29 + $0x30] sm:$0xff] %vm520_vm0, %v2279_v57 }
0x1529   : >> { %v2293_v18 = vpop.permute.xlu2 %2292 }
0x1537   : > { %1617 = sbr.rel (!%p1615_p11) target bundleno = 2938 (0xb7a), region = 229 }
0x1538   : >> { %v2281_v14 = vpop.permute.xlu0 %2280 }
0x1539   : >> { %v2291_v15 = vpop.permute.xlu1 %2290  ;;  %3314 = vst.msk [vmem:[%s4935_s29 + $0x38] sm:$0xff] %vm520_vm0, %v2281_v14 }
0x153a   : >> { %2298 = vst.msk [vmem:[%s2297_s19] sm:$0xff] %vm882_vm1, %v2291_v15 }
0x153b   : >> { %2299 = vst.msk [vmem:[%s2297_s19 + $0x8] sm:$0xff] %vm882_vm1, %v2293_v18 }
0x153c   : > { %s3420_s30 = sshll.u32 (%p4062_p5), %s3058_s12, 4 }
0x153d   : > { %s2762_s17 = scalar_lea.vmem (%p4062_p5), %s5295_s9, %s3420_s30 }
0x1542   : > { %v2300_v46 = vld [vmem:[#allocation3] sm:$0xff]  ;;  %v2301_v61 = vld [vmem:[#allocation3 + $0x8] sm:$0xff]  ;;  %v2302_v28 = vld [vmem:[#allocation3 + $0x10] sm:$0xff] }
0x1543   : > { %v2304_v0 = vld [vmem:[#allocation3 + $0x20] sm:$0xff]  ;;  %v2305_v1 = vld [vmem:[#allocation3 + $0x28] sm:$0xff]  ;;  %v2316_v33 = vpack.c.bf16 %v2301_v61, %v2300_v46  ;;  %v2303_v32 = vld [vmem:[#allocation3 + $0x18] sm:$0xff] }
0x1544   : > { %v2308_v2 = vld [vmem:[#allocation3 + $0x40] sm:$0xff]  ;;  %v2309_v12 = vld [vmem:[#allocation3 + $0x48] sm:$0xff]  ;;  %v2318_v36 = vpack.c.bf16 %v2305_v1, %v2304_v0  ;;  %v2306_v5 = vld [vmem:[#allocation3 + $0x30] sm:$0xff]  ;;  %v2317_v38 = vpack.c.bf16 %v2303_v32, %v2302_v28 }
0x1545   : > { %v2312_v13 = vld [vmem:[#allocation3 + $0x60] sm:$0xff]  ;;  %v2313_v31 = vld [vmem:[#allocation3 + $0x68] sm:$0xff]  ;;  %v2320_v40 = vpack.c.bf16 %v2309_v12, %v2308_v2  ;;  %3332 = vmatmul.msk.bf16.vlgmr.msra.gmra.mxu0 %vm1449_vm2, %v2316_v33  ;;  %v2307_v62 = vld [vmem:[#allocation3 + $0x38] sm:$0xff] }
0x1546   : > { %v2322_v48 = vpack.c.bf16 %v2313_v31, %v2312_v13  ;;  %3334 = vmatmul.msk.bf16.vlgmr.msra.gmra.mxu1 %vm1449_vm2, %v2318_v36  ;;  %v2310_v6 = vld [vmem:[#allocation3 + $0x50] sm:$0xff]  ;;  %v2311_v10 = vld [vmem:[#allocation3 + $0x58] sm:$0xff]  ;;  %v2319_v41 = vpack.c.bf16 %v2307_v62, %v2306_v5 }
0x1547   : > { %3336 = vmatmul.msk.bf16.vlgmr.msra.gmra.mxu2 %vm1449_vm2, %v2320_v40  ;;  %v2314_v39 = vld [vmem:[#allocation3 + $0x70] sm:$0xff]  ;;  %v2315_v19 = vld [vmem:[#allocation3 + $0x78] sm:$0xff]  ;;  %v2321_v52 = vpack.c.bf16 %v2311_v10, %v2310_v6 }
0x1548   : > { %3338 = vmatmul.msk.bf16.vlgmr.msra.gmra.mxu3 %vm1449_vm2, %v2322_v48  ;;  %v2323_v56 = vpack.c.bf16 %v2315_v19, %v2314_v39 }
0x1555   : > { %3333 = vmatmul.msk.bf16.gmra.mxu0 %vm1449_vm2, %v2317_v38 }
0x1556   : > { %3335 = vmatmul.msk.bf16.gmra.mxu1 %vm1449_vm2, %v2319_v41 }
0x1557   : > { %3337 = vmatmul.msk.bf16.gmra.mxu2 %vm1449_vm2, %v2321_v52 }
0x1558   : > { %3339 = vmatmul.msk.bf16.gmra.mxu3 %vm1449_vm2, %v2323_v56 }
0x15c2   : > { %v2393_v16 = vpop.f32.mrf.mxu0 }
0x15c3   : > { %v2403_v45 = vpop.f32.mrf.mxu1  ;;  %v2394_v34 = vadd.f32 %v5017_v60, %v2393_v16 }
0x15c4   : > { %v2404_v21 = vadd.f32 %v5017_v60, %v2403_v45 }
0x15c5   : > { %v3340_v37 = vmul.f32 -1.442695, %v2394_v34 }
0x15c6   : > { %v3344_v22 = vmul.f32 -1.442695, %v2404_v21 }
0x15c7   : > { %3746 = vpow2.f32 %v3340_v37 }
0x15c8   : > { %3748 = vpow2.f32 %v3344_v22 }
0x15ca   : > { %v2413_v23 = vpop.f32.mrf.mxu2  ;;  %v2395_v63 = vpop.f32.mrf.mxu0 }
0x15cb   : > { %v2423_v24 = vpop.f32.mrf.mxu3  ;;  %v2414_v11 = vadd.f32 %v5017_v60, %v2413_v23  ;;  %v2405_v49 = vpop.f32.mrf.mxu1  ;;  %v2396_v50 = vadd.f32 %v5017_v60, %v2395_v63 }
0x15cc   : > { %v2424_v7 = vadd.f32 %v5017_v60, %v2423_v24  ;;  %v2406_v43 = vadd.f32 %v5017_v60, %v2405_v49 }
0x15cd   : > { %v3348_v3 = vmul.f32 -1.442695, %v2414_v11  ;;  %v3747_v8 = vpop.eup %3746  ;;  %v3341_v29 = vmul.f32 -1.442695, %v2396_v50 }
0x15ce   : > { %v3352_v4 = vmul.f32 -1.442695, %v2424_v7  ;;  %v3749_v44 = vpop.eup %3748  ;;  %v2481_v9 = vadd.f32 1.0, %v3747_v8  ;;  %v3345_v47 = vmul.f32 -1.442695, %v2406_v43 }
0x15cf   : > { %3750 = vpow2.f32 %v3348_v3  ;;  %v5025_v51 = vadd.f32 1.0, %v3749_v44 }
0x15d0   : > { %3752 = vpow2.f32 %v3352_v4  ;;  %v2506_v53 = vand.u32 2147483647, %v2481_v9  ;;  %v2508_v30 = vand.u32 2147483648, %v2481_v9  ;;  %vm2502_vm3 = vweird.f32 %v2481_v9 }
0x15d1   : > { %3754 = vrcp.f32 %v2481_v9  ;;  %v2566_v55 = vand.u32 2147483647, %v5025_v51  ;;  %v2568_v15 = vand.u32 2147483648, %v5025_v51  ;;  %vm2562_vm4 = vweird.f32 %v5025_v51 }
0x15d2   : > { %3756 = vrcp.f32 %v5025_v51  ;;  %v2415_v42 = vpop.f32.mrf.mxu2  ;;  %v2398_v54 = vpop.f32.mrf.mxu0  ;;  %vm5038_vm5 = vcmp.eq.f32.partialorder %v2506_v53, 8.507059e+37  ;;  %v2509_v1 = vor.u32 1.1754944e-38, %v2508_v30 }
0x15d3   : > { %v2425_v17 = vpop.f32.mrf.mxu3  ;;  %3758 = vpow2.f32 %v3341_v29  ;;  %v2416_v20 = vadd.f32 %v5017_v60, %v2415_v42  ;;  %v2399_v27 = vadd.f32 %v5017_v60, %v2398_v54  ;;  %v2408_v35 = vpop.f32.mrf.mxu1  ;;  %vm5044_vm6 = vcmp.eq.f32.partialorder %v2566_v55, 8.507059e+37 }
0x15d4   : > { %3760 = vpow2.f32 %v3345_v47  ;;  %v2426_v57 = vadd.f32 %v5017_v60, %v2425_v17  ;;  %v2569_v40 = vor.u32 1.1754944e-38, %v2568_v15  ;;  %v2409_v48 = vadd.f32 %v5017_v60, %v2408_v35 }
0x15d5   : > { %v3751_v58 = vpop.eup %3750  ;;  %v3349_v59 = vmul.f32 -1.442695, %v2416_v20  ;;  %v3342_v5 = vmul.f32 -1.442695, %v2399_v27 }
0x15d6   : > { %v3753_v14 = vpop.eup %3752  ;;  %v5032_v18 = vadd.f32 1.0, %v3751_v58  ;;  %v3353_v31 = vmul.f32 -1.442695, %v2426_v57  ;;  %v5059_v16 = vmul.f32 -1.442695, %v2409_v48 }
0x15d7   : > { %v3755_v25 = vpop.eup %3754  ;;  %v5035_v26 = vadd.f32 1.0, %v3753_v14 }
0x15d8   : > { %v3757_v46 = vpop.eup %3756  ;;  %v2498_v61 = vmul.f32 %v3755_v25, %v2481_v9  ;;  %3762 = vrcp.f32 %v5032_v18  ;;  %vm2503_vm7 = vweird.f32 %v3755_v25  ;;  %v2626_v32 = vand.u32 2147483647, %v5032_v18 }
0x15d9   : > { %v3759_v2 = vpop.eup %3758  ;;  %v2558_v12 = vmul.f32 %v3757_v46, %v5025_v51  ;;  %3764 = vpow2.f32 %v3349_v59  ;;  %v2628_v6 = vand.u32 2147483648, %v5032_v18  ;;  %vm2563_vm8 = vweird.f32 %v3757_v46  ;;  %vm2504_vm9 = vmor %vm2502_vm3, %vm2503_vm7 }
0x15da   : > { %v3761_v33 = vpop.eup %3760  ;;  %v2499_v36 = vsub.f32 1.0, %v2498_v61  ;;  %3766 = vrcp.f32 %v5035_v26  ;;  %v5052_v10 = vadd.f32 1.0, %v3759_v2  ;;  %v2686_v38 = vand.u32 2147483647, %v5035_v26  ;;  %v2418_v37 = vpop.f32.mrf.mxu2  ;;  %vm2564_vm12 = vmor %vm2562_vm4, %vm2563_vm8 }
0x15db   : > { %v2559_v28 = vsub.f32 1.0, %v2558_v12  ;;  %v5054_v39 = vadd.f32 1.0, %v3761_v33  ;;  %3768 = vpow2.f32 %v3353_v31  ;;  %v2688_v56 = vand.u32 2147483648, %v5035_v26  ;;  %v2428_v57 = vpop.f32.mrf.mxu3  ;;  %v2400_v48 = vpop.f32.mrf.mxu0 }
0x15dc   : > { %v2500_v62 = vmul.f32 %v3755_v25, %v2499_v36  ;;  %3770 = vrcp.f32 %v5052_v10  ;;  %vm2622_vm10 = vweird.f32 %v5032_v18  ;;  %vm2682_vm11 = vweird.f32 %v5035_v26 }
0x15dd   : > { %v2560_v19 = vmul.f32 %v3757_v46, %v2559_v28  ;;  %vm5069_vm13 = vcmp.eq.f32.partialorder %v2626_v32, 8.507059e+37  ;;  %v2629_v11 = vor.u32 1.1754944e-38, %v2628_v6  ;;  %3772 = vrcp.f32 %v5054_v39 }
0x15de   : > { %v3763_v41 = vpop.eup %3762  ;;  %v2501_v52 = vadd.f32 %v3755_v25, %v2500_v62  ;;  %vm5077_vm14 = vcmp.eq.f32.partialorder %v2686_v38, 8.507059e+37  ;;  %v2689_v4 = vor.u32 1.1754944e-38, %v2688_v56  ;;  %v2521_v8 = vand.u32 2147483647, %v5052_v10 }
0x15df   : > { %v3765_v45 = vpop.eup %3764  ;;  %v2561_v34 = vadd.f32 %v3757_v46, %v2560_v19  ;;  %v2618_v21 = vmul.f32 %v3763_v41, %v5032_v18  ;;  %v2419_v44 = vadd.f32 %v5017_v60, %v2418_v37  ;;  %vm2623_vm15 = vweird.f32 %v3763_v41  ;;  %v2410_v37 = vpop.f32.mrf.mxu1 }
0x15e0   : > { %v3767_v22 = vpop.eup %3766  ;;  %v2505_v23 = vsel %vm2504_vm9, %v3755_v25, %v2501_v52  ;;  %v5089_v47 = vadd.f32 1.0, %v3765_v45  ;;  %vm2517_vm2 = vweird.f32 %v5052_v10  ;;  %v2523_v17 = vand.u32 2147483648, %v5052_v10  ;;  %vm2624_vm3 = vmor %vm2622_vm10, %vm2623_vm15 }
0x15e1   : > { %v2510_v7 = vsel %vm5038_vm5, %v2509_v1, %v2505_v23  ;;  %v2565_v63 = vsel %vm2564_vm12, %v3757_v46, %v2561_v34  ;;  %v2619_v49 = vsub.f32 1.0, %v2618_v21  ;;  %v2678_v50 = vmul.f32 %v3767_v22, %v5035_v26  ;;  %v3769_v9 = vpop.eup %3768 }
0x15e2   : > { %2737 = vst.msk [vmem:[%s4197_s20] sm:$0xff] %vm520_vm0, %v2510_v7  ;;  %v2570_v3 = vsel %vm5044_vm6, %v2569_v40, %v2565_v63  ;;  %v3771_v42 = vpop.eup %3770  ;;  %vm2683_vm1 = vweird.f32 %v3767_v22  ;;  %3774 = vpow2.f32 %v3342_v5  ;;  %v5094_v54 = vadd.f32 1.0, %v3769_v9 }
0x15e3   : > { %2741 = vst.msk [vmem:[%s4197_s20 + $0x20] sm:$0xff] %vm520_vm0, %v2570_v3  ;;  %v2620_v29 = vmul.f32 %v3763_v41, %v2619_v49  ;;  %v2679_v51 = vsub.f32 1.0, %v2678_v50  ;;  %v2513_v30 = vmul.f32 %v3771_v42, %v5052_v10  ;;  %v3773_v58 = vpop.eup %3772  ;;  %vm5098_vm4 = vcmp.eq.f32.partialorder %v2521_v8, 8.507059e+37  ;;  %vm2684_vm6 = vmor %vm2682_vm11, %vm2683_vm1 }
0x15e4   : > { %vm2577_vm5 = vweird.f32 %v5054_v39  ;;  %v2581_v59 = vand.u32 2147483647, %v5054_v39  ;;  %3776 = vrcp.f32 %v5089_v47  ;;  %v2573_v27 = vmul.f32 %v3773_v58, %v5054_v39 }
0x15e5   : > { %v2621_v20 = vadd.f32 %v3763_v41, %v2620_v29  ;;  %v2680_v53 = vmul.f32 %v3767_v22, %v2679_v51  ;;  %v2514_v25 = vsub.f32 1.0, %v2513_v30  ;;  %vm2518_vm7 = vweird.f32 %v3771_v42 }
0x15e6   : > { %v2583_v35 = vand.u32 2147483648, %v5054_v39  ;;  %v2641_v46 = vand.u32 2147483647, %v5089_v47  ;;  %v2574_v1 = vsub.f32 1.0, %v2573_v27  ;;  %3778 = vrcp.f32 %v5094_v54  ;;  %vm2519_vm10 = vmor %vm2517_vm2, %vm2518_vm7 }
0x15e7   : > { %v2625_v14 = vsel %vm2624_vm3, %v3763_v41, %v2621_v20  ;;  %v2681_v15 = vadd.f32 %v3767_v22, %v2680_v53  ;;  %v2515_v0 = vmul.f32 %v3771_v42, %v2514_v25  ;;  %v2524_v13 = vor.u32 1.1754944e-38, %v2523_v17 }
0x15e8   : > { %v2630_v18 = vsel %vm5069_vm13, %v2629_v11, %v2625_v14  ;;  %v3775_v2 = vpop.eup %3774  ;;  %vm5118_vm8 = vcmp.eq.f32.partialorder %v2581_v59, 8.507059e+37  ;;  %v2643_v31 = vand.u32 2147483648, %v5089_v47  ;;  %v2575_v36 = vmul.f32 %v3773_v58, %v2574_v1  ;;  %v2430_v11 = vpop.f32.mrf.mxu3 }
0x15e9   : > { %2745 = vst.msk [vmem:[%s4197_s20 + $0x40] sm:$0xff] %vm520_vm0, %v2630_v18  ;;  %v2685_v61 = vsel %vm2684_vm6, %v3767_v22, %v2681_v15  ;;  %v2516_v33 = vadd.f32 %v3771_v42, %v2515_v0  ;;  %vm2578_vm9 = vweird.f32 %v3773_v58  ;;  %v5125_v40 = vadd.f32 1.0, %v3775_v2  ;;  %v2420_v22 = vpop.f32.mrf.mxu2 }
0x15ea   : > { %v2690_v12 = vsel %vm5077_vm14, %v2689_v4, %v2685_v61  ;;  %v3777_v28 = vpop.eup %3776  ;;  %v2584_v32 = vor.u32 1.1754944e-38, %v2583_v35  ;;  %vm2637_vm11 = vweird.f32 %v5089_v47  ;;  %3780 = vpow2.f32 %v5059_v16  ;;  %vm2579_vm13 = vmor %vm2577_vm5, %vm2578_vm9 }
0x15eb   : > { %2749 = vst.msk [vmem:[%s4197_s20 + $0x60] sm:$0xff] %vm520_vm0, %v2690_v12  ;;  %v3350_v5 = vmul.f32 -1.442695, %v2419_v44  ;;  %v2520_v62 = vsel %vm2519_vm10, %v3771_v42, %v2516_v33  ;;  %v2576_v6 = vadd.f32 %v3773_v58, %v2575_v36  ;;  %v2633_v19 = vmul.f32 %v3777_v28, %v5089_v47 }
0x15ec   : > { %vm5133_vm12 = vcmp.eq.f32.partialorder %v2641_v46, 8.507059e+37  ;;  %v2429_v41 = vadd.f32 %v5017_v60, %v2428_v57  ;;  %v2525_v10 = vsel %vm5098_vm4, %v2524_v13, %v2520_v62  ;;  %v2644_v52 = vor.u32 1.1754944e-38, %v2643_v31  ;;  %v3779_v16 = vpop.eup %3778 }
0x15ed   : > { %3782 = vrcp.f32 %v5125_v40  ;;  %v2401_v56 = vadd.f32 %v5017_v60, %v2400_v48  ;;  %2738 = vst.msk [vmem:[%s4197_s20 + $0x8] sm:$0xff] %vm520_vm0, %v2525_v10  ;;  %v2580_v45 = vsel %vm2579_vm13, %v3773_v58, %v2576_v6  ;;  %v2634_v34 = vsub.f32 1.0, %v2633_v19 }
0x15ee   : > { %vm2697_vm14 = vweird.f32 %v5094_v54  ;;  %v2701_v21 = vand.u32 2147483647, %v5094_v54  ;;  %v2585_v39 = vsel %vm5118_vm8, %v2584_v32, %v2580_v45  ;;  %v2693_v23 = vmul.f32 %v3779_v16, %v5094_v54 }
0x15ef   : > { %v2703_v24 = vand.u32 2147483648, %v5094_v54  ;;  %3784 = vpow2.f32 %v3350_v5  ;;  %2742 = vst.msk [vmem:[%s4197_s20 + $0x28] sm:$0xff] %vm520_vm0, %v2585_v39  ;;  %v2635_v7 = vmul.f32 %v3777_v28, %v2634_v34  ;;  %vm2638_vm15 = vweird.f32 %v3777_v28 }
0x15f0   : > { %vm2698_vm1 = vweird.f32 %v3779_v16  ;;  %v3354_v63 = vmul.f32 -1.442695, %v2429_v41  ;;  %v3781_v49 = vpop.eup %3780  ;;  %v2694_v50 = vsub.f32 1.0, %v2693_v23  ;;  %v3343_v43 = vmul.f32 -1.442695, %v2401_v56  ;;  %vm2639_vm2 = vmor %vm2637_vm11, %vm2638_vm15 }
0x15f1   : > { %v2411_v3 = vadd.f32 %v5017_v60, %v2410_v37  ;;  %v2421_v4 = vadd.f32 %v5017_v60, %v2420_v22  ;;  %v2636_v8 = vadd.f32 %v3777_v28, %v2635_v7  ;;  %v5157_v44 = vadd.f32 1.0, %v3781_v49  ;;  %vm2699_vm5 = vmor %vm2697_vm14, %vm2698_vm1 }
0x15f2   : > { %3786 = vpow2.f32 %v3354_v63  ;;  %v2431_v9 = vadd.f32 %v5017_v60, %v2430_v11  ;;  %v2695_v51 = vmul.f32 %v3779_v16, %v2694_v50  ;;  %vm5162_vm3 = vcmp.eq.f32.partialorder %v2701_v21, 8.507059e+37 }
0x15f3   : > { %v3783_v29 = vpop.eup %3782  ;;  %3788 = vpow2.f32 %v3343_v43  ;;  %v3347_v42 = vmul.f32 -1.442695, %v2411_v3  ;;  %v3351_v17 = vmul.f32 -1.442695, %v2421_v4  ;;  %v2640_v20 = vsel %vm2639_vm2, %v3777_v28, %v2636_v8 }
0x15f4   : > { %v2528_v30 = vmul.f32 %v3783_v29, %v5125_v40  ;;  %3790 = vrcp.f32 %v5157_v44  ;;  %v2645_v60 = vsel %vm5133_vm12, %v2644_v52, %v2640_v20  ;;  %v2696_v55 = vadd.f32 %v3779_v16, %v2695_v51 }
0x15f5   : > { %v3785_v58 = vpop.eup %3784  ;;  %v2704_v47 = vor.u32 1.1754944e-38, %v2703_v24  ;;  %vm2532_vm4 = vweird.f32 %v5125_v40  ;;  %2746 = vst.msk [vmem:[%s4197_s20 + $0x48] sm:$0xff] %vm520_vm0, %v2645_v60  ;;  %v2536_v57 = vand.u32 2147483647, %v5125_v40  ;;  %3792 = vpow2.f32 %v3347_v42  ;;  %v2845_v24 = vld [vmem:[%s4197_s20 + $0x60] sm:$0xff] (%p4062_p5) }
0x15f6   : > { %v2529_v59 = vsub.f32 1.0, %v2528_v30  ;;  %v5177_v14 = vadd.f32 1.0, %v3785_v58  ;;  %v2700_v15 = vsel %vm2699_vm5, %v3779_v16, %v2696_v55  ;;  %v2538_v25 = vand.u32 2147483648, %v5125_v40  ;;  %2846 = vst [vmem:[%s2762_s17 + $0xc0] sm:$0xff] (%p4062_p5), %v2845_v24 }
0x15f7   : > { %3794 = vpow2.f32 %v3351_v17  ;;  %v3355_v27 = vmul.f32 -1.442695, %v2431_v9  ;;  %v2705_v35 = vsel %vm5162_vm3, %v2704_v47, %v2700_v15  ;;  %vm2533_vm6 = vweird.f32 %v3783_v29 }
0x15f8   : > { %v3787_v18 = vpop.eup %3786  ;;  %v2530_v46 = vmul.f32 %v3783_v29, %v2529_v59  ;;  %3796 = vrcp.f32 %v5177_v14  ;;  %2750 = vst.msk [vmem:[%s4197_s20 + $0x68] sm:$0xff] %vm520_vm0, %v2705_v35  ;;  %vm2534_vm7 = vmor %vm2532_vm4, %vm2533_vm6  ;;  %v2539_v12 = vor.u32 1.1754944e-38, %v2538_v25  ;;  %vm2537_vm8 = vcmp.eq.f32.partialorder %v2536_v57, 8.507059e+37 }
0x15f9   : > { %v3789_v54 = vpop.eup %3788  ;;  %v5185_v61 = vadd.f32 1.0, %v3787_v18  ;;  %3798 = vpow2.f32 %v3355_v27  ;;  %v2596_v28 = vand.u32 2147483647, %v5157_v44  ;;  %v2598_v40 = vand.u32 2147483648, %v5157_v44 }
0x15fa   : > { %v3791_v0 = vpop.eup %3790  ;;  %v2531_v1 = vadd.f32 %v3783_v29, %v2530_v46  ;;  %v5187_v2 = vadd.f32 1.0, %v3789_v54  ;;  %vm2592_vm9 = vweird.f32 %v5157_v44  ;;  %v2656_v19 = vand.u32 2147483647, %v5177_v14 }
0x15fb   : > { %v2588_v13 = vmul.f32 %v3791_v0, %v5157_v44  ;;  %v3793_v26 = vpop.eup %3792  ;;  %3800 = vrcp.f32 %v5185_v61  ;;  %vm2593_vm10 = vweird.f32 %v3791_v0  ;;  %vm2597_vm11 = vcmp.eq.f32.partialorder %v2596_v28, 8.507059e+37 }
0x15fc   : > { %v2535_v31 = vsel %vm2534_vm7, %v3783_v29, %v2531_v1  ;;  %3802 = vrcp.f32 %v5187_v2  ;;  %v5201_v38 = vadd.f32 1.0, %v3793_v26  ;;  %vm2594_vm12 = vmor %vm2592_vm9, %vm2593_vm10  ;;  %v2599_v16 = vor.u32 1.1754944e-38, %v2598_v40 }
0x15fd   : > { %v3795_v33 = vpop.eup %3794  ;;  %v2540_v36 = vsel %vm2537_vm8, %v2539_v12, %v2535_v31  ;;  %v2589_v48 = vsub.f32 1.0, %v2588_v13  ;;  %v2658_v45 = vand.u32 2147483648, %v5177_v14  ;;  %vm2652_vm14 = vweird.f32 %v5177_v14 }
0x15fe   : > { %v3797_v32 = vpop.eup %3796  ;;  %2739 = vst.msk [vmem:[%s4197_s20 + $0x10] sm:$0xff] %vm520_vm0, %v2540_v36  ;;  %v5203_v52 = vadd.f32 1.0, %v3795_v33  ;;  %3804 = vrcp.f32 %v5201_v38  ;;  %vm5211_vm15 = vcmp.eq.f32.partialorder %v2656_v19, 8.507059e+37  ;;  %v2716_v49 = vand.u32 2147483647, %v5185_v61 }
0x15ff   : > { %v2590_v5 = vmul.f32 %v3791_v0, %v2589_v48  ;;  %v2648_v62 = vmul.f32 %v3797_v32, %v5177_v14  ;;  %v3799_v6 = vpop.eup %3798  ;;  %vm2653_vm13 = vweird.f32 %v3797_v32  ;;  %v2659_v50 = vor.u32 1.1754944e-38, %v2658_v45  ;;  %v2831_v45 = vld [vmem:[%s4197_s20 + $0x28] sm:$0xff] (%p4062_p5) }
0x1600   : > { %v5208_v39 = vadd.f32 1.0, %v3799_v6  ;;  %3806 = vrcp.f32 %v5203_v52  ;;  %vm2654_vm1 = vmor %vm2652_vm14, %vm2653_vm13  ;;  %v2718_v43 = vand.u32 2147483648, %v5185_v61  ;;  %v2553_v4 = vand.u32 2147483648, %v5187_v2  ;;  %2832 = vst [vmem:[%s2762_s17 + $0x48] sm:$0xff] (%p4062_p5), %v2831_v45 }
0x1601   : > { %v2591_v41 = vadd.f32 %v3791_v0, %v2590_v5  ;;  %v2649_v10 = vsub.f32 1.0, %v2648_v62  ;;  %v3801_v56 = vpop.eup %3800  ;;  %v2551_v42 = vand.u32 2147483647, %v5187_v2  ;;  %vm2712_vm4 = vweird.f32 %v5185_v61 }
0x1602   : > { %v3803_v34 = vpop.eup %3802  ;;  %v2708_v22 = vmul.f32 %v3801_v56, %v5185_v61  ;;  %vm2713_vm2 = vweird.f32 %v3801_v56  ;;  %3808 = vrcp.f32 %v5208_v39  ;;  %vm2717_vm5 = vcmp.eq.f32.partialorder %v2716_v49, 8.507059e+37 }
0x1603   : > { %v2595_v21 = vsel %vm2594_vm12, %v3791_v0, %v2591_v41  ;;  %v2650_v37 = vmul.f32 %v3797_v32, %v2649_v10  ;;  %v2543_v11 = vmul.f32 %v3803_v34, %v5187_v2  ;;  %vm2548_vm3 = vweird.f32 %v3803_v34  ;;  %vm2714_vm6 = vmor %vm2712_vm4, %vm2713_vm2  ;;  %v2821_v41 = vld [vmem:[%s4197_s20] sm:$0xff] (%p4062_p5)  ;;  %v2823_v10 = vld [vmem:[%s4197_s20 + $0x8] sm:$0xff] (%p4062_p5) }
0x1604   : > { %v2600_v23 = vsel %vm2597_vm11, %v2599_v16, %v2595_v21  ;;  %v2709_v63 = vsub.f32 1.0, %v2708_v22  ;;  %v3805_v9 = vpop.eup %3804  ;;  %v2719_v53 = vor.u32 1.1754944e-38, %v2718_v43  ;;  %vm2547_vm7 = vweird.f32 %v5187_v2  ;;  %2822 = vst [vmem:[%s2762_s17] sm:$0xff] (%p4062_p5), %v2821_v41  ;;  %v2829_v16 = vld [vmem:[%s4197_s20 + $0x20] sm:$0xff] (%p4062_p5)  ;;  %v2839_v22 = vld [vmem:[%s4197_s20 + $0x48] sm:$0xff] (%p4062_p5) }
0x1605   : > { %2743 = vst.msk [vmem:[%s4197_s20 + $0x30] sm:$0xff] %vm520_vm0, %v2600_v23  ;;  %v2651_v7 = vadd.f32 %v3797_v32, %v2650_v37  ;;  %v2544_v3 = vsub.f32 1.0, %v2543_v11  ;;  %v2603_v20 = vmul.f32 %v3805_v9, %v5201_v38  ;;  %v2554_v58 = vor.u32 1.1754944e-38, %v2553_v4  ;;  %vm2549_vm8 = vmor %vm2547_vm7, %vm2548_vm3  ;;  %v2837_v37 = vld [vmem:[%s4197_s20 + $0x40] sm:$0xff] (%p4062_p5)  ;;  %v2847_v11 = vld [vmem:[%s4197_s20 + $0x68] sm:$0xff] (%p4062_p5) }
0x1606   : > { %v2710_v44 = vmul.f32 %v3801_v56, %v2709_v63  ;;  %v3807_v60 = vpop.eup %3806  ;;  %v2611_v59 = vand.u32 2147483647, %v5201_v38  ;;  %v2613_v57 = vand.u32 2147483648, %v5201_v38  ;;  %vm2552_vm9 = vcmp.eq.f32.partialorder %v2551_v42, 8.507059e+37  ;;  %2824 = vst [vmem:[%s2762_s17 + $0x8] sm:$0xff] (%p4062_p5), %v2823_v10 }
0x1607   : > { %v2655_v8 = vsel %vm2654_vm1, %v3797_v32, %v2651_v7  ;;  %v2545_v51 = vmul.f32 %v3803_v34, %v2544_v3  ;;  %v2604_v47 = vsub.f32 1.0, %v2603_v20  ;;  %v2663_v25 = vmul.f32 %v3807_v60, %v5203_v52  ;;  %2830 = vst [vmem:[%s2762_s17 + $0x40] sm:$0xff] (%p4062_p5), %v2829_v16 }
0x1608   : > { %v2660_v29 = vsel %vm5211_vm15, %v2659_v50, %v2655_v8  ;;  %v2711_v17 = vadd.f32 %v3801_v56, %v2710_v44  ;;  %v3809_v27 = vpop.eup %3808  ;;  %vm2608_vm10 = vweird.f32 %v3805_v9  ;;  %vm2607_vm11 = vweird.f32 %v5201_v38  ;;  %2838 = vst [vmem:[%s2762_s17 + $0x80] sm:$0xff] (%p4062_p5), %v2837_v37 }
0x1609   : > { %2747 = vst.msk [vmem:[%s4197_s20 + $0x50] sm:$0xff] %vm520_vm0, %v2660_v29  ;;  %v2546_v30 = vadd.f32 %v3803_v34, %v2545_v51  ;;  %v2605_v35 = vmul.f32 %v3805_v9, %v2604_v47  ;;  %v2664_v46 = vsub.f32 1.0, %v2663_v25  ;;  %v2723_v54 = vmul.f32 %v3809_v27, %v5208_v39  ;;  %vm2609_vm13 = vmor %vm2607_vm11, %vm2608_vm10 }
0x160a   : > { %v2715_v55 = vsel %vm2714_vm6, %v3801_v56, %v2711_v17  ;;  %vm2612_vm12 = vcmp.eq.f32.partialorder %v2611_v59, 8.507059e+37  ;;  %v2614_v0 = vor.u32 1.1754944e-38, %v2613_v57  ;;  %v2673_v1 = vand.u32 2147483648, %v5203_v52  ;;  %2840 = vst [vmem:[%s2762_s17 + $0x88] sm:$0xff] (%p4062_p5), %v2839_v22 }
0x160b   : > { %v2720_v14 = vsel %vm2717_vm5, %v2719_v53, %v2715_v55  ;;  %v2550_v15 = vsel %vm2549_vm8, %v3803_v34, %v2546_v30  ;;  %v2606_v61 = vadd.f32 %v3805_v9, %v2605_v35  ;;  %v2665_v2 = vmul.f32 %v3807_v60, %v2664_v46  ;;  %2848 = vst [vmem:[%s2762_s17 + $0xc8] sm:$0xff] (%p4062_p5), %v2847_v11 }
0x160c   : > { %2751 = vst.msk [vmem:[%s4197_s20 + $0x70] sm:$0xff] %vm520_vm0, %v2720_v14  ;;  %v2555_v18 = vsel %vm2552_vm9, %v2554_v58, %v2550_v15  ;;  %vm2668_vm14 = vweird.f32 %v3807_v60  ;;  %v2671_v12 = vand.u32 2147483647, %v5203_v52  ;;  %v2724_v13 = vsub.f32 1.0, %v2723_v54  ;;  %v2833_v34 = vld [vmem:[%s4197_s20 + $0x30] sm:$0xff] (%p4062_p5) }
0x160d   : > { %2740 = vst.msk [vmem:[%s4197_s20 + $0x18] sm:$0xff] %vm520_vm0, %v2555_v18  ;;  %v2610_v26 = vsel %vm2609_vm13, %v3805_v9, %v2606_v61  ;;  %vm2667_vm15 = vweird.f32 %v5203_v52  ;;  %v2731_v31 = vand.u32 2147483647, %v5208_v39  ;;  %v2733_v33 = vand.u32 2147483648, %v5208_v39  ;;  %v2825_v52 = vld [vmem:[%s4197_s20 + $0x10] sm:$0xff] (%p4062_p5) }
0x160e   : > { %v2615_v36 = vsel %vm2612_vm12, %v2614_v0, %v2610_v26  ;;  %v2666_v48 = vadd.f32 %v3807_v60, %v2665_v2  ;;  %v2725_v28 = vmul.f32 %v3809_v27, %v2724_v13  ;;  %vm2728_vm1 = vweird.f32 %v3809_v27  ;;  %vm2669_vm2 = vmor %vm2667_vm15, %vm2668_vm14  ;;  %2826 = vst [vmem:[%s2762_s17 + $0x20] sm:$0xff] (%p4062_p5), %v2825_v52 }
0x160f   : > { %2744 = vst.msk [vmem:[%s4197_s20 + $0x38] sm:$0xff] %vm520_vm0, %v2615_v36  ;;  %v2674_v32 = vor.u32 1.1754944e-38, %v2673_v1  ;;  %vm2672_vm3 = vcmp.eq.f32.partialorder %v2671_v12, 8.507059e+37  ;;  %vm2727_vm4 = vweird.f32 %v5208_v39  ;;  %v2734_v6 = vor.u32 1.1754944e-38, %v2733_v33 }
0x1610   : > { %v2670_v40 = vsel %vm2669_vm2, %v3807_v60, %v2666_v48  ;;  %v2726_v5 = vadd.f32 %v3809_v27, %v2725_v28  ;;  %vm2729_vm5 = vmor %vm2727_vm4, %vm2728_vm1  ;;  %vm2732_vm6 = vcmp.eq.f32.partialorder %v2731_v31, 8.507059e+37  ;;  %2759 = sbr.rel (!%p4062_p5) target bundleno = 5661 (0x161d), region = 115  ;;  %2834 = vst [vmem:[%s2762_s17 + $0x60] sm:$0xff] (%p4062_p5), %v2833_v34  ;;  %v2841_v39 = vld [vmem:[%s4197_s20 + $0x50] sm:$0xff] (%p4062_p5) }
0x1611   : > { %v2675_v62 = vsel %vm2672_vm3, %v2674_v32, %v2670_v40  ;;  %2842 = vst [vmem:[%s2762_s17 + $0xa0] sm:$0xff] (%p4062_p5), %v2841_v39 }
0x1612   : > { %2748 = vst.msk [vmem:[%s4197_s20 + $0x58] sm:$0xff] %vm520_vm0, %v2675_v62  ;;  %v2730_v19 = vsel %vm2729_vm5, %v3809_v27, %v2726_v5 }
0x1613   : > { %v2735_v38 = vsel %vm2732_vm6, %v2734_v6, %v2730_v19  ;;  %v2849_v7 = vld [vmem:[%s4197_s20 + $0x70] sm:$0xff] (%p4062_p5) }
0x1614   : > { %2752 = vst.msk [vmem:[%s4197_s20 + $0x78] sm:$0xff] %vm520_vm0, %v2735_v38  ;;  %v2827_v56 = vld [vmem:[%s4197_s20 + $0x18] sm:$0xff] (%p4062_p5) }
0x1615   : > { %2828 = vst [vmem:[%s2762_s17 + $0x28] sm:$0xff] %v2827_v56 }
0x1616   : > { %v2835_v21 = vld [vmem:[%s4197_s20 + $0x38] sm:$0xff]  ;;  %2850 = vst [vmem:[%s2762_s17 + $0xe0] sm:$0xff] %v2849_v7 }
0x1617   : > { %2836 = vst [vmem:[%s2762_s17 + $0x68] sm:$0xff] %v2835_v21 }
0x1619   : > { %v2843_v23 = vld [vmem:[%s4197_s20 + $0x58] sm:$0xff] }
0x161a   : > { %2844 = vst [vmem:[%s2762_s17 + $0xa8] sm:$0xff] %v2843_v23 }
0x161b   : > { %v2851_v63 = vld [vmem:[%s4197_s20 + $0x78] sm:$0xff] }
0x161c   : > { %2852 = vst [vmem:[%s2762_s17 + $0xe8] sm:$0xff] %v2851_v63 }
0x161d PF: > { %p16_p12 = scmp.ge.s32.totalorder %s4049_s13, 4   ;;  %s5319_s30 = smov %s3900_s10 }
0x161e   : > { %s5320_s10 = smov %s4060_s16  ;;  %s5321_s11 = smov %s4049_s13 }
0x161f   :  { %18 = sbr.rel (!%p16_p12) target bundleno = 2 (0x2), region = 240 }

</bundles_post_ra>
